<compile_context>
chip_gen: v5e
topology: v5e:2x2
jax: 0.10.0
libtpu: 0.0.40
codegen_flags: <defaults>
</compile_context>

<pallas_src>
import jax
import jax.numpy as jnp
from jax.experimental import pallas as pl
from jax.experimental.pallas import tpu as pltpu

# Module hyper-parameters (stand-in for `param` in the original code).
DIMX = 4
DIMUA = 4
DIMUB = 3
HIDDEN = 15
K1 = DIMX + DIMUA            # linear1 input width

GROUP = 32                   # batch elements packed per 128-lane row (128/DIMX)
MAX_TILE_ROWS = 512          # 512 packed rows == 16384 batch elements per step


def brnet_kernel(x_ref, a_ref, w1x_ref, w1a_ref, b1_ref, w2_ref, b2_ref, o_ref):
    """Fused MLP forward in lane-packed layout.

    x_ref : (TR, GROUP*DIMX)              32 batch elems interleaved per row
    a_ref : (TR, GROUP*DIMUA)
    w1x_ref: (GROUP*DIMX,  GROUP*HIDDEN)  block-diag of w1[:, :DIMX].T
    w1a_ref: (GROUP*DIMUA, GROUP*HIDDEN)  block-diag of w1[:, DIMX:].T
    b1_ref : (1, GROUP*HIDDEN)            tiled bias
    w2_ref : (GROUP*HIDDEN, GROUP*DIMUB)  block-diag of w2.T
    b2_ref : (1, GROUP*DIMUB)
    o_ref  : (TR, GROUP*DIMUB)
    """
    hp = jax.lax.Precision.HIGHEST  # true-f32 MXU contraction (torch is f64)
    h = (jnp.dot(x_ref[...], w1x_ref[...],
                 preferred_element_type=jnp.float32, precision=hp)
         + jnp.dot(a_ref[...], w1a_ref[...],
                   preferred_element_type=jnp.float32, precision=hp)
         + b1_ref[...])
    h = jnp.maximum(h, 0.0)  # ReLU (VPU)
    out = jnp.dot(h, w2_ref[...],
                  preferred_element_type=jnp.float32, precision=hp) + b2_ref[...]
    o_ref[...] = out.astype(o_ref.dtype)


def prepare_params(params):
    """One-time packing of torch-layout params into lane-packed MXU weights."""
    w1 = params["w1"].astype(jnp.float32)        # (HIDDEN, K1)
    b1 = params["b1"].astype(jnp.float32)        # (HIDDEN,)
    w2 = params["w2"].astype(jnp.float32)        # (DIMUB, HIDDEN)
    b2 = params["b2"].astype(jnp.float32)        # (DIMUB,)
    eye = jnp.eye(GROUP, dtype=jnp.float32)
    return {
        # kron(I_G, M) = block-diagonal with G copies of M on the diagonal.
        "w1x": jnp.kron(eye, w1[:, :DIMX].T),    # (G*DIMX,  G*HIDDEN) = (128, 480)
        "w1a": jnp.kron(eye, w1[:, DIMX:].T),    # (G*DIMUA, G*HIDDEN) = (128, 480)
        "b1": jnp.tile(b1, GROUP)[None, :],      # (1, 480)
        "w2": jnp.kron(eye, w2.T),               # (G*HIDDEN, G*DIMUB) = (480, 96)
        "b2": jnp.tile(b2, GROUP)[None, :],      # (1, 96)
    }


def _round_up(n, m):
    return ((n + m - 1) // m) * m


@jax.jit
def brnet_forward(x, a, kparams):
    """Matches BRNet1.forward semantics.

    x: (B, dimx) or (dimx,);  a: (B, dimua) or (dimua,)
    returns (B, dimub) or (dimub,) accordingly.
    """
    squeeze = x.ndim == 1
    if squeeze:  # torch.cat((x, a), dim=0) path -> batch of 1
        x = x[None, :]
        a = a[None, :]
    B = x.shape[0]
    x = x.astype(jnp.float32)
    a = a.astype(jnp.float32)

    # Tail-pad the batch to the packing granule.  Small batches pad to a full
    # (8, 128) sublane tile (copy is negligible); large batches pad only to
    # GROUP and let Pallas handle the ragged last block (garbage rows are
    # row-independent and never written back to the valid region).
    pad_to = GROUP * 8 if B <= MAX_TILE_ROWS * GROUP else GROUP
    Bp = _round_up(B, pad_to)
    if Bp != B:
        x = jnp.pad(x, ((0, Bp - B), (0, 0)))
        a = jnp.pad(a, ((0, Bp - B), (0, 0)))
    rows = Bp // GROUP
    x_r = x.reshape(rows, GROUP * DIMX)    # free bitcast: batch packed on lanes
    a_r = a.reshape(rows, GROUP * DIMUA)

    # Up to 16384 batch elems per grid step, but keep >= 2 steps whenever the
    # batch allows it so both v7x TensorCores get work.
    tile_rows = min(MAX_TILE_ROWS, max(8, _round_up(pl.cdiv(rows, 2), 8)))
    n_tiles = pl.cdiv(rows, tile_rows)

    out_r = pl.pallas_call(
        brnet_kernel,
        out_shape=jax.ShapeDtypeStruct((rows, GROUP * DIMUB), jnp.float32),
        grid=(n_tiles,),
        in_specs=[
            # streamed batch tiles (double-buffered by the pipeline)
            pl.BlockSpec((tile_rows, GROUP * DIMX), lambda i: (i, 0)),
            pl.BlockSpec((tile_rows, GROUP * DIMUA), lambda i: (i, 0)),
            # packed weights/biases: constant index_map -> resident in VMEM
            pl.BlockSpec((GROUP * DIMX, GROUP * HIDDEN), lambda i: (0, 0)),
            pl.BlockSpec((GROUP * DIMUA, GROUP * HIDDEN), lambda i: (0, 0)),
            pl.BlockSpec((1, GROUP * HIDDEN), lambda i: (0, 0)),
            pl.BlockSpec((GROUP * HIDDEN, GROUP * DIMUB), lambda i: (0, 0)),
            pl.BlockSpec((1, GROUP * DIMUB), lambda i: (0, 0)),
        ],
        out_specs=pl.BlockSpec((tile_rows, GROUP * DIMUB), lambda i: (i, 0)),
        compiler_params=pltpu.CompilerParams(
            dimension_semantics=("parallel",)),
        cost_estimate=pl.CostEstimate(
            flops=2 * Bp * (K1 * HIDDEN + HIDDEN * DIMUB),
            bytes_accessed=4 * Bp * (K1 + DIMUB),
            transcendentals=0),
    )(x_r, a_r, kparams["w1x"], kparams["w1a"], kparams["b1"],
      kparams["w2"], kparams["b2"])

    out = out_r.reshape(Bp, DIMUB)[:B]  # free reshape back to (B, dimub)
    if squeeze:
        out = out[0]
    return out


def init_params(key):
    """Deterministic init mirroring BRNet1.__init__ (normal, mean=0, std=0.1)."""
    k1, k2, k3, k4 = jax.random.split(key, 4)
    w1 = 0.1 * jax.random.normal(k1, (HIDDEN, K1), dtype=jnp.float32)
    b1 = 0.1 * jax.random.normal(k2, (HIDDEN,), dtype=jnp.float32)
    w2 = 0.1 * jax.random.normal(k3, (DIMUB, HIDDEN), dtype=jnp.float32)
    b2 = 0.1 * jax.random.normal(k4, (DIMUB,), dtype=jnp.float32)
    return {"w1": w1, "b1": b1, "w2": w2, "b2": b2}


def reference_forward(x, a, params):
    """Plain-JAX reference (full-f32 dots) for correctness checking."""
    hp = jax.lax.Precision.HIGHEST
    y = jnp.concatenate((x, a), axis=-1)
    h = jnp.maximum(jnp.dot(y, params["w1"].T, precision=hp) + params["b1"], 0.0)
    return jnp.dot(h, params["w2"].T, precision=hp) + params["b2"]


if __name__ == "__main__":
    key = jax.random.PRNGKey(0)
    kp, kx, ka, kx2, ka2 = jax.random.split(key, 5)

    params = init_params(kp)
    kparams = prepare_params(params)   # lane-packed weights, built once

    # Small batch (matches the original example usage).
    B = 2
    x = jax.random.normal(kx, (B, DIMX), dtype=jnp.float32)
    a = jax.random.normal(ka, (B, DIMUA), dtype=jnp.float32)
    out = jax.block_until_ready(brnet_forward(x, a, kparams))
    ref = reference_forward(x, a, params)
    assert out.shape == (B, DIMUB)
    assert jnp.allclose(out, ref, atol=1e-5, rtol=1e-5), (out, ref)

    # Multi-tile + ragged batch (exercises the 2-step grid and tail padding).
    B2 = 600  # not a multiple of the 32-element packing granule
    x2 = jax.random.normal(kx2, (B2, DIMX), dtype=jnp.float32)
    a2 = jax.random.normal(ka2, (B2, DIMUA), dtype=jnp.float32)
    out2 = jax.block_until_ready(brnet_forward(x2, a2, kparams))
    ref2 = reference_forward(x2, a2, params)
    assert out2.shape == (B2, DIMUB)
    assert jnp.allclose(out2, ref2, atol=1e-5, rtol=1e-5)

    # 1-D (single sample) branch of forward().
    out1 = jax.block_until_ready(brnet_forward(x[0], a[0], kparams))
    assert out1.shape == (DIMUB,)
    assert jnp.allclose(out1, ref[0], atol=1e-5, rtol=1e-5)

    print("KERNEL_OK")
</pallas_src>

<mosaic_0001>
module attributes {stable_mosaic.version = 11 : i64} {
  func.func @brnet_kernel(%arg0: i32, %arg1: memref<8x128xf32, #tpu.memory_space<vmem>>, %arg2: memref<8x128xf32, #tpu.memory_space<vmem>>, %arg3: memref<128x480xf32, #tpu.memory_space<vmem>>, %arg4: memref<128x480xf32, #tpu.memory_space<vmem>>, %arg5: memref<1x480xf32, #tpu.memory_space<vmem>>, %arg6: memref<480x96xf32, #tpu.memory_space<vmem>>, %arg7: memref<1x96xf32, #tpu.memory_space<vmem>>, %arg8: memref<8x96xf32, #tpu.memory_space<vmem>>) attributes {dimension_semantics = [#tpu.dimension_semantics<parallel>], iteration_bounds = array<i64: 1>, scalar_prefetch = 0 : i64, scratch_operands = 0 : i64, tpu.core_type = #tpu.core_type<tc>, window_params = [{transform_indices = @transform_0, window_bounds = array<i64: 8, 128>}, {transform_indices = @transform_1, window_bounds = array<i64: 8, 128>}, {pipeline_mode = #tpu.pipeline_mode<synchronous>, transform_indices = @transform_2, window_bounds = array<i64: 128, 480>}, {pipeline_mode = #tpu.pipeline_mode<synchronous>, transform_indices = @transform_3, window_bounds = array<i64: 128, 480>}, {pipeline_mode = #tpu.pipeline_mode<synchronous>, transform_indices = @transform_4, window_bounds = array<i64: 1, 480>}, {pipeline_mode = #tpu.pipeline_mode<synchronous>, transform_indices = @transform_5, window_bounds = array<i64: 480, 96>}, {pipeline_mode = #tpu.pipeline_mode<synchronous>, transform_indices = @transform_6, window_bounds = array<i64: 1, 96>}, {transform_indices = @transform_7, window_bounds = array<i64: 8, 96>}]} {
    %c0 = arith.constant 0 : index
    %c0_0 = arith.constant 0 : index
    %0 = vector.load %arg1[%c0, %c0_0] : memref<8x128xf32, #tpu.memory_space<vmem>>, vector<8x128xf32>
    %c0_1 = arith.constant 0 : index
    %c0_2 = arith.constant 0 : index
    %1 = vector.load %arg3[%c0_1, %c0_2] : memref<128x480xf32, #tpu.memory_space<vmem>>, vector<128x480xf32>
    %cst = arith.constant dense<0.000000e+00> : vector<8x480xf32>
    %2 = tpu.matmul %0, %1, %cst {dimension_numbers = #tpu.dot_dimension_numbers<[1], [0], [0], [1], [0, 0, 1, 1], [], []>, precision = #tpu.contract_precision<fp32>} : vector<8x128xf32>, vector<128x480xf32>, vector<8x480xf32> -> vector<8x480xf32>
    %c0_3 = arith.constant 0 : index
    %c0_4 = arith.constant 0 : index
    %3 = vector.load %arg2[%c0_3, %c0_4] : memref<8x128xf32, #tpu.memory_space<vmem>>, vector<8x128xf32>
    %c0_5 = arith.constant 0 : index
    %c0_6 = arith.constant 0 : index
    %4 = vector.load %arg4[%c0_5, %c0_6] : memref<128x480xf32, #tpu.memory_space<vmem>>, vector<128x480xf32>
    %cst_7 = arith.constant dense<0.000000e+00> : vector<8x480xf32>
    %5 = tpu.matmul %3, %4, %cst_7 {dimension_numbers = #tpu.dot_dimension_numbers<[1], [0], [0], [1], [0, 0, 1, 1], [], []>, precision = #tpu.contract_precision<fp32>} : vector<8x128xf32>, vector<128x480xf32>, vector<8x480xf32> -> vector<8x480xf32>
    %6 = arith.addf %2, %5 : vector<8x480xf32>
    %c0_8 = arith.constant 0 : index
    %c0_9 = arith.constant 0 : index
    %7 = vector.load %arg5[%c0_8, %c0_9] : memref<1x480xf32, #tpu.memory_space<vmem>>, vector<1x480xf32>
    %8 = vector.broadcast %7 : vector<1x480xf32> to vector<8x480xf32>
    %9 = arith.addf %6, %8 : vector<8x480xf32>
    %cst_10 = arith.constant 0.000000e+00 : f32
    %10 = vector.broadcast %cst_10 : f32 to vector<8x480xf32>
    %11 = arith.maximumf %9, %10 : vector<8x480xf32>
    %c0_11 = arith.constant 0 : index
    %c0_12 = arith.constant 0 : index
    %12 = vector.load %arg6[%c0_11, %c0_12] : memref<480x96xf32, #tpu.memory_space<vmem>>, vector<480x96xf32>
    %cst_13 = arith.constant dense<0.000000e+00> : vector<8x96xf32>
    %13 = tpu.matmul %11, %12, %cst_13 {dimension_numbers = #tpu.dot_dimension_numbers<[1], [0], [0], [1], [0, 0, 1, 1], [], []>, precision = #tpu.contract_precision<fp32>} : vector<8x480xf32>, vector<480x96xf32>, vector<8x96xf32> -> vector<8x96xf32>
    %c0_14 = arith.constant 0 : index
    %c0_15 = arith.constant 0 : index
    %14 = vector.load %arg7[%c0_14, %c0_15] : memref<1x96xf32, #tpu.memory_space<vmem>>, vector<1x96xf32>
    %15 = vector.broadcast %14 : vector<1x96xf32> to vector<8x96xf32>
    %16 = arith.addf %13, %15 : vector<8x96xf32>
    %c0_16 = arith.constant 0 : index
    %c0_17 = arith.constant 0 : index
    %17 = vector.load %arg8[%c0_16, %c0_17] : memref<8x96xf32, #tpu.memory_space<vmem>>, vector<8x96xf32>
    tpu.vector_store %arg8[%c0_16, %c0_17], %16 {strides = array<i32>} : memref<8x96xf32, #tpu.memory_space<vmem>>, vector<8x96xf32>,
    return
  }
  func.func @transform_0(%arg0: i32) -> (i32, i32) {
    %c0_i32 = arith.constant 0 : i32
    %c0_i32_0 = arith.constant 0 : i32
    return %arg0, %c0_i32 : i32, i32
  }
  func.func @transform_1(%arg0: i32) -> (i32, i32) {
    %c0_i32 = arith.constant 0 : i32
    %c0_i32_0 = arith.constant 0 : i32
    return %arg0, %c0_i32 : i32, i32
  }
  func.func @transform_2(%arg0: i32) -> (i32, i32) {
    %c0_i32 = arith.constant 0 : i32
    %c0_i32_0 = arith.constant 0 : i32
    %c0_i32_1 = arith.constant 0 : i32
    return %c0_i32, %c0_i32_0 : i32, i32
  }
  func.func @transform_3(%arg0: i32) -> (i32, i32) {
    %c0_i32 = arith.constant 0 : i32
    %c0_i32_0 = arith.constant 0 : i32
    %c0_i32_1 = arith.constant 0 : i32
    return %c0_i32, %c0_i32_0 : i32, i32
  }
  func.func @transform_4(%arg0: i32) -> (i32, i32) {
    %c0_i32 = arith.constant 0 : i32
    %c0_i32_0 = arith.constant 0 : i32
    %c0_i32_1 = arith.constant 0 : i32
    return %c0_i32, %c0_i32_0 : i32, i32
  }
  func.func @transform_5(%arg0: i32) -> (i32, i32) {
    %c0_i32 = arith.constant 0 : i32
    %c0_i32_0 = arith.constant 0 : i32
    %c0_i32_1 = arith.constant 0 : i32
    return %c0_i32, %c0_i32_0 : i32, i32
  }
  func.func @transform_6(%arg0: i32) -> (i32, i32) {
    %c0_i32 = arith.constant 0 : i32
    %c0_i32_0 = arith.constant 0 : i32
    %c0_i32_1 = arith.constant 0 : i32
    return %c0_i32, %c0_i32_0 : i32, i32
  }
  func.func @transform_7(%arg0: i32) -> (i32, i32) {
    %c0_i32 = arith.constant 0 : i32
    %c0_i32_0 = arith.constant 0 : i32
    return %arg0, %c0_i32 : i32, i32
  }
}

</mosaic_0001>

<bundles_post_ra>
// kernel: brnet_forward.1
= control target key start
LH: loop header
LB: loop body
LE: loop exit
PB: predicated region body
PF: predicated region fallthrough
CT: control target
= control target key end

     0   :  { %vm2966_vm0 = vcmask 785408   ;;  %s7917_s3 = inlined_call_operand.vmem [shape: f32[128,480], index: 3, kind: input, shape index: {}]   ;;  %s7918_s1 = inlined_call_operand.vmem [shape: f32[8,128], index: 1, kind: input, shape index: {}]   ;;  %s7919_s2 = inlined_call_operand.vmem [shape: f32[128,480], index: 2, kind: input, shape index: {}]   ;;  %s7920_s0 = inlined_call_operand.vmem [shape: f32[8,128], index: 0, kind: input, shape index: {}]   ;;  %s7921_s5 = inlined_call_operand.vmem [shape: f32[480,96], index: 5, kind: input, shape index: {}]   ;;  %s7922_s4 = inlined_call_operand.vmem [shape: f32[1,480], index: 4, kind: input, shape index: {}]   ;;  %s7923_s6 = inlined_call_operand.vmem [shape: f32[1,96], index: 6, kind: input, shape index: {}]   ;;  %s7924_s7 = inlined_call_operand.vmem [shape: f32[8,96], index: 7, kind: output, shape index: {}]  }
   0x1   :  { %v152_v0 = vld [vmem:[%s7917_s3 + $0x1e0] sm:$0xff]  ;;  %v153_v56 = vld [vmem:[%s7917_s3 + $0x1e8] sm:$0xff] }
   0x2   :  { %v148_v1 = vld [vmem:[%s7917_s3 + $0x1c0] sm:$0xff]  ;;  %v4338_v3 = vand.u32 4294901760, %v152_v0  ;;  %v149_v60 = vld [vmem:[%s7917_s3 + $0x1c8] sm:$0xff] }
   0x3   :  { %v144_v2 = vld [vmem:[%s7917_s3 + $0x1a0] sm:$0xff]  ;;  %v4340_v4 = vand.u32 4294901760, %v148_v1 }
   0x4   :  { %v4342_v5 = vand.u32 4294901760, %v144_v2  ;;  %v140_v6 = vld [vmem:[%s7917_s3 + $0x180] sm:$0xff]  ;;  %157 = vmatpush.msra.mxu0 %v4338_v3  ;;  %353 = vmatpush.msra.mxu3 %v4338_v3  ;;  %v4368_v14 = vsub.f32 %v152_v0, %v4338_v3 }
   0x5   :  { %v136_v7 = vld [vmem:[%s7917_s3 + $0x160] sm:$0xff]  ;;  %v4353_v9 = vand.u32 4294901760, %v140_v6  ;;  %v4371_v15 = vsub.f32 %v148_v1, %v4340_v4 }
   0x6   :  { %v132_v8 = vld [vmem:[%s7917_s3 + $0x140] sm:$0xff]  ;;  %v4355_v10 = vand.u32 4294901760, %v136_v7  ;;  %v4374_v16 = vsub.f32 %v144_v2, %v4342_v5  ;;  %159 = vmatpush.msra.mxu0 %v4340_v4  ;;  %300 = vmatpush.msra.mxu2 %v4368_v14  ;;  %v7939_v23 = vand.u32 4294901760, %v4368_v14 }
   0x7   :  { %v4357_v11 = vand.u32 4294901760, %v132_v8  ;;  %v128_v12 = vld [vmem:[%s7917_s3 + $0x120] sm:$0xff]  ;;  %v4382_v19 = vsub.f32 %v140_v6, %v4353_v9  ;;  %v7938_v24 = vand.u32 4294901760, %v4371_v15  ;;  %355 = vmatpush.msra.mxu3 %v4340_v4  ;;  %v4499_v6 = vand.u32 4294901760, %v153_v56 }
   0x8   :  { %v124_v13 = vld [vmem:[%s7917_s3 + $0x100] sm:$0xff]  ;;  %v4376_v17 = vand.u32 4294901760, %v128_v12  ;;  %v4385_v20 = vsub.f32 %v136_v7, %v4355_v10  ;;  %v7937_v25 = vand.u32 4294901760, %v4374_v16  ;;  %161 = vmatpush.msra.mxu0 %v4342_v5  ;;  %303 = vmatpush.msra.mxu2 %v4371_v15  ;;  %v200_v30 = vsub.f32 %v4368_v14, %v7939_v23  ;;  %v145_v7 = vld [vmem:[%s7917_s3 + $0x1a8] sm:$0xff] }
   0x9   :  { %v120_v18 = vld [vmem:[%s7917_s3 + $0xe0] sm:$0xff]  ;;  %v4388_v21 = vsub.f32 %v132_v8, %v4357_v11  ;;  %v4390_v22 = vand.u32 4294901760, %v124_v13  ;;  %v7935_v26 = vand.u32 4294901760, %v4382_v19  ;;  %v206_v31 = vsub.f32 %v4371_v15, %v7938_v24  ;;  %357 = vmatpush.msra.mxu3 %v4342_v5 }
   0xa   :  { %v4400_v27 = vsub.f32 %v128_v12, %v4376_v17  ;;  %v4402_v28 = vand.u32 4294901760, %v120_v18  ;;  %v116_v29 = vld [vmem:[%s7917_s3 + $0xc0] sm:$0xff]  ;;  %v212_v32 = vsub.f32 %v4374_v16, %v7937_v25  ;;  %v7934_v33 = vand.u32 4294901760, %v4385_v20  ;;  %163 = vmatpush.msra.mxu0 %v4353_v9  ;;  %306 = vmatpush.msra.mxu2 %v4374_v16  ;;  %v117_v25 = vld [vmem:[%s7917_s3 + $0xc8] sm:$0xff] }
   0xb   :  { %v4421_v34 = vsub.f32 %v124_v13, %v4390_v22  ;;  %v7933_v35 = vand.u32 4294901760, %v4388_v21  ;;  %v112_v36 = vld [vmem:[%s7917_s3 + $0xa0] sm:$0xff]  ;;  %v201_v37 = vand.u32 4294901760, %v200_v30  ;;  %v207_v38 = vand.u32 4294901760, %v206_v31  ;;  %359 = vmatpush.msra.mxu3 %v4353_v9 }
   0xc   :  { %v218_v39 = vsub.f32 %v4382_v19, %v7935_v26  ;;  %v4432_v40 = vand.u32 4294901760, %v116_v29  ;;  %v4436_v41 = vsub.f32 %v120_v18, %v4402_v28  ;;  %v7930_v42 = vand.u32 4294901760, %v4400_v27  ;;  %v108_v43 = vld [vmem:[%s7917_s3 + $0x80] sm:$0xff]  ;;  %165 = vmatpush.msra.mxu0 %v4355_v10  ;;  %309 = vmatpush.msra.mxu2 %v4382_v19  ;;  %v121_v26 = vld [vmem:[%s7917_s3 + $0xe8] sm:$0xff] }
   0xd   :  { %202 = vmatpush.msra.mxu1 %v201_v37  ;;  %v213_v44 = vand.u32 4294901760, %v212_v32  ;;  %v224_v45 = vsub.f32 %v4385_v20, %v7934_v33  ;;  %v4446_v46 = vand.u32 4294901760, %v112_v36  ;;  %361 = vmatpush.msra.mxu3 %v4355_v10  ;;  %v230_v47 = vsub.f32 %v4388_v21, %v7933_v35  ;;  %v104_v49 = vld [vmem:[%s7917_s3 + $0x60] sm:$0xff] }
   0xe   :  { %v7929_v48 = vand.u32 4294901760, %v4421_v34  ;;  %167 = vmatpush.msra.mxu0 %v4357_v11  ;;  %v219_v50 = vand.u32 4294901760, %v218_v39  ;;  %v4459_v51 = vsub.f32 %v116_v29, %v4432_v40  ;;  %v4461_v52 = vand.u32 4294901760, %v108_v43  ;;  %312 = vmatpush.msra.mxu2 %v4385_v20  ;;  %v100_v55 = vld [vmem:[%s7917_s3 + $0x40] sm:$0xff] }
   0xf   :  { %208 = vmatpush.msra.mxu1 %v207_v38  ;;  %363 = vmatpush.msra.mxu3 %v4357_v11  ;;  %v236_v53 = vsub.f32 %v4400_v27, %v7930_v42  ;;  %v7927_v54 = vand.u32 4294901760, %v4436_v41  ;;  %v225_v57 = vand.u32 4294901760, %v224_v45  ;;  %v4477_v58 = vsub.f32 %v112_v36, %v4446_v46  ;;  %v96_v63 = vld [vmem:[%s7917_s3 + $0x20] sm:$0xff]  ;;  %v141_v36 = vld [vmem:[%s7917_s3 + $0x188] sm:$0xff] }
  0x10   :  { %169 = vmatpush.msra.mxu0 %v4376_v17  ;;  %v4479_v59 = vand.u32 4294901760, %v104_v49  ;;  %315 = vmatpush.msra.mxu2 %v4388_v21  ;;  %v231_v61 = vand.u32 4294901760, %v230_v47  ;;  %v242_v62 = vsub.f32 %v4421_v34, %v7929_v48  ;;  %v4494_v0 = vsub.f32 %v108_v43, %v4461_v52  ;;  %v92_v13 = vld [vmem:[%s7917_s3] sm:$0xff]  ;;  %v137_v47 = vld [vmem:[%s7917_s3 + $0x168] sm:$0xff] }
  0x11   :  { %214 = vmatpush.msra.mxu1 %v213_v44  ;;  %365 = vmatpush.msra.mxu3 %v4376_v17  ;;  %v4496_v1 = vand.u32 4294901760, %v100_v55  ;;  %v7926_v2 = vand.u32 4294901760, %v4459_v51  ;;  %v237_v8 = vand.u32 4294901760, %v236_v53  ;;  %v248_v12 = vsub.f32 %v4436_v41, %v7927_v54 }
  0x12   :  { %171 = vmatpush.msra.mxu0 %v4390_v22  ;;  %318 = vmatpush.msra.mxu2 %v4400_v27  ;;  %v4512_v18 = vand.u32 4294901760, %v149_v60  ;;  %v4516_v29 = vsub.f32 %v104_v49, %v4479_v59  ;;  %v4518_v30 = vand.u32 4294901760, %v96_v63  ;;  %v7925_v31 = vand.u32 4294901760, %v4477_v58 }
  0x13   :  { %220 = vmatpush.msra.mxu1 %v219_v50  ;;  %8096 = vst [vmem:[#allocation2_spill] sm:$0xff] %v4496_v1  ;;  %367 = vmatpush.msra.mxu3 %v4390_v22  ;;  %v4522_v32 = vsub.f32 %v153_v56, %v4499_v6  ;;  %v243_v37 = vand.u32 4294901760, %v242_v62  ;;  %v4529_v38 = vand.u32 4294901760, %v145_v7  ;;  %v254_v39 = vsub.f32 %v4459_v51, %v7926_v2 }
  0x14   :  { %173 = vmatpush.msra.mxu0 %v4402_v28  ;;  %8097 = vst [vmem:[#allocation3_spill] sm:$0xff] %v4518_v30  ;;  %321 = vmatpush.msra.mxu2 %v4421_v34  ;;  %v4536_v43 = vsub.f32 %v100_v55, %v4496_v1  ;;  %v4538_v44 = vand.u32 4294901760, %v92_v13  ;;  %v7928_v45 = vand.u32 4294901760, %v4494_v0  ;;  %v249_v49 = vand.u32 4294901760, %v248_v12 }
  0x15   :  { %226 = vmatpush.msra.mxu1 %v225_v57  ;;  %369 = vmatpush.msra.mxu3 %v4402_v28  ;;  %v4547_v50 = vsub.f32 %v149_v60, %v4512_v18  ;;  %v4549_v53 = vand.u32 4294901760, %v141_v36  ;;  %v260_v55 = vsub.f32 %v4477_v58, %v7925_v31  ;;  %v4556_v56 = vsub.f32 %v96_v63, %v4518_v30  ;;  %v133_v60 = vld [vmem:[%s7917_s3 + $0x148] sm:$0xff] }
  0x16   :  { %175 = vmatpush.msra.mxu0 %v4432_v40  ;;  %8098 = vst [vmem:[#allocation4_spill] sm:$0xff] %v4538_v44  ;;  %324 = vmatpush.msra.mxu2 %v4436_v41  ;;  %v7931_v57 = vand.u32 4294901760, %v4522_v32  ;;  %v4566_v62 = vsub.f32 %v145_v7, %v4529_v38  ;;  %v255_v63 = vand.u32 4294901760, %v254_v39  ;;  %v266_v12 = vsub.f32 %v4494_v0, %v7928_v45  ;;  %v129_v7 = vld [vmem:[%s7917_s3 + $0x128] sm:$0xff] }
  0x17   :  { %232 = vmatpush.msra.mxu1 %v231_v61  ;;  %371 = vmatpush.msra.mxu3 %v4432_v40  ;;  %8099 = vst [vmem:[#allocation5_spill] sm:$0xff] %v4547_v50  ;;  %v7932_v61 = vand.u32 4294901760, %v4516_v29  ;;  %v4575_v31 = vsub.f32 %v92_v13, %v4538_v44  ;;  %v7936_v2 = vand.u32 4294901760, %v4536_v43  ;;  %v4585_v39 = vsub.f32 %v141_v36, %v4549_v53  ;;  %v125_v36 = vld [vmem:[%s7917_s3 + $0x108] sm:$0xff] }
  0x18   :  { %177 = vmatpush.msra.mxu0 %v4446_v46  ;;  %327 = vmatpush.msra.mxu2 %v4459_v51  ;;  %8100 = vst [vmem:[#allocation6_spill] sm:$0xff] %v4566_v62  ;;  %v4587_v54 = vand.u32 4294901760, %v133_v60  ;;  %v261_v13 = vand.u32 4294901760, %v260_v55  ;;  %v541_v45 = vsub.f32 %v4522_v32, %v7931_v57  ;;  %v7941_v42 = vand.u32 4294901760, %v4556_v56 }
  0x19   :  { %238 = vmatpush.msra.mxu1 %v237_v8  ;;  %373 = vmatpush.msra.mxu3 %v4446_v46  ;;  %v4568_v8 = vand.u32 4294901760, %v137_v47  ;;  %v272_v48 = vsub.f32 %v4516_v29, %v7932_v61  ;;  %v4606_v57 = vand.u32 4294901760, %v129_v7  ;;  %v267_v61 = vand.u32 4294901760, %v266_v12 }
  0x1a   :  { %179 = vmatpush.msra.mxu0 %v4461_v52  ;;  %330 = vmatpush.msra.mxu2 %v4477_v58  ;;  %v278_v35 = vsub.f32 %v4536_v43, %v7936_v2  ;;  %v4623_v12 = vsub.f32 %v133_v60, %v4587_v54  ;;  %v4625_v2 = vand.u32 4294901760, %v125_v36  ;;  %v542_v24 = vand.u32 4294901760, %v541_v45 }
  0x1b   :  { %244 = vmatpush.msra.mxu1 %v243_v37  ;;  %375 = vmatpush.msra.mxu3 %v4461_v52  ;;  %v7940_v37 = vand.u32 4294901760, %v4547_v50  ;;  %v4604_v55 = vsub.f32 %v137_v47, %v4568_v8  ;;  %v273_v23 = vand.u32 4294901760, %v272_v48  ;;  %v4641_v33 = vsub.f32 %v129_v7, %v4606_v57  ;;  %v113_v48 = vld [vmem:[%s7917_s3 + $0xa8] sm:$0xff] }
  0x1c   :  { %181 = vmatpush.msra.mxu0 %v4479_v59  ;;  %333 = vmatpush.msra.mxu2 %v4494_v0  ;;  %v279_v45 = vand.u32 4294901760, %v278_v35  ;;  %v8103_v35 = vand.u32 4294901760, %v4368_v14 }
  0x1d   :  { %250 = vmatpush.msra.mxu1 %v249_v49  ;;  %377 = vmatpush.msra.mxu3 %v4479_v59  ;;  %v7943_v49 = vand.u32 4294901760, %v4566_v62  ;;  %v547_v47 = vsub.f32 %v4547_v50, %v7940_v37  ;;  %v284_v37 = vsub.f32 %v4556_v56, %v7941_v42  ;;  %v8101_v42 = vand.u32 4294901760, %v4575_v31 }
  0x1e   :  { %183 = vmatpush.msra.mxu0 %v4496_v1  ;;  %336 = vmatpush.msra.mxu2 %v4516_v29  ;;  %v4665_v50 = vand.u32 4294901760, %v113_v48 }
  0x1f   :  { %256 = vmatpush.msra.mxu1 %v255_v63  ;;  %379 = vmatpush.msra.mxu3 %v4496_v1  ;;  %v553_v60 = vsub.f32 %v4566_v62, %v7943_v49  ;;  %v4652_v49 = vand.u32 4294901760, %v117_v25  ;;  %v548_v7 = vand.u32 4294901760, %v547_v47  ;;  %v8102_v63 = vand.u32 4294901760, %v4585_v39  ;;  %v109_v47 = vld [vmem:[%s7917_s3 + $0x88] sm:$0xff] }
  0x20   :  { %185 = vmatpush.msra.mxu0 %v4518_v30  ;;  %339 = vmatpush.msra.mxu2 %v4536_v43  ;;  %v8104_v1 = vand.u32 4294901760, %v4604_v55 }
  0x21   :  { %262 = vmatpush.msra.mxu1 %v261_v13  ;;  %381 = vmatpush.msra.mxu3 %v4518_v30  ;;  %v4643_v13 = vand.u32 4294901760, %v121_v26  ;;  %v290_v30 = vsub.f32 %v4575_v31, %v8101_v42  ;;  %v559_v62 = vsub.f32 %v4585_v39, %v8102_v63  ;;  %v285_v42 = vand.u32 4294901760, %v284_v37 }
  0x22   :  { %187 = vmatpush.msra.mxu0 %v4538_v44  ;;  %342 = vmatpush.msra.mxu2 %v4556_v56  ;;  %v554_v63 = vand.u32 4294901760, %v553_v60  ;;  %v105_v60 = vld [vmem:[%s7917_s3 + $0x68] sm:$0xff] }
  0x23   :  { %268 = vmatpush.msra.mxu1 %v267_v61  ;;  %383 = vmatpush.msra.mxu3 %v4538_v44  ;;  %v4661_v61 = vsub.f32 %v125_v36, %v4625_v2  ;;  %v565_v36 = vsub.f32 %v4604_v55, %v8104_v1  ;;  %v7950_v44 = vand.u32 4294901760, %v4641_v33  ;;  %v4676_v14 = vsub.f32 %v121_v26, %v4643_v13 }
  0x24   :  { %394 = vmatpush.msrb.mxu0 %v8103_v35  ;;  %345 = vmatpush.msra.mxu2 %v4575_v31  ;;  %v291_v37 = vand.u32 4294901760, %v290_v30  ;;  %v560_v1 = vand.u32 4294901760, %v559_v62  ;;  %v8106_v35 = vand.u32 4294901760, %v4623_v12  ;;  %v8107_v30 = vand.u32 4294901760, %v4374_v16  ;;  %v101_v62 = vld [vmem:[%s7917_s3 + $0x48] sm:$0xff] }
  0x25   :  { %543 = vmatpush.msrb.mxu3 %v542_v24  ;;  %274 = vmatpush.msra.mxu1 %v273_v23  ;;  %v8105_v24 = vand.u32 4294901760, %v4371_v15  ;;  %v4682_v23 = vsub.f32 %v117_v25, %v4652_v49  ;;  %v7952_v15 = vand.u32 4294901760, %v4661_v61  ;;  %v4697_v25 = vsub.f32 %v113_v48, %v4665_v50 }
  0x26   :  { %498 = vmatpush.msrb.mxu2 %v4499_v6  ;;  %v571_v26 = vsub.f32 %v4623_v12, %v8106_v35  ;;  %v7951_v35 = vand.u32 4294901760, %v4676_v14  ;;  %v4706_v16 = vand.u32 4294901760, %v105_v60 }
  0x27   :  { %398 = vmatpush.msrb.mxu0 %v8105_v24  ;;  %549 = vmatpush.msrb.mxu3 %v548_v7  ;;  %v4691_v24 = vand.u32 4294901760, %v109_v47  ;;  %v577_v7 = vsub.f32 %v4641_v33, %v7950_v44 }
  0x28   :  { %280 = vmatpush.msra.mxu1 %v279_v45  ;;  %500 = vmatpush.msrb.mxu2 %v4512_v18  ;;  %v566_v45 = vand.u32 4294901760, %v565_v36  ;;  %v583_v36 = vsub.f32 %v4661_v61, %v7952_v15 }
  0x29   :  { %402 = vmatpush.msrb.mxu0 %v8107_v30  ;;  %555 = vmatpush.msrb.mxu3 %v554_v63  ;;  %v8108_v30 = vand.u32 4294901760, %v4382_v19  ;;  %v572_v63 = vand.u32 4294901760, %v571_v26  ;;  %v4719_v44 = vsub.f32 %v109_v47, %v4691_v24  ;;  %v4721_v19 = vand.u32 4294901760, %v101_v62 }
  0x2a   :  { %286 = vmatpush.msra.mxu1 %v285_v42  ;;  %502 = vmatpush.msrb.mxu2 %v4529_v38  ;;  %v97_v42 = vld [vmem:[%s7917_s3 + $0x28] sm:$0xff]  ;;  %v589_v47 = vsub.f32 %v4676_v14, %v7951_v35  ;;  %v4735_v26 = vsub.f32 %v105_v60, %v4706_v16  ;;  %v584_v60 = vand.u32 4294901760, %v583_v36 }
  0x2b   :  { %406 = vmatpush.msrb.mxu0 %v8108_v30  ;;  %561 = vmatpush.msrb.mxu3 %v560_v1  ;;  %v8109_v30 = vand.u32 4294901760, %v4385_v20  ;;  %v578_v1 = vand.u32 4294901760, %v577_v7  ;;  %v4737_v20 = vand.u32 4294901760, %v97_v42  ;;  %v606_v35 = vand.u32 4294901760, %v4719_v44 }
  0x2c   :  { %292 = vmatpush.msra.mxu1 %v291_v37  ;;  %v93_v37 = vld [vmem:[%s7917_s3 + $0x8] sm:$0xff]  ;;  %504 = vmatpush.msrb.mxu2 %v4549_v53  ;;  %v4751_v15 = vsub.f32 %v101_v62, %v4721_v19  ;;  %v612_v62 = vand.u32 4294901760, %v4735_v26 }
  0x2d   :  { %410 = vmatpush.msrb.mxu0 %v8109_v30  ;;  %567 = vmatpush.msrb.mxu3 %v566_v45  ;;  %v8110_v30 = vand.u32 4294901760, %v4388_v21  ;;  %v8111_v45 = vand.u32 4294901760, %v4682_v23  ;;  %v4753_v48 = vand.u32 4294901760, %v93_v37  ;;  %v8112_v21 = vand.u32 4294901760, %v4400_v27 }
  0x2e   :  { %461 = vmatpush.msrb.mxu1 %v4338_v3  ;;  %v91_v3 = vld [vmem:[%s7918_s1] sm:$0xff]  ;;  %506 = vmatpush.msrb.mxu2 %v4568_v8  ;;  %v8115_v27 = vand.u32 4294901760, %v4421_v34 }
  0x2f   :  { %414 = vmatpush.msrb.mxu0 %v8110_v30  ;;  %v595_v7 = vsub.f32 %v4682_v23, %v8111_v45  ;;  %573 = vmatpush.msrb.mxu3 %v572_v63  ;;  %v590_v30 = vand.u32 4294901760, %v589_v47  ;;  %v8114_v63 = vand.u32 4294901760, %v4697_v25  ;;  %v4766_v45 = vsub.f32 %v97_v42, %v4737_v20 }
  0x30   :  { %463 = vmatpush.msrb.mxu1 %v4340_v4  ;;  %v4758_v4 = vand.u32 4294901760, %v91_v3  ;;  %508 = vmatpush.msrb.mxu2 %v4587_v54  ;;  %v618_v47 = vand.u32 4294901760, %v4751_v15  ;;  %v8116_v42 = vand.u32 4294901760, %v4436_v41 }
  0x31   :  { %418 = vmatpush.msrb.mxu0 %v8112_v21  ;;  %579 = vmatpush.msrb.mxu3 %v578_v1  ;;  %v601_v36 = vsub.f32 %v4697_v25, %v8114_v63  ;;  %v607_v1 = vsub.f32 %v4719_v44, %v606_v35  ;;  %v4777_v21 = vsub.f32 %v93_v37, %v4753_v48  ;;  %v8118_v37 = vand.u32 4294901760, %v4459_v51 }
  0x32   :  { %465 = vmatpush.msrb.mxu1 %v4342_v5  ;;  %8113 = vst [vmem:[#allocation7_spill] sm:$0xff] %v4758_v4  ;;  %510 = vmatpush.msrb.mxu2 %v4606_v57  ;;  %v596_v5 = vand.u32 4294901760, %v595_v7  ;;  %v613_v7 = vsub.f32 %v4735_v26, %v612_v62  ;;  %v619_v41 = vsub.f32 %v4751_v15, %v618_v47 }
  0x33   :  { %422 = vmatpush.msrb.mxu0 %v8115_v27  ;;  %585 = vmatpush.msrb.mxu3 %v584_v60  ;;  %v602_v34 = vand.u32 4294901760, %v601_v36  ;;  %v624_v60 = vand.u32 4294901760, %v4766_v45  ;;  %v8120_v36 = vand.u32 4294901760, %v4494_v0  ;;  %v8121_v27 = vand.u32 4294901760, %v4516_v29 }
  0x34   :  { %467 = vmatpush.msrb.mxu1 %v4353_v9  ;;  %v4783_v9 = vsub.f32 %v91_v3, %v4758_v4  ;;  %512 = vmatpush.msrb.mxu2 %v4625_v2  ;;  %v630_v3 = vand.u32 4294901760, %v4777_v21  ;;  %v8122_v0 = vand.u32 4294901760, %v4536_v43  ;;  %v8123_v29 = vand.u32 4294901760, %v4556_v56  ;;  %v8132_v56 = vld [vmem:[#allocation4_spill] sm:$0xff] }
  0x35   :  { %426 = vmatpush.msrb.mxu0 %v8116_v42  ;;  %591 = vmatpush.msrb.mxu3 %v590_v30  ;;  %v8119_v30 = vand.u32 4294901760, %v4477_v58  ;;  %v625_v63 = vsub.f32 %v4766_v45, %v624_v60  ;;  %v8124_v42 = vand.u32 4294901760, %v4575_v31  ;;  %v8128_v31 = vld [vmem:[#allocation6_spill] sm:$0xff] }
  0x36   :  { %469 = vmatpush.msrb.mxu1 %v4355_v10  ;;  %8117 = vst [vmem:[#allocation8_spill] sm:$0xff] %v4783_v9  ;;  %514 = vmatpush.msrb.mxu2 %v4643_v13  ;;  %v608_v10 = vand.u32 4294901760, %v607_v1  ;;  %v4802_v51 = vand.u32 4294901760, %v4783_v9  ;;  %v631_v58 = vsub.f32 %v4777_v21, %v630_v3 }
  0x37   :  { %430 = vmatpush.msrb.mxu0 %v8118_v37  ;;  %597 = vmatpush.msrb.mxu3 %v596_v5 }
  0x38   :  { %471 = vmatpush.msrb.mxu1 %v4357_v11  ;;  %516 = vmatpush.msrb.mxu2 %v4652_v49  ;;  %v614_v11 = vand.u32 4294901760, %v613_v7  ;;  %v191_v5 = vsub.f32 %v4783_v9, %v4802_v51  ;;  %v632_v1 = vand.u32 4294901760, %v631_v58  ;;  %v8134_v7 = vand.u32 4294901760, %v4604_v55 }
  0x39   :  { %434 = vmatpush.msrb.mxu0 %v8119_v30  ;;  %603 = vmatpush.msrb.mxu3 %v602_v34  ;;  %v8133_v34 = vand.u32 4294901760, %v4585_v39 }
  0x3a   :  { %473 = vmatpush.msrb.mxu1 %v4376_v17  ;;  %518 = vmatpush.msrb.mxu2 %v4665_v50  ;;  %v620_v17 = vand.u32 4294901760, %v619_v41  ;;  %v122_v41 = vld [vmem:[%s7917_s3 + $0xf0] sm:$0xff] }
  0x3b   :  { %438 = vmatpush.msrb.mxu0 %v8120_v36  ;;  %609 = vmatpush.msrb.mxu3 %v608_v10 }
  0x3c   :  { %475 = vmatpush.msrb.mxu1 %v4390_v22  ;;  %520 = vmatpush.msrb.mxu2 %v4691_v24  ;;  %v626_v22 = vand.u32 4294901760, %v625_v63  ;;  %v118_v63 = vld [vmem:[%s7917_s3 + $0xd0] sm:$0xff] }
  0x3d   :  { %442 = vmatpush.msrb.mxu0 %v8121_v27  ;;  %615 = vmatpush.msrb.mxu3 %v614_v11 }
  0x3e   :  { %477 = vmatpush.msrb.mxu1 %v4402_v28  ;;  %522 = vmatpush.msrb.mxu2 %v4706_v16  ;;  %v4828_v28 = vand.u32 4294901760, %v191_v5  ;;  %v114_v5 = vld [vmem:[%s7917_s3 + $0xb0] sm:$0xff] }
  0x3f   :  { %446 = vmatpush.msrb.mxu0 %v8122_v0  ;;  %621 = vmatpush.msrb.mxu3 %v620_v17  ;;  %v5017_v17 = vand.u32 4294901760, %v122_v41  ;;  %v5032_v0 = vand.u32 4294901760, %v118_v63 }
  0x40   :  { %479 = vmatpush.msrb.mxu1 %v4432_v40  ;;  %524 = vmatpush.msrb.mxu2 %v4721_v19  ;;  %v8125_v40 = vld [vmem:[#allocation5_spill] sm:$0xff] }
  0x41   :  { %450 = vmatpush.msrb.mxu0 %v8123_v29  ;;  %627 = vmatpush.msrb.mxu3 %v626_v22  ;;  %v8129_v43 = vand.u32 4294901760, %v8125_v40  ;;  %v110_v29 = vld [vmem:[%s7917_s3 + $0x90] sm:$0xff] }
  0x42   :  { %481 = vmatpush.msrb.mxu1 %v4446_v46  ;;  %526 = vmatpush.msrb.mxu2 %v4737_v20  ;;  %v8126_v46 = vand.u32 4294901760, %v4522_v32 }
  0x43   :  { %454 = vmatpush.msrb.mxu0 %v8124_v42  ;;  %633 = vmatpush.msrb.mxu3 %v632_v1 }
  0x44   :  { %483 = vmatpush.msrb.mxu1 %v4461_v52  ;;  %193 = vmatmul.f32.vlgmr.msra.gmra.mxu0 %v4828_v28  ;;  %v8127_v52 = vld [vmem:[#allocation2_spill] sm:$0xff] }
  0x45   :  { %387 = vmatmul.f32.vlgmr.msra.gmra.mxu3 %v4802_v51  ;;  %641 = vmatpush.msra.mxu0 %v4522_v32  ;;  %v8131_v32 = vand.u32 4294901760, %v8128_v31 }
  0x46   :  { %802 = vmatpush.msra.mxu3 %v4499_v6  ;;  %485 = vmatpush.msrb.mxu1 %v4479_v59  ;;  %v8130_v59 = vld [vmem:[#allocation3_spill] sm:$0xff] }
  0x47   :  { %528 = vmatpush.msrb.mxu2 %v4753_v48  ;;  %644 = vmatpush.msra.mxu0 %v8125_v40 }
  0x48   :  { %348 = vmatmul.f32.vlgmr.msra.gmra.mxu2 %v4783_v9  ;;  %804 = vmatpush.msra.mxu3 %v4512_v18 }
  0x49   :  { %735 = vmatpush.msra.mxu2 %v8126_v46  ;;  %487 = vmatpush.msrb.mxu1 %v8127_v52  ;;  %v5047_v46 = vsub.f32 %v122_v41, %v5017_v17  ;;  %v5049_v52 = vand.u32 4294901760, %v114_v5 }
  0x4a   :  { %647 = vmatpush.msra.mxu0 %v8128_v31  ;;  %806 = vmatpush.msra.mxu3 %v4529_v38 }
  0x4b   :  { %739 = vmatpush.msra.mxu2 %v8129_v43  ;;  %489 = vmatpush.msrb.mxu1 %v8130_v59  ;;  %v155_v43 = vld [vmem:[%s7917_s3 + $0x1f8] sm:$0xff] }
  0x4c   :  { %650 = vmatpush.msra.mxu0 %v4585_v39  ;;  %294 = vmatmul.f32.vlgmr.msra.gmra.mxu1 %v4758_v4 }
  0x4d   :  { %743 = vmatpush.msra.mxu2 %v8131_v32  ;;  %808 = vmatpush.msra.mxu3 %v4549_v53 }
  0x4e   :  { %491 = vmatpush.msrb.mxu1 %v8132_v56  ;;  %653 = vmatpush.msra.mxu0 %v4604_v55  ;;  %v8140_v55 = vand.u32 4294901760, %v4697_v25  ;;  %v5062_v56 = vsub.f32 %v118_v63, %v5032_v0 }
  0x4f   :  { %747 = vmatpush.msra.mxu2 %v8133_v34  ;;  %810 = vmatpush.msra.mxu3 %v4568_v8  ;;  %v5064_v34 = vand.u32 4294901760, %v110_v29 }
  0x50   :  { %694 = vmatpush.msra.mxu1 %v4499_v6  ;;  %656 = vmatpush.msra.mxu0 %v4623_v12  ;;  %v8135_v6 = vand.u32 4294901760, %v4623_v12  ;;  %v146_v12 = vld [vmem:[%s7917_s3 + $0x1b0] sm:$0xff] }
  0x51   :  { %751 = vmatpush.msra.mxu2 %v8134_v7  ;;  %812 = vmatpush.msra.mxu3 %v4587_v54  ;;  %v106_v7 = vld [vmem:[%s7917_s3 + $0x70] sm:$0xff] }
  0x52   :  { %696 = vmatpush.msra.mxu1 %v4512_v18  ;;  %456 = vmatmul.f32.vlgmr.msrb.gmra.mxu0 %v4758_v4  ;;  %v8136_v18 = vand.u32 4294901760, %v4641_v33 }
  0x53   :  { %659 = vmatpush.msra.mxu0 %v4641_v33  ;;  %755 = vmatpush.msra.mxu2 %v8135_v6  ;;  %v154_v33 = vld [vmem:[%s7917_s3 + $0x1f0] sm:$0xff] }
  0x54   :  { %698 = vmatpush.msra.mxu1 %v4529_v38  ;;  %814 = vmatpush.msra.mxu3 %v4606_v57  ;;  %v8137_v38 = vand.u32 4294901760, %v4661_v61  ;;  %v4898_v39 = vand.u32 4294901760, %v154_v33 }
  0x55   :  { %493 = vmatmul.f32.vlgmr.msrb.gmra.mxu1 %v4758_v4  ;;  %662 = vmatpush.msra.mxu0 %v4661_v61 }
  0x56   :  { %700 = vmatpush.msra.mxu1 %v4549_v53  ;;  %759 = vmatpush.msra.mxu2 %v8136_v18  ;;  %v8138_v53 = vand.u32 4294901760, %v4676_v14  ;;  %v151_v18 = vld [vmem:[%s7917_s3 + $0x1d8] sm:$0xff] }
  0x57   :  { %816 = vmatpush.msra.mxu3 %v4625_v2  ;;  %665 = vmatpush.msra.mxu0 %v4676_v14 }
  0x58   :  { %702 = vmatpush.msra.mxu1 %v4568_v8  ;;  %763 = vmatpush.msra.mxu2 %v8137_v38  ;;  %v8139_v8 = vand.u32 4294901760, %v4682_v23 }
  0x59   :  { %818 = vmatpush.msra.mxu3 %v4643_v13  ;;  %668 = vmatpush.msra.mxu0 %v4682_v23 }
  0x5a   :  { %704 = vmatpush.msra.mxu1 %v4587_v54  ;;  %767 = vmatpush.msra.mxu2 %v8138_v53  ;;  %v150_v54 = vld [vmem:[%s7917_s3 + $0x1d0] sm:$0xff]  ;;  %v7954_v53 = vand.u32 4294901760, %v5047_v46 }
  0x5b   :  { %820 = vmatpush.msra.mxu3 %v4652_v49  ;;  %671 = vmatpush.msra.mxu0 %v4697_v25 }
  0x5c   :  { %706 = vmatpush.msra.mxu1 %v4606_v57  ;;  %771 = vmatpush.msra.mxu2 %v8139_v8  ;;  %v4910_v57 = vand.u32 4294901760, %v150_v54  ;;  %v102_v8 = vld [vmem:[%s7917_s3 + $0x50] sm:$0xff]  ;;  %v930_v63 = vsub.f32 %v5047_v46, %v7954_v53 }
  0x5d   :  { %822 = vmatpush.msra.mxu3 %v4665_v50  ;;  %674 = vmatpush.msra.mxu0 %v4719_v44  ;;  %v4929_v44 = vand.u32 4294901760, %v146_v12  ;;  %v5109_v41 = vand.u32 4294901760, %v102_v8 }
  0x5e   :  { %708 = vmatpush.msra.mxu1 %v4625_v2  ;;  %775 = vmatpush.msra.mxu2 %v8140_v55  ;;  %v4919_v2 = vsub.f32 %v154_v33, %v4898_v39  ;;  %v4934_v61 = vsub.f32 %v150_v54, %v4910_v57  ;;  %v5079_v33 = vsub.f32 %v114_v5, %v5049_v52  ;;  %v5085_v54 = vand.u32 4294901760, %v155_v43  ;;  %v94_v5 = vld [vmem:[%s7917_s3 + $0x10] sm:$0xff] }
  0x5f   :  { %824 = vmatpush.msra.mxu3 %v4691_v24  ;;  %677 = vmatpush.msra.mxu0 %v4735_v26  ;;  %8142 = vst [vmem:[#allocation2_spill] sm:$0xff] %v5109_v41 }
  0x60   :  { %710 = vmatpush.msra.mxu1 %v4643_v13  ;;  %779 = vmatpush.msra.mxu2 %v606_v35  ;;  %v142_v13 = vld [vmem:[%s7917_s3 + $0x190] sm:$0xff]  ;;  %v7964_v23 = vand.u32 4294901760, %v4919_v2 }
  0x61   :  { %826 = vmatpush.msra.mxu3 %v4706_v16  ;;  %680 = vmatpush.msra.mxu0 %v4751_v15  ;;  %v4942_v14 = vand.u32 4294901760, %v142_v13  ;;  %v4954_v15 = vsub.f32 %v146_v12, %v4929_v44  ;;  %v130_v35 = vld [vmem:[%s7917_s3 + $0x130] sm:$0xff]  ;;  %v5092_v12 = vand.u32 4294901760, %v106_v7 }
  0x62   :  { %712 = vmatpush.msra.mxu1 %v4652_v49  ;;  %783 = vmatpush.msra.mxu2 %v612_v62  ;;  %v138_v49 = vld [vmem:[%s7917_s3 + $0x170] sm:$0xff]  ;;  %v882_v26 = vsub.f32 %v4919_v2, %v7964_v23 }
  0x63   :  { %828 = vmatpush.msra.mxu3 %v4721_v19  ;;  %683 = vmatpush.msra.mxu0 %v4766_v45  ;;  %v4956_v25 = vand.u32 4294901760, %v138_v49  ;;  %v4970_v62 = vsub.f32 %v142_v13, %v4942_v14  ;;  %v7962_v37 = vand.u32 4294901760, %v4954_v15  ;;  %8141 = vst [vmem:[#allocation5_spill] sm:$0xff] %v5092_v12  ;;  %v98_v13 = vld [vmem:[%s7917_s3 + $0x30] sm:$0xff] }
  0x64   :  { %714 = vmatpush.msra.mxu1 %v4665_v50  ;;  %787 = vmatpush.msra.mxu2 %v618_v47  ;;  %v134_v50 = vld [vmem:[%s7917_s3 + $0x150] sm:$0xff] }
  0x65   :  { %830 = vmatpush.msra.mxu3 %v4737_v20  ;;  %686 = vmatpush.msra.mxu0 %v4777_v21  ;;  %v4972_v45 = vand.u32 4294901760, %v134_v50  ;;  %v126_v47 = vld [vmem:[%s7917_s3 + $0x110] sm:$0xff]  ;;  %v894_v36 = vsub.f32 %v4954_v15, %v7962_v37 }
  0x66   :  { %716 = vmatpush.msra.mxu1 %v4691_v24  ;;  %791 = vmatpush.msra.mxu2 %v624_v60  ;;  %v7963_v24 = vand.u32 4294901760, %v4934_v61  ;;  %v4980_v60 = vand.u32 4294901760, %v130_v35  ;;  %v4993_v10 = vand.u32 4294901760, %v126_v47 }
  0x67   :  { %832 = vmatpush.msra.mxu3 %v4753_v48  ;;  %839 = vmatpush.msrb.mxu0 %v4898_v39  ;;  %v5001_v30 = vsub.f32 %v134_v50, %v4972_v45  ;;  %v895_v42 = vand.u32 4294901760, %v894_v36  ;;  %v5099_v50 = vsub.f32 %v110_v29, %v5064_v34  ;;  %v5118_v36 = vand.u32 4294901760, %v98_v13 }
  0x68   :  { %635 = vmatmul.f32.vlgmr.msrb.gmra.mxu3 %v4758_v4  ;;  %718 = vmatpush.msra.mxu1 %v4706_v16  ;;  %v4985_v16 = vsub.f32 %v138_v49, %v4956_v25  ;;  %v888_v21 = vsub.f32 %v4934_v61, %v7963_v24  ;;  %v5007_v11 = vsub.f32 %v130_v35, %v4980_v60  ;;  %v7953_v35 = vand.u32 4294901760, %v5062_v56 }
  0x69   :  { %1035 = vmatpush.msrb.mxu3 %v4898_v39  ;;  %795 = vmatpush.msra.mxu2 %v630_v3  ;;  %v883_v3 = vand.u32 4294901760, %v882_v26  ;;  %v5023_v27 = vsub.f32 %v126_v47, %v4993_v10  ;;  %v7958_v1 = vand.u32 4294901760, %v5001_v30  ;;  %v5102_v26 = vand.u32 4294901760, %v151_v18  ;;  %v147_v47 = vld [vmem:[%s7917_s3 + $0x1b8] sm:$0xff]  ;;  %8143 = vst [vmem:[#allocation6_spill] sm:$0xff] %v5118_v36 }
  0x6a   :  { %841 = vmatpush.msrb.mxu0 %v4910_v57  ;;  %534 = vmatmul.f32.vlgmr.msrb.gmra.mxu2 %v4828_v28  ;;  %v7959_v58 = vand.u32 4294901760, %v4985_v16 }
  0x6b   :  { %1037 = vmatpush.msrb.mxu3 %v4910_v57  ;;  %982 = vmatpush.msrb.mxu2 %v4919_v2  ;;  %v7955_v31 = vand.u32 4294901760, %v5023_v27  ;;  %v912_v32 = vsub.f32 %v5001_v30, %v7958_v1 }
  0x6c   :  { %720 = vmatpush.msra.mxu1 %v4721_v19  ;;  %843 = vmatpush.msrb.mxu0 %v4929_v44  ;;  %v7960_v19 = vand.u32 4294901760, %v4970_v62  ;;  %v906_v40 = vsub.f32 %v4985_v16, %v7959_v58 }
  0x6d   :  { %1039 = vmatpush.msrb.mxu3 %v4929_v44  ;;  %985 = vmatpush.msrb.mxu2 %v4934_v61  ;;  %v924_v55 = vsub.f32 %v5023_v27, %v7955_v31  ;;  %v913_v49 = vand.u32 4294901760, %v912_v32  ;;  %v5140_v32 = vsub.f32 %v151_v18, %v5102_v26  ;;  %v931_v18 = vand.u32 4294901760, %v930_v63 }
  0x6e   :  { %722 = vmatpush.msra.mxu1 %v4737_v20  ;;  %845 = vmatpush.msrb.mxu0 %v4942_v14  ;;  %v889_v20 = vand.u32 4294901760, %v888_v21  ;;  %v900_v22 = vsub.f32 %v4970_v62, %v7960_v19  ;;  %v907_v38 = vand.u32 4294901760, %v906_v40  ;;  %v5132_v40 = vand.u32 4294901760, %v147_v47 }
  0x6f   :  { %1041 = vmatpush.msrb.mxu3 %v4942_v14  ;;  %988 = vmatpush.msrb.mxu2 %v4954_v15  ;;  %v925_v29 = vand.u32 4294901760, %v924_v55  ;;  %8144 = vst [vmem:[#allocation3_spill] sm:$0xff] %v5140_v32  ;;  %v5152_v55 = vand.u32 4294901760, %v94_v5  ;;  %v7967_v1 = vand.u32 4294901760, %v5140_v32 }
  0x70   :  { %724 = vmatpush.msra.mxu1 %v4753_v48  ;;  %847 = vmatpush.msrb.mxu0 %v4956_v25  ;;  %v7957_v48 = vand.u32 4294901760, %v5007_v11  ;;  %v901_v59 = vand.u32 4294901760, %v900_v22  ;;  %v5125_v22 = vsub.f32 %v155_v43, %v5085_v54  ;;  %v7961_v43 = vand.u32 4294901760, %v5099_v50 }
  0x71   :  { %991 = vmatpush.msrb.mxu2 %v4970_v62  ;;  %1043 = vmatpush.msrb.mxu3 %v4956_v25  ;;  %8145 = vst [vmem:[#allocation4_spill] sm:$0xff] %v5152_v55  ;;  %v5169_v63 = vsub.f32 %v147_v47, %v5132_v40  ;;  %v5187_v47 = vsub.f32 %v94_v5, %v5152_v55 }
  0x72   :  { %884 = vmatpush.msrb.mxu1 %v883_v3  ;;  %797 = vmatmul.f32.vlgmr.msra.gmra.mxu2 %v4758_v4  ;;  %v918_v6 = vsub.f32 %v5007_v11, %v7957_v48  ;;  %v143_v3 = vld [vmem:[%s7917_s3 + $0x198] sm:$0xff]  ;;  %v7965_v53 = vand.u32 4294901760, %v5125_v22  ;;  %v948_v48 = vsub.f32 %v5099_v50, %v7961_v43 }
  0x73   :  { %849 = vmatpush.msrb.mxu0 %v4972_v45  ;;  %994 = vmatpush.msrb.mxu2 %v4985_v16  ;;  %8146 = vst [vmem:[#allocation9_spill] sm:$0xff] %v5169_v63 }
  0x74   :  { %890 = vmatpush.msrb.mxu1 %v889_v20  ;;  %1045 = vmatpush.msrb.mxu3 %v4972_v45  ;;  %v919_v21 = vand.u32 4294901760, %v918_v6  ;;  %v7956_v20 = vand.u32 4294901760, %v5079_v33  ;;  %v5142_v6 = vand.u32 4294901760, %v143_v3  ;;  %v1223_v43 = vsub.f32 %v5125_v22, %v7965_v53 }
  0x75   :  { %689 = vmatmul.f32.vlgmr.msra.gmra.mxu0 %v4783_v9  ;;  %834 = vmatmul.f32.vlgmr.msra.gmra.mxu3 %v4758_v4  ;;  %v1229_v53 = vsub.f32 %v5140_v32, %v7967_v1 }
  0x76   :  { %851 = vmatpush.msrb.mxu0 %v4980_v60  ;;  %896 = vmatpush.msrb.mxu1 %v895_v42  ;;  %v5130_v42 = vsub.f32 %v106_v7, %v5092_v12  ;;  %v139_v7 = vld [vmem:[%s7917_s3 + $0x178] sm:$0xff]  ;;  %v5182_v58 = vsub.f32 %v143_v3, %v5142_v6  ;;  %v1224_v37 = vand.u32 4294901760, %v1223_v43 }
  0x77   :  { %997 = vmatpush.msrb.mxu2 %v5001_v30  ;;  %1047 = vmatpush.msrb.mxu3 %v4980_v60  ;;  %v5171_v31 = vand.u32 4294901760, %v139_v7 }
  0x78   :  { %728 = vmatmul.f32.vlgmr.msra.gmra.mxu1 %v4802_v51  ;;  %853 = vmatpush.msrb.mxu0 %v4993_v10  ;;  %8147 = vst [vmem:[#allocation10_spill] sm:$0xff] %v5182_v58 }
  0x79   :  { %902 = vmatpush.msrb.mxu1 %v901_v59  ;;  %1000 = vmatpush.msrb.mxu2 %v5007_v11  ;;  %v936_v59 = vsub.f32 %v5062_v56, %v7953_v35  ;;  %v5159_v35 = vsub.f32 %v98_v13, %v5118_v36  ;;  %v131_v13 = vld [vmem:[%s7917_s3 + $0x138] sm:$0xff] }
  0x7a   :  { %1049 = vmatpush.msrb.mxu3 %v4993_v10  ;;  %855 = vmatpush.msrb.mxu0 %v5017_v17  ;;  %v5200_v5 = vand.u32 4294901760, %v131_v13 }
  0x7b   :  { %908 = vmatpush.msrb.mxu1 %v907_v38  ;;  %1003 = vmatpush.msrb.mxu2 %v5023_v27  ;;  %v5150_v38 = vsub.f32 %v102_v8, %v5109_v41  ;;  %v135_v8 = vld [vmem:[%s7917_s3 + $0x158] sm:$0xff]  ;;  %v8149_v23 = vand.u32 4294901760, %v5159_v35 }
  0x7c   :  { %1051 = vmatpush.msrb.mxu3 %v5017_v17  ;;  %857 = vmatpush.msrb.mxu0 %v5032_v0  ;;  %v5235_v32 = vsub.f32 %v131_v13, %v5200_v5  ;;  %v8151_v13 = vand.u32 4294901760, %v5182_v58 }
  0x7d   :  { %914 = vmatpush.msrb.mxu1 %v913_v49  ;;  %1006 = vmatpush.msrb.mxu2 %v5047_v46  ;;  %v942_v49 = vsub.f32 %v5079_v33, %v7956_v20  ;;  %v937_v20 = vand.u32 4294901760, %v936_v59  ;;  %v127_v59 = vld [vmem:[%s7917_s3 + $0x118] sm:$0xff]  ;;  %v966_v4 = vsub.f32 %v5159_v35, %v8149_v23  ;;  %v1230_v23 = vand.u32 4294901760, %v1229_v53 }
  0x7e   :  { %1053 = vmatpush.msrb.mxu3 %v5032_v0  ;;  %859 = vmatpush.msrb.mxu0 %v5049_v52  ;;  %v5216_v19 = vand.u32 4294901760, %v127_v59  ;;  %v1241_v9 = vsub.f32 %v5182_v58, %v8151_v13 }
  0x7f   :  { %920 = vmatpush.msrb.mxu1 %v919_v21  ;;  %1009 = vmatpush.msrb.mxu2 %v5062_v56  ;;  %v7966_v21 = vand.u32 4294901760, %v5130_v42  ;;  %v943_v3 = vand.u32 4294901760, %v942_v49  ;;  %v949_v49 = vand.u32 4294901760, %v948_v48  ;;  %v967_v13 = vand.u32 4294901760, %v966_v4 }
  0x80   :  { %1055 = vmatpush.msrb.mxu3 %v5049_v52  ;;  %861 = vmatpush.msrb.mxu0 %v5064_v34  ;;  %v8155_v4 = vand.u32 4294901760, %v4934_v61 }
  0x81   :  { %926 = vmatpush.msrb.mxu1 %v925_v29  ;;  %1012 = vmatpush.msrb.mxu2 %v5079_v33  ;;  %v5190_v29 = vand.u32 4294901760, %v135_v8  ;;  %v954_v24 = vsub.f32 %v5130_v42, %v7966_v21  ;;  %v123_v21 = vld [vmem:[%s7917_s3 + $0xf8] sm:$0xff] }
  0x82   :  { %1057 = vmatpush.msrb.mxu3 %v5064_v34  ;;  %863 = vmatpush.msrb.mxu0 %v5092_v12 }
  0x83   :  { %932 = vmatpush.msrb.mxu1 %v931_v18  ;;  %1015 = vmatpush.msrb.mxu2 %v5099_v50  ;;  %v5209_v18 = vsub.f32 %v139_v7, %v5171_v31  ;;  %v8148_v7 = vand.u32 4294901760, %v5150_v38  ;;  %v5228_v1 = vsub.f32 %v135_v8, %v5190_v29  ;;  %v955_v8 = vand.u32 4294901760, %v954_v24  ;;  %v115_v24 = vld [vmem:[%s7917_s3 + $0xb8] sm:$0xff] }
  0x84   :  { %1059 = vmatpush.msrb.mxu3 %v5092_v12  ;;  %865 = vmatpush.msrb.mxu0 %v5109_v41  ;;  %v5253_v12 = vsub.f32 %v127_v59, %v5216_v19  ;;  %v8153_v59 = vand.u32 4294901760, %v4919_v2  ;;  %v5279_v2 = vand.u32 4294901760, %v115_v24 }
  0x85   :  { %938 = vmatpush.msrb.mxu1 %v937_v20  ;;  %1018 = vmatpush.msrb.mxu2 %v5130_v42  ;;  %v960_v48 = vsub.f32 %v5150_v38, %v8148_v7  ;;  %v119_v7 = vld [vmem:[%s7917_s3 + $0xd8] sm:$0xff]  ;;  %v8150_v20 = vand.u32 4294901760, %v5169_v63 }
  0x86   :  { %1061 = vmatpush.msrb.mxu3 %v5109_v41  ;;  %867 = vmatpush.msrb.mxu0 %v5118_v36  ;;  %v5246_v41 = vand.u32 4294901760, %v123_v21 }
  0x87   :  { %944 = vmatpush.msrb.mxu1 %v943_v3  ;;  %1021 = vmatpush.msrb.mxu2 %v5150_v38  ;;  %v1235_v43 = vsub.f32 %v5169_v63, %v8150_v20  ;;  %v961_v20 = vand.u32 4294901760, %v960_v48  ;;  %v8152_v3 = vand.u32 4294901760, %v5187_v47 }
  0x88   :  { %1063 = vmatpush.msrb.mxu3 %v5118_v36  ;;  %869 = vmatpush.msrb.mxu0 %v5152_v55  ;;  %v5264_v36 = vand.u32 4294901760, %v119_v7  ;;  %v5277_v63 = vsub.f32 %v123_v21, %v5246_v41  ;;  %v8156_v21 = vand.u32 4294901760, %v5228_v1 }
  0x89   :  { %950 = vmatpush.msrb.mxu1 %v949_v49  ;;  %1024 = vmatpush.msrb.mxu2 %v5159_v35  ;;  %v972_v53 = vsub.f32 %v5187_v47, %v8152_v3  ;;  %v1236_v48 = vand.u32 4294901760, %v1235_v43  ;;  %v8154_v3 = vand.u32 4294901760, %v5209_v18  ;;  %v107_v43 = vld [vmem:[%s7917_s3 + $0x78] sm:$0xff] }
  0x8a   :  { %1065 = vmatpush.msrb.mxu3 %v5152_v55  ;;  %1076 = vmatpush.msra.mxu0 %v8153_v59  ;;  %v111_v55 = vld [vmem:[%s7917_s3 + $0x98] sm:$0xff]  ;;  %v5292_v58 = vsub.f32 %v119_v7, %v5264_v36 }
  0x8b   :  { %956 = vmatpush.msrb.mxu1 %v955_v8  ;;  %1027 = vmatpush.msrb.mxu2 %v5187_v47  ;;  %v1247_v49 = vsub.f32 %v5209_v18, %v8154_v3  ;;  %v7982_v8 = vand.u32 4294901760, %v5253_v12  ;;  %v973_v59 = vand.u32 4294901760, %v972_v53  ;;  %v1253_v3 = vsub.f32 %v5228_v1, %v8156_v21  ;;  %v95_v7 = vld [vmem:[%s7917_s3 + $0x18] sm:$0xff] }
  0x8c   :  { %1225 = vmatpush.msra.mxu3 %v1224_v37  ;;  %1080 = vmatpush.msra.mxu0 %v8155_v4  ;;  %v1242_v37 = vand.u32 4294901760, %v1241_v9  ;;  %v5294_v61 = vand.u32 4294901760, %v111_v55  ;;  %v8157_v9 = vand.u32 4294901760, %v4954_v15  ;;  %v8158_v4 = vand.u32 4294901760, %v5235_v32 }
  0x8d   :  { %1180 = vmatpush.msra.mxu2 %v5085_v54  ;;  %962 = vmatpush.msrb.mxu1 %v961_v20  ;;  %v103_v20 = vld [vmem:[%s7917_s3 + $0x58] sm:$0xff]  ;;  %v1248_v53 = vand.u32 4294901760, %v1247_v49  ;;  %v5307_v21 = vsub.f32 %v115_v24, %v5279_v2  ;;  %v5309_v15 = vand.u32 4294901760, %v107_v43  ;;  %v1276_v24 = vand.u32 4294901760, %v5292_v58 }
  0x8e   :  { %1231 = vmatpush.msra.mxu3 %v1230_v23  ;;  %1084 = vmatpush.msra.mxu0 %v8157_v9  ;;  %v1259_v23 = vsub.f32 %v5235_v32, %v8158_v4  ;;  %v8159_v9 = vand.u32 4294901760, %v4970_v62  ;;  %v1265_v4 = vsub.f32 %v5253_v12, %v7982_v8  ;;  %v99_v49 = vld [vmem:[%s7917_s3 + $0x38] sm:$0xff]  ;;  %v5324_v62 = vand.u32 4294901760, %v103_v20 }
  0x8f   :  { %1182 = vmatpush.msra.mxu2 %v5102_v26  ;;  %968 = vmatpush.msrb.mxu1 %v967_v13  ;;  %v1254_v13 = vand.u32 4294901760, %v1253_v3  ;;  %v5338_v3 = vsub.f32 %v107_v43, %v5309_v15 }
  0x90   :  { %1237 = vmatpush.msra.mxu3 %v1236_v48  ;;  %1088 = vmatpush.msra.mxu0 %v8159_v9  ;;  %v5322_v48 = vsub.f32 %v111_v55, %v5294_v61  ;;  %v8160_v9 = vand.u32 4294901760, %v4985_v16  ;;  %v1260_v8 = vand.u32 4294901760, %v1259_v23  ;;  %v5340_v16 = vand.u32 4294901760, %v99_v49 }
  0x91   :  { %1184 = vmatpush.msra.mxu2 %v5132_v40  ;;  %974 = vmatpush.msrb.mxu1 %v973_v59  ;;  %v1282_v59 = vand.u32 4294901760, %v5307_v21  ;;  %v1266_v23 = vand.u32 4294901760, %v1265_v4  ;;  %v5351_v43 = vsub.f32 %v103_v20, %v5324_v62 }
  0x92   :  { %1243 = vmatpush.msra.mxu3 %v1242_v37  ;;  %1092 = vmatpush.msra.mxu0 %v8160_v9  ;;  %v8161_v37 = vand.u32 4294901760, %v5277_v63  ;;  %v1288_v9 = vand.u32 4294901760, %v5322_v48  ;;  %v5364_v20 = vsub.f32 %v99_v49, %v5340_v16  ;;  %v8165_v49 = vand.u32 4294901760, %v5047_v46 }
  0x93   :  { %1143 = vmatpush.msra.mxu1 %v4898_v39  ;;  %1186 = vmatpush.msra.mxu2 %v5142_v6  ;;  %v8162_v39 = vand.u32 4294901760, %v5001_v30  ;;  %v8163_v30 = vand.u32 4294901760, %v5007_v11  ;;  %v1283_v4 = vsub.f32 %v5307_v21, %v1282_v59 }
  0x94   :  { %1249 = vmatpush.msra.mxu3 %v1248_v53  ;;  %v1271_v55 = vsub.f32 %v5277_v63, %v8161_v37  ;;  %v1277_v53 = vsub.f32 %v5292_v58, %v1276_v24  ;;  %v5353_v37 = vand.u32 4294901760, %v95_v7  ;;  %v1289_v11 = vsub.f32 %v5322_v48, %v1288_v9  ;;  %875 = vmatmul.f32.vlgmr.msrb.gmra.mxu0 %v4828_v28 }
  0x95   :  { %1096 = vmatpush.msra.mxu0 %v8162_v39  ;;  %1145 = vmatpush.msra.mxu1 %v4910_v57  ;;  %v8164_v39 = vand.u32 4294901760, %v5023_v27 }
  0x96   :  { %1188 = vmatpush.msra.mxu2 %v5171_v31  ;;  %1255 = vmatpush.msra.mxu3 %v1254_v13  ;;  %v1272_v57 = vand.u32 4294901760, %v1271_v55  ;;  %v1294_v13 = vand.u32 4294901760, %v5338_v3  ;;  %v5375_v55 = vsub.f32 %v95_v7, %v5353_v37  ;;  %v1290_v46 = vand.u32 4294901760, %v1289_v11  ;;  %v8180_v11 = vld [vmem:[#allocation6_spill] sm:$0xff] }
  0x97   :  { %1100 = vmatpush.msra.mxu0 %v8163_v30  ;;  %1147 = vmatpush.msra.mxu1 %v4929_v44  ;;  %v1278_v44 = vand.u32 4294901760, %v1277_v53  ;;  %v8166_v53 = vand.u32 4294901760, %v5062_v56  ;;  %v8167_v30 = vand.u32 4294901760, %v5079_v33 }
  0x98   :  { %1190 = vmatpush.msra.mxu2 %v5190_v29  ;;  %1261 = vmatpush.msra.mxu3 %v1260_v8  ;;  %v1300_v8 = vand.u32 4294901760, %v5351_v43  ;;  %v1295_v27 = vsub.f32 %v5338_v3, %v1294_v13  ;;  %v1312_v7 = vand.u32 4294901760, %v5375_v55 }
  0x99   :  { %1104 = vmatpush.msra.mxu0 %v8164_v39  ;;  %1149 = vmatpush.msra.mxu1 %v4942_v14  ;;  %v1284_v14 = vand.u32 4294901760, %v1283_v4  ;;  %v8169_v4 = vand.u32 4294901760, %v5130_v42  ;;  %v8170_v39 = vand.u32 4294901760, %v5150_v38  ;;  %v8177_v42 = vld [vmem:[#allocation2_spill] sm:$0xff]  ;;  %v8178_v38 = vld [vmem:[#allocation9_spill] sm:$0xff] }
  0x9a   :  { %1192 = vmatpush.msra.mxu2 %v5200_v5  ;;  %1267 = vmatpush.msra.mxu3 %v1266_v23  ;;  %v1306_v23 = vand.u32 4294901760, %v5364_v20  ;;  %v1296_v56 = vand.u32 4294901760, %v1295_v27  ;;  %v8184_v27 = vld [vmem:[#allocation4_spill] sm:$0xff] }
  0x9b   :  { %1108 = vmatpush.msra.mxu0 %v8165_v49  ;;  %1151 = vmatpush.msra.mxu1 %v4956_v25  ;;  %v1301_v25 = vsub.f32 %v5351_v43, %v1300_v8  ;;  %v8181_v49 = vld [vmem:[#allocation10_spill] sm:$0xff] }
  0x9c   :  { %1194 = vmatpush.msra.mxu2 %v5216_v19  ;;  %1273 = vmatpush.msra.mxu3 %v1272_v57  ;;  %v8168_v57 = vand.u32 4294901760, %v5099_v50 }
  0x9d   :  { %1112 = vmatpush.msra.mxu0 %v8166_v53  ;;  %1153 = vmatpush.msra.mxu1 %v4972_v45  ;;  %v1307_v45 = vsub.f32 %v5364_v20, %v1306_v23  ;;  %v1302_v33 = vand.u32 4294901760, %v1301_v25  ;;  %v8185_v53 = vand.u32 4294901760, %v8181_v49 }
  0x9e   :  { %1196 = vmatpush.msra.mxu2 %v5246_v41  ;;  %1279 = vmatpush.msra.mxu3 %v1278_v44  ;;  %v8171_v44 = vand.u32 4294901760, %v5159_v35  ;;  %v8175_v35 = vld [vmem:[#allocation3_spill] sm:$0xff] }
  0x9f   :  { %1116 = vmatpush.msra.mxu0 %v8167_v30  ;;  %1155 = vmatpush.msra.mxu1 %v4980_v60  ;;  %v1313_v60 = vsub.f32 %v5375_v55, %v1312_v7  ;;  %v1308_v50 = vand.u32 4294901760, %v1307_v45  ;;  %v51_v30 = vld [vmem:[%s7919_s2 + $0xc0] sm:$0xff] }
  0xa0   :  { %1198 = vmatpush.msra.mxu2 %v5264_v36  ;;  %1285 = vmatpush.msra.mxu3 %v1284_v14  ;;  %v8182_v14 = vld [vmem:[#allocation7_spill] sm:$0xff] }
  0xa1   :  { %1120 = vmatpush.msra.mxu0 %v8168_v57  ;;  %1157 = vmatpush.msra.mxu1 %v4993_v10  ;;  %v1314_v10 = vand.u32 4294901760, %v1313_v60  ;;  %v47_v60 = vld [vmem:[%s7919_s2 + $0xa0] sm:$0xff] }
  0xa2   :  { %1200 = vmatpush.msra.mxu2 %v5279_v2  ;;  %1291 = vmatpush.msra.mxu3 %v1290_v46  ;;  %v8186_v46 = vand.u32 4294901760, %v5209_v18 }
  0xa3   :  { %1124 = vmatpush.msra.mxu0 %v8169_v4  ;;  %1159 = vmatpush.msra.mxu1 %v5017_v17  ;;  %v8172_v17 = vand.u32 4294901760, %v5187_v47  ;;  %v8179_v47 = vand.u32 4294901760, %v8175_v35 }
  0xa4   :  { %1202 = vmatpush.msra.mxu2 %v5294_v61  ;;  %1297 = vmatpush.msra.mxu3 %v1296_v56 }
  0xa5   :  { %1128 = vmatpush.msra.mxu0 %v8170_v39  ;;  %1161 = vmatpush.msra.mxu1 %v5032_v0  ;;  %v8173_v0 = vld [vmem:[#allocation5_spill] sm:$0xff] }
  0xa6   :  { %1204 = vmatpush.msra.mxu2 %v5309_v15  ;;  %1303 = vmatpush.msra.mxu3 %v1302_v33 }
  0xa7   :  { %1132 = vmatpush.msra.mxu0 %v8171_v44  ;;  %1163 = vmatpush.msra.mxu1 %v5049_v52  ;;  %v8174_v52 = vld [vmem:[#allocation8_spill] sm:$0xff] }
  0xa8   :  { %1206 = vmatpush.msra.mxu2 %v5324_v62  ;;  %1309 = vmatpush.msra.mxu3 %v1308_v50  ;;  %v5620_v50 = vand.u32 4294901760, %v51_v30 }
  0xa9   :  { %1136 = vmatpush.msra.mxu0 %v8172_v17  ;;  %1165 = vmatpush.msra.mxu1 %v5064_v34  ;;  %v8176_v34 = vand.u32 4294901760, %v5125_v22 }
  0xaa   :  { %1208 = vmatpush.msra.mxu2 %v5340_v16  ;;  %1315 = vmatpush.msra.mxu3 %v1314_v10 }
  0xab   :  { %1069 = vmatmul.f32.vlgmr.msrb.gmra.mxu3 %v4802_v51  ;;  %1323 = vmatpush.msrb.mxu0 %v5125_v22  ;;  %v8183_v22 = vand.u32 4294901760, %v8178_v38 }
  0xac   :  { %1484 = vmatpush.msrb.mxu3 %v5085_v54  ;;  %1167 = vmatpush.msra.mxu1 %v8173_v0  ;;  %v5636_v0 = vand.u32 4294901760, %v47_v60 }
  0xad   :  { %1210 = vmatpush.msra.mxu2 %v5353_v37  ;;  %1326 = vmatpush.msrb.mxu0 %v8175_v35 }
  0xae   :  { %1030 = vmatmul.f32.vlgmr.msrb.gmra.mxu2 %v8174_v52  ;;  %1486 = vmatpush.msrb.mxu3 %v5102_v26 }
  0xaf   :  { %1417 = vmatpush.msrb.mxu2 %v8176_v34  ;;  %1169 = vmatpush.msra.mxu1 %v8177_v42  ;;  %v26_v34 = vld [vmem:[%s7920_s0] sm:$0xff] }
  0xb0   :  { %1329 = vmatpush.msrb.mxu0 %v8178_v38  ;;  %1488 = vmatpush.msrb.mxu3 %v5132_v40 }
  0xb1   :  { %1421 = vmatpush.msrb.mxu2 %v8179_v47  ;;  %1171 = vmatpush.msra.mxu1 %v8180_v11  ;;  %v88_v47 = vld [vmem:[%s7919_s2 + $0x1e8] sm:$0xff] }
  0xb2   :  { %1332 = vmatpush.msrb.mxu0 %v8181_v49  ;;  %976 = vmatmul.f32.vlgmr.msrb.gmra.mxu1 %v8182_v14 }
  0xb3   :  { %1425 = vmatpush.msrb.mxu2 %v8183_v22  ;;  %1490 = vmatpush.msrb.mxu3 %v5142_v6  ;;  %v5655_v22 = vsub.f32 %v51_v30, %v5620_v50 }
  0xb4   :  { %1173 = vmatpush.msra.mxu1 %v8184_v27  ;;  %1335 = vmatpush.msrb.mxu0 %v5209_v18  ;;  %v39_v27 = vld [vmem:[%s7919_s2 + $0x60] sm:$0xff] }
  0xb5   :  { %1429 = vmatpush.msrb.mxu2 %v8185_v53  ;;  %1492 = vmatpush.msrb.mxu3 %v5171_v31 }
  0xb6   :  { %1376 = vmatpush.msrb.mxu1 %v5085_v54  ;;  %1338 = vmatpush.msrb.mxu0 %v5228_v1  ;;  %v8187_v54 = vand.u32 4294901760, %v5228_v1  ;;  %v8189_v1 = vand.u32 4294901760, %v5253_v12 }
  0xb7   :  { %1433 = vmatpush.msrb.mxu2 %v8186_v46  ;;  %1494 = vmatpush.msrb.mxu3 %v5190_v29  ;;  %v5663_v46 = vand.u32 4294901760, %v26_v34 }
  0xb8   :  { %1378 = vmatpush.msrb.mxu1 %v5102_v26  ;;  %1138 = vmatmul.f32.vlgmr.msra.gmra.mxu0 %v8182_v14  ;;  %v8188_v26 = vand.u32 4294901760, %v5235_v32 }
  0xb9   :  { %1341 = vmatpush.msrb.mxu0 %v5235_v32  ;;  %1437 = vmatpush.msrb.mxu2 %v8187_v54  ;;  %v8190_v32 = vand.u32 4294901760, %v5277_v63 }
  0xba   :  { %1380 = vmatpush.msrb.mxu1 %v5132_v40  ;;  %1496 = vmatpush.msrb.mxu3 %v5200_v5  ;;  %v87_v40 = vld [vmem:[%s7919_s2 + $0x1e0] sm:$0xff] }
  0xbb   :  { %1175 = vmatmul.f32.vlgmr.msra.gmra.mxu1 %v8182_v14  ;;  %1344 = vmatpush.msrb.mxu0 %v5253_v12  ;;  %v83_v12 = vld [vmem:[%s7919_s2 + $0x1c0] sm:$0xff] }
  0xbc   :  { %1382 = vmatpush.msrb.mxu1 %v5142_v6  ;;  %1441 = vmatpush.msrb.mxu2 %v8188_v26  ;;  %v79_v6 = vld [vmem:[%s7919_s2 + $0x1a0] sm:$0xff] }
  0xbd   :  { %1498 = vmatpush.msrb.mxu3 %v5216_v19  ;;  %1347 = vmatpush.msrb.mxu0 %v5277_v63  ;;  %v5517_v63 = vand.u32 4294901760, %v79_v6 }
  0xbe   :  { %1384 = vmatpush.msrb.mxu1 %v5171_v31  ;;  %1445 = vmatpush.msrb.mxu2 %v8189_v1  ;;  %v5486_v31 = vand.u32 4294901760, %v87_v40  ;;  %v5675_v1 = vand.u32 4294901760, %v88_v47 }
  0xbf   :  { %1500 = vmatpush.msrb.mxu3 %v5246_v41  ;;  %1350 = vmatpush.msrb.mxu0 %v5292_v58  ;;  %v5498_v58 = vand.u32 4294901760, %v83_v12 }
  0xc0   :  { %1386 = vmatpush.msrb.mxu1 %v5190_v29  ;;  %1449 = vmatpush.msrb.mxu2 %v8190_v32  ;;  %v5682_v32 = vand.u32 4294901760, %v39_v27  ;;  %v5713_v30 = vsub.f32 %v88_v47, %v5675_v1 }
  0xc1   :  { %1502 = vmatpush.msrb.mxu3 %v5264_v36  ;;  %1353 = vmatpush.msrb.mxu0 %v5307_v21  ;;  %v5522_v29 = vsub.f32 %v83_v12, %v5498_v58  ;;  %v5542_v21 = vsub.f32 %v79_v6, %v5517_v63  ;;  %v35_v6 = vld [vmem:[%s7919_s2 + $0x40] sm:$0xff] }
  0xc2   :  { %1388 = vmatpush.msrb.mxu1 %v5200_v5  ;;  %1453 = vmatpush.msrb.mxu2 %v1276_v24 }
  0xc3   :  { %1504 = vmatpush.msrb.mxu3 %v5279_v2  ;;  %1356 = vmatpush.msrb.mxu0 %v5322_v48  ;;  %v63_v48 = vld [vmem:[%s7919_s2 + $0x120] sm:$0xff] }
  0xc4   :  { %1390 = vmatpush.msrb.mxu1 %v5216_v19  ;;  %1457 = vmatpush.msrb.mxu2 %v1282_v59  ;;  %v5507_v19 = vsub.f32 %v87_v40, %v5486_v31 }
  0xc5   :  { %1506 = vmatpush.msrb.mxu3 %v5294_v61  ;;  %1359 = vmatpush.msrb.mxu0 %v5338_v3 }
  0xc6   :  { %1392 = vmatpush.msrb.mxu1 %v5246_v41  ;;  %1461 = vmatpush.msrb.mxu2 %v1288_v9  ;;  %v75_v41 = vld [vmem:[%s7919_s2 + $0x180] sm:$0xff]  ;;  %v7997_v18 = vand.u32 4294901760, %v5507_v19 }
  0xc7   :  { %1508 = vmatpush.msrb.mxu3 %v5309_v15  ;;  %1362 = vmatpush.msrb.mxu0 %v5351_v43  ;;  %v5530_v5 = vand.u32 4294901760, %v75_v41  ;;  %v59_v43 = vld [vmem:[%s7919_s2 + $0x100] sm:$0xff] }
  0xc8   :  { %1394 = vmatpush.msrb.mxu1 %v5264_v36  ;;  %1465 = vmatpush.msrb.mxu2 %v1294_v13  ;;  %v71_v36 = vld [vmem:[%s7919_s2 + $0x160] sm:$0xff]  ;;  %v1564_v59 = vsub.f32 %v5507_v19, %v7997_v18  ;;  %v5573_v13 = vand.u32 4294901760, %v63_v48 }
  0xc9   :  { %1510 = vmatpush.msrb.mxu3 %v5324_v62  ;;  %1365 = vmatpush.msrb.mxu0 %v5364_v20  ;;  %v5544_v24 = vand.u32 4294901760, %v71_v36  ;;  %v5558_v3 = vsub.f32 %v75_v41, %v5530_v5  ;;  %v7994_v20 = vand.u32 4294901760, %v5542_v21 }
  0xca   :  { %1396 = vmatpush.msrb.mxu1 %v5279_v2  ;;  %1469 = vmatpush.msrb.mxu2 %v1300_v8  ;;  %v67_v2 = vld [vmem:[%s7919_s2 + $0x140] sm:$0xff]  ;;  %v5605_v45 = vsub.f32 %v63_v48, %v5573_v13 }
  0xcb   :  { %1512 = vmatpush.msrb.mxu3 %v5340_v16  ;;  %1368 = vmatpush.msrb.mxu0 %v5375_v55  ;;  %v5560_v9 = vand.u32 4294901760, %v67_v2  ;;  %v55_v8 = vld [vmem:[%s7919_s2 + $0xe0] sm:$0xff]  ;;  %v5584_v55 = vand.u32 4294901760, %v59_v43  ;;  %v1576_v56 = vsub.f32 %v5542_v21, %v7994_v20 }
  0xcc   :  { %1398 = vmatpush.msrb.mxu1 %v5294_v61  ;;  %1473 = vmatpush.msrb.mxu2 %v1306_v23  ;;  %v7995_v61 = vand.u32 4294901760, %v5522_v29  ;;  %v1565_v23 = vand.u32 4294901760, %v1564_v59  ;;  %v7988_v35 = vand.u32 4294901760, %v5605_v45  ;;  %v31_v48 = vld [vmem:[%s7919_s2 + $0x20] sm:$0xff]  ;;  %v5703_v59 = vsub.f32 %v26_v34, %v5663_v46 }
  0xcd   :  { %1514 = vmatpush.msrb.mxu3 %v5353_v37  ;;  %1521 = vmatpush.msra.mxu0 %v5486_v31  ;;  %v5589_v25 = vsub.f32 %v67_v2, %v5560_v9  ;;  %v5611_v33 = vsub.f32 %v59_v43, %v5584_v55  ;;  %v1577_v44 = vand.u32 4294901760, %v1576_v56  ;;  %v80_v43 = vld [vmem:[%s7919_s2 + $0x1a8] sm:$0xff] }
  0xce   :  { %1317 = vmatmul.f32.vlgmr.msra.gmra.mxu3 %v8182_v14  ;;  %1400 = vmatpush.msrb.mxu1 %v5309_v15  ;;  %v5571_v15 = vsub.f32 %v71_v36, %v5544_v24  ;;  %v1600_v26 = vsub.f32 %v5605_v45, %v7988_v35  ;;  %v7984_v36 = vand.u32 4294901760, %v5655_v22  ;;  %8191 = vst [vmem:[#allocation5_spill] sm:$0xff] %v5703_v59  ;;  %v5736_v47 = vand.u32 4294901760, %v80_v43 }
  0xcf   :  { %1717 = vmatpush.msra.mxu3 %v5486_v31  ;;  %1477 = vmatpush.msrb.mxu2 %v1312_v7  ;;  %v7991_v7 = vand.u32 4294901760, %v5558_v3  ;;  %v7989_v39 = vand.u32 4294901760, %v5589_v25  ;;  %v7986_v38 = vand.u32 4294901760, %v5611_v33 }
  0xd0   :  { %1523 = vmatpush.msra.mxu0 %v5498_v58  ;;  %1216 = vmatmul.f32.vlgmr.msra.gmra.mxu2 %v4828_v28  ;;  %v1570_v28 = vsub.f32 %v5522_v29, %v7995_v61  ;;  %v7990_v57 = vand.u32 4294901760, %v5571_v15 }
  0xd1   :  { %1719 = vmatpush.msra.mxu3 %v5498_v58  ;;  %1664 = vmatpush.msra.mxu2 %v5507_v19  ;;  %v1582_v4 = vsub.f32 %v5558_v3, %v7991_v7  ;;  %v1594_v49 = vsub.f32 %v5589_v25, %v7989_v39  ;;  %v1606_v40 = vsub.f32 %v5611_v33, %v7986_v38  ;;  %v68_v38 = vld [vmem:[%s7919_s2 + $0x148] sm:$0xff] }
  0xd2   :  { %1402 = vmatpush.msrb.mxu1 %v5324_v62  ;;  %1525 = vmatpush.msra.mxu0 %v5517_v63  ;;  %v5594_v62 = vand.u32 4294901760, %v55_v8  ;;  %v1588_v17 = vsub.f32 %v5571_v15, %v7990_v57 }
  0xd3   :  { %1721 = vmatpush.msra.mxu3 %v5517_v63  ;;  %1667 = vmatpush.msra.mxu2 %v5522_v29  ;;  %v1583_v11 = vand.u32 4294901760, %v1582_v4  ;;  %v1595_v41 = vand.u32 4294901760, %v1594_v49  ;;  %v1607_v56 = vand.u32 4294901760, %v1606_v40  ;;  %v76_v4 = vld [vmem:[%s7919_s2 + $0x188] sm:$0xff]  ;;  %v5741_v49 = vand.u32 4294901760, %v5703_v59 }
  0xd4   :  { %1404 = vmatpush.msrb.mxu1 %v5340_v16  ;;  %1527 = vmatpush.msra.mxu0 %v5530_v5  ;;  %v1571_v16 = vand.u32 4294901760, %v1570_v28  ;;  %v5629_v10 = vsub.f32 %v55_v8, %v5594_v62  ;;  %v1589_v54 = vand.u32 4294901760, %v1588_v17  ;;  %v1601_v8 = vand.u32 4294901760, %v1600_v26  ;;  %v27_v17 = vld [vmem:[%s7919_s2] sm:$0xff]  ;;  %v72_v40 = vld [vmem:[%s7919_s2 + $0x168] sm:$0xff] }
  0xd5   :  { %1723 = vmatpush.msra.mxu3 %v5530_v5  ;;  %1670 = vmatpush.msra.mxu2 %v5542_v21  ;;  %v5709_v28 = vand.u32 4294901760, %v35_v6  ;;  %8195 = vst [vmem:[#allocation9_spill] sm:$0xff] %v5741_v49  ;;  %v5751_v26 = vand.u32 4294901760, %v76_v4 }
  0xd6   :  { %1406 = vmatpush.msrb.mxu1 %v5353_v37  ;;  %1529 = vmatpush.msra.mxu0 %v5544_v24  ;;  %v43_v37 = vld [vmem:[%s7919_s2 + $0x80] sm:$0xff]  ;;  %v7985_v53 = vand.u32 4294901760, %v5629_v10 }
  0xd7   :  { %1673 = vmatpush.msra.mxu2 %v5558_v3  ;;  %1725 = vmatpush.msra.mxu3 %v5544_v24  ;;  %v5643_v42 = vand.u32 4294901760, %v43_v37  ;;  %8192 = vst [vmem:[#allocation8_spill] sm:$0xff] %v5709_v28  ;;  %v5790_v39 = vsub.f32 %v76_v4, %v5751_v26 }
  0xd8   :  { %1566 = vmatpush.msra.mxu1 %v1565_v23  ;;  %1479 = vmatmul.f32.vlgmr.msrb.gmra.mxu2 %v8182_v14  ;;  %v1612_v2 = vsub.f32 %v5629_v10, %v7985_v53  ;;  %v5770_v53 = vsub.f32 %v80_v43, %v5736_v47 }
  0xd9   :  { %1531 = vmatpush.msra.mxu0 %v5560_v9  ;;  %1676 = vmatpush.msra.mxu2 %v5571_v15  ;;  %v5685_v12 = vsub.f32 %v43_v37, %v5643_v42  ;;  %v1618_v37 = vsub.f32 %v5655_v22, %v7984_v36  ;;  %8198 = vst [vmem:[#allocation7_spill] sm:$0xff] %v5790_v39 }
  0xda   :  { %1572 = vmatpush.msra.mxu1 %v1571_v16  ;;  %1727 = vmatpush.msra.mxu3 %v5560_v9  ;;  %v5718_v16 = vsub.f32 %v39_v27, %v5682_v32  ;;  %8197 = vst [vmem:[#allocation10_spill] sm:$0xff] %v5770_v53 }
  0xdb   :  { %1371 = vmatmul.f32.vlgmr.msrb.gmra.mxu0 %v8174_v52  ;;  %1516 = vmatmul.f32.vlgmr.msrb.gmra.mxu3 %v8182_v14  ;;  %v84_v52 = vld [vmem:[%s7919_s2 + $0x1c8] sm:$0xff]  ;;  %v5673_v14 = vsub.f32 %v47_v60, %v5636_v0  ;;  %v7987_v60 = vand.u32 4294901760, %v5685_v12 }
  0xdc   :  { %1533 = vmatpush.msra.mxu0 %v5573_v13  ;;  %1578 = vmatpush.msra.mxu1 %v1577_v44  ;;  %v5728_v44 = vand.u32 4294901760, %v31_v48 }
  0xdd   :  { %1679 = vmatpush.msra.mxu2 %v5589_v25  ;;  %1729 = vmatpush.msra.mxu3 %v5573_v13  ;;  %v7983_v23 = vand.u32 4294901760, %v5673_v14 }
  0xde   :  { %1410 = vmatmul.f32.vlgmr.msrb.gmra.mxu1 %v4802_v51  ;;  %1535 = vmatpush.msra.mxu0 %v5584_v55  ;;  %v5692_v51 = vand.u32 4294901760, %v84_v52  ;;  %8193 = vst [vmem:[#allocation3_spill] sm:$0xff] %v5728_v44 }
  0xdf   :  { %1584 = vmatpush.msra.mxu1 %v1583_v11  ;;  %1682 = vmatpush.msra.mxu2 %v5605_v45  ;;  %v1613_v11 = vand.u32 4294901760, %v1612_v2  ;;  %v1624_v27 = vsub.f32 %v5673_v14, %v7983_v23  ;;  %v1630_v2 = vsub.f32 %v5685_v12, %v7987_v60  ;;  %v5766_v23 = vsub.f32 %v31_v48, %v5728_v44  ;;  %v64_v48 = vld [vmem:[%s7919_s2 + $0x128] sm:$0xff] }
  0xe0   :  { %1731 = vmatpush.msra.mxu3 %v5584_v55  ;;  %1537 = vmatpush.msra.mxu0 %v5594_v62  ;;  %v5734_v34 = vsub.f32 %v84_v52, %v5692_v51  ;;  %v5748_v52 = vsub.f32 %v35_v6, %v5709_v28  ;;  %v7993_v6 = vand.u32 4294901760, %v5718_v16  ;;  %v5811_v20 = vand.u32 4294901760, %v64_v48 }
  0xe1   :  { %1590 = vmatpush.msra.mxu1 %v1589_v54  ;;  %1685 = vmatpush.msra.mxu2 %v5611_v33  ;;  %v7992_v54 = vand.u32 4294901760, %v5713_v30  ;;  %v1625_v43 = vand.u32 4294901760, %v1624_v27  ;;  %v1631_v57 = vand.u32 4294901760, %v1630_v2  ;;  %v5800_v27 = vand.u32 4294901760, %v68_v38 }
  0xe2   :  { %1733 = vmatpush.msra.mxu3 %v5594_v62  ;;  %1539 = vmatpush.msra.mxu0 %v5620_v50  ;;  %8194 = vst [vmem:[#allocation2_spill] sm:$0xff] %v5734_v34  ;;  %v7996_v36 = vand.u32 4294901760, %v5734_v34  ;;  %v7998_v35 = vand.u32 4294901760, %v5748_v52  ;;  %v1636_v7 = vsub.f32 %v5718_v16, %v7993_v6  ;;  %v8003_v2 = vand.u32 4294901760, %v5770_v53 }
  0xe3   :  { %1596 = vmatpush.msra.mxu1 %v1595_v41  ;;  %1688 = vmatpush.msra.mxu2 %v5629_v10  ;;  %v5758_v41 = vand.u32 4294901760, %v27_v17  ;;  %v1905_v60 = vsub.f32 %v5713_v30, %v7992_v54  ;;  %v60_v54 = vld [vmem:[%s7919_s2 + $0x108] sm:$0xff] }
  0xe4   :  { %1735 = vmatpush.msra.mxu3 %v5620_v50  ;;  %1541 = vmatpush.msra.mxu0 %v5636_v0  ;;  %v1911_v4 = vsub.f32 %v5734_v34, %v7996_v36  ;;  %v1642_v36 = vsub.f32 %v5748_v52, %v7998_v35  ;;  %v5825_v6 = vand.u32 4294901760, %v60_v54  ;;  %v1917_v18 = vsub.f32 %v5770_v53, %v8003_v2 }
  0xe5   :  { %1602 = vmatpush.msra.mxu1 %v1601_v8  ;;  %1691 = vmatpush.msra.mxu2 %v5655_v22  ;;  %8196 = vst [vmem:[#allocation6_spill] sm:$0xff] %v5758_v41  ;;  %v1619_v8 = vand.u32 4294901760, %v1618_v37  ;;  %v5779_v37 = vand.u32 4294901760, %v72_v40 }
  0xe6   :  { %1737 = vmatpush.msra.mxu3 %v5636_v0  ;;  %1543 = vmatpush.msra.mxu0 %v5643_v42  ;;  %v1912_v35 = vand.u32 4294901760, %v1911_v4  ;;  %v1643_v4 = vand.u32 4294901760, %v1642_v36  ;;  %v5859_v2 = vsub.f32 %v60_v54, %v5825_v6  ;;  %v1918_v54 = vand.u32 4294901760, %v1917_v18 }
  0xe7   :  { %1608 = vmatpush.msra.mxu1 %v1607_v56  ;;  %1694 = vmatpush.msra.mxu2 %v5673_v14  ;;  %v1555_v56 = vsub.f32 %v5703_v59, %v5741_v49  ;;  %v5818_v61 = vsub.f32 %v72_v40, %v5779_v37  ;;  %v1637_v40 = vand.u32 4294901760, %v1636_v7  ;;  %v52_v7 = vld [vmem:[%s7919_s2 + $0xc8] sm:$0xff] }
  0xe8   :  { %1739 = vmatpush.msra.mxu3 %v5643_v42  ;;  %1545 = vmatpush.msra.mxu0 %v5682_v32  ;;  %v5870_v53 = vand.u32 4294901760, %v52_v7 }
  0xe9   :  { %1614 = vmatpush.msra.mxu1 %v1613_v11  ;;  %1697 = vmatpush.msra.mxu2 %v5685_v12  ;;  %v5798_v11 = vsub.f32 %v27_v17, %v5758_v41  ;;  %v5815_v17 = vand.u32 4294901760, %v1555_v56  ;;  %v56_v56 = vld [vmem:[%s7919_s2 + $0xe8] sm:$0xff] }
  0xea   :  { %1741 = vmatpush.msra.mxu3 %v5682_v32  ;;  %1547 = vmatpush.msra.mxu0 %v5709_v28 }
  0xeb   :  { %1620 = vmatpush.msra.mxu1 %v1619_v8  ;;  %1700 = vmatpush.msra.mxu2 %v5718_v16  ;;  %v1906_v8 = vand.u32 4294901760, %v1905_v60  ;;  %v5834_v60 = vsub.f32 %v68_v38, %v5800_v27  ;;  %v5852_v38 = vand.u32 4294901760, %v56_v56 }
  0xec   :  { %1743 = vmatpush.msra.mxu3 %v5709_v28  ;;  %1549 = vmatpush.msra.mxu0 %v5728_v44  ;;  %v8199_v28 = vand.u32 4294901760, %v5766_v23 }
  0xed   :  { %1626 = vmatpush.msra.mxu1 %v1625_v43  ;;  %1703 = vmatpush.msra.mxu2 %v5748_v52  ;;  %v48_v43 = vld [vmem:[%s7919_s2 + $0xa8] sm:$0xff]  ;;  %v5884_v36 = vsub.f32 %v56_v56, %v5852_v38  ;;  %v8206_v56 = vand.u32 4294901760, %v5834_v60 }
  0xee   :  { %1745 = vmatpush.msra.mxu3 %v5728_v44  ;;  %1551 = vmatpush.msra.mxu0 %v5758_v41  ;;  %v1648_v34 = vsub.f32 %v5766_v23, %v8199_v28  ;;  %v5844_v44 = vsub.f32 %v64_v48, %v5811_v20  ;;  %v8200_v28 = vand.u32 4294901760, %v5790_v39  ;;  %v5886_v18 = vand.u32 4294901760, %v48_v43 }
  0xef   :  { %1632 = vmatpush.msra.mxu1 %v1631_v57  ;;  %1706 = vmatpush.msra.mxu2 %v5766_v23  ;;  %v8202_v57 = vand.u32 4294901760, %v5798_v11 }
  0xf0   :  { %1747 = vmatpush.msra.mxu3 %v5758_v41  ;;  %1557 = vmatmul.f32.vlgmr.msra.gmra.mxu0 %v5815_v17  ;;  %v1923_v48 = vsub.f32 %v5790_v39, %v8200_v28  ;;  %v8201_v41 = vand.u32 4294901760, %v5507_v19  ;;  %v1649_v28 = vand.u32 4294901760, %v1648_v34  ;;  %v44_v19 = vld [vmem:[%s7919_s2 + $0x88] sm:$0xff]  ;;  %v1935_v39 = vsub.f32 %v5834_v60, %v8206_v56 }
  0xf1   :  { %1638 = vmatpush.msra.mxu1 %v1637_v40  ;;  %1709 = vmatpush.msra.mxu2 %v5798_v11  ;;  %v8204_v40 = vand.u32 4294901760, %v5818_v61  ;;  %v8207_v34 = vand.u32 4294901760, %v5844_v44  ;;  %v5915_v56 = vsub.f32 %v48_v43, %v5886_v18 }
  0xf2   :  { %1907 = vmatpush.msrb.mxu3 %v1906_v8  ;;  %1758 = vmatpush.msrb.mxu0 %v8201_v41  ;;  %v1654_v8 = vsub.f32 %v5798_v11, %v8202_v57  ;;  %v8203_v41 = vand.u32 4294901760, %v5522_v29  ;;  %v40_v29 = vld [vmem:[%s7919_s2 + $0x68] sm:$0xff] }
  0xf3   :  { %1862 = vmatpush.msrb.mxu2 %v5675_v1  ;;  %v1929_v57 = vsub.f32 %v5818_v61, %v8204_v40  ;;  %1644 = vmatpush.msra.mxu1 %v1643_v4  ;;  %v5900_v4 = vsub.f32 %v52_v7, %v5870_v53 }
  0xf4   :  { %1913 = vmatpush.msrb.mxu3 %v1912_v35  ;;  %1762 = vmatpush.msrb.mxu0 %v8203_v41  ;;  %v1924_v35 = vand.u32 4294901760, %v1923_v48  ;;  %v8205_v41 = vand.u32 4294901760, %v5542_v21  ;;  %v1655_v40 = vand.u32 4294901760, %v1654_v8  ;;  %v5902_v48 = vand.u32 4294901760, %v44_v19  ;;  %v36_v21 = vld [vmem:[%s7919_s2 + $0x48] sm:$0xff] }
  0xf5   :  { %1712 = vmatmul.f32.vlgmr.msra.gmra.mxu2 %v5703_v59  ;;  %1650 = vmatpush.msra.mxu1 %v1649_v28  ;;  %v1941_v59 = vsub.f32 %v5844_v44, %v8207_v34  ;;  %v8208_v8 = vand.u32 4294901760, %v5558_v3  ;;  %v8209_v28 = vand.u32 4294901760, %v5859_v2  ;;  %v32_v3 = vld [vmem:[%s7919_s2 + $0x28] sm:$0xff] }
  0xf6   :  { %1766 = vmatpush.msrb.mxu0 %v8205_v41  ;;  %1864 = vmatpush.msrb.mxu2 %v5692_v51  ;;  %v1930_v41 = vand.u32 4294901760, %v1929_v57  ;;  %v8210_v57 = vand.u32 4294901760, %v5571_v15  ;;  %v5930_v7 = vsub.f32 %v44_v19, %v5902_v48  ;;  %v8211_v15 = vand.u32 4294901760, %v5884_v36 }
  0xf7   :  { %1919 = vmatpush.msrb.mxu3 %v1918_v54  ;;  %v5917_v54 = vand.u32 4294901760, %v40_v29  ;;  %v1947_v34 = vsub.f32 %v5859_v2, %v8209_v28  ;;  %1656 = vmatpush.msra.mxu1 %v1655_v40  ;;  %v28_v40 = vld [vmem:[%s7919_s2 + $0x8] sm:$0xff] }
  0xf8   :  { %1751 = vmatmul.f32.vlgmr.msra.gmra.mxu3 %v5741_v49  ;;  %1770 = vmatpush.msrb.mxu0 %v8208_v8  ;;  %v1936_v8 = vand.u32 4294901760, %v1935_v39  ;;  %v5932_v49 = vand.u32 4294901760, %v36_v21  ;;  %v1953_v39 = vsub.f32 %v5884_v36, %v8211_v15  ;;  %v1970_v15 = vand.u32 4294901760, %v5930_v7 }
  0xf9   :  { %1866 = vmatpush.msrb.mxu2 %v5736_v47  ;;  %1925 = vmatpush.msrb.mxu3 %v1924_v35  ;;  %v1942_v35 = vand.u32 4294901760, %v1941_v59  ;;  %v5945_v28 = vsub.f32 %v40_v29, %v5917_v54  ;;  %v8212_v59 = vand.u32 4294901760, %v5589_v25  ;;  %v1948_v43 = vand.u32 4294901760, %v1947_v34 }
  0xfa   :  { %1774 = vmatpush.msrb.mxu0 %v8210_v57  ;;  %1658 = vmatmul.f32.vlgmr.msra.gmra.mxu1 %v5663_v46  ;;  %v5947_v57 = vand.u32 4294901760, %v32_v3  ;;  %v5958_v29 = vsub.f32 %v36_v21, %v5932_v49  ;;  %v5960_v19 = vand.u32 4294901760, %v28_v40  ;;  %v8214_v25 = vand.u32 4294901760, %v5605_v45 }
  0xfb   :  { %1868 = vmatpush.msrb.mxu2 %v5751_v26  ;;  %1825 = vmatpush.msrb.mxu1 %v5486_v31  ;;  %v8213_v31 = vand.u32 4294901760, %v5900_v4  ;;  %v8215_v34 = vand.u32 4294901760, %v5915_v56  ;;  %v1971_v45 = vsub.f32 %v5930_v7, %v1970_v15 }
  0xfc   :  { %1931 = vmatpush.msrb.mxu3 %v1930_v41  ;;  %1778 = vmatpush.msrb.mxu0 %v8212_v59  ;;  %v1976_v59 = vand.u32 4294901760, %v5945_v28  ;;  %v5971_v21 = vsub.f32 %v32_v3, %v5947_v57  ;;  %v8217_v3 = vand.u32 4294901760, %v5629_v10 }
  0xfd   :  { %1870 = vmatpush.msrb.mxu2 %v5779_v37  ;;  %1827 = vmatpush.msrb.mxu1 %v5498_v58  ;;  %v1959_v41 = vsub.f32 %v5900_v4, %v8213_v31  ;;  %v1954_v58 = vand.u32 4294901760, %v1953_v39  ;;  %v8216_v31 = vand.u32 4294901760, %v5611_v33  ;;  %v5982_v39 = vsub.f32 %v28_v40, %v5960_v19 }
  0xfe   :  { %1937 = vmatpush.msrb.mxu3 %v1936_v8  ;;  %1782 = vmatpush.msrb.mxu0 %v8214_v25  ;;  %v1965_v8 = vsub.f32 %v5915_v56, %v8215_v34  ;;  %v1977_v33 = vsub.f32 %v5945_v28, %v1976_v59  ;;  %v1972_v10 = vand.u32 4294901760, %v1971_v45  ;;  %v8219_v25 = vand.u32 4294901760, %v5673_v14  ;;  %v8234_v45 = vld [vmem:[#allocation3_spill] sm:$0xff] }
  0xff   :  { %1872 = vmatpush.msrb.mxu2 %v5800_v27  ;;  %1829 = vmatpush.msrb.mxu1 %v5517_v63  ;;  %v1960_v63 = vand.u32 4294901760, %v1959_v41  ;;  %v8218_v41 = vand.u32 4294901760, %v5655_v22  ;;  %v1994_v40 = vand.u32 4294901760, %v5982_v39 }
 0x100   :  { %1943 = vmatpush.msrb.mxu3 %v1942_v35  ;;  %1786 = vmatpush.msrb.mxu0 %v8216_v31  ;;  %v1982_v35 = vand.u32 4294901760, %v5958_v29  ;;  %v1978_v22 = vand.u32 4294901760, %v1977_v33  ;;  %v8223_v31 = vand.u32 4294901760, %v5766_v23  ;;  %v8229_v23 = vand.u32 4294901760, %v5713_v30  ;;  %v8238_v33 = vld [vmem:[#allocation6_spill] sm:$0xff] }
 0x101   :  { %1874 = vmatpush.msrb.mxu2 %v5811_v20  ;;  %1831 = vmatpush.msrb.mxu1 %v5530_v5  ;;  %v1966_v5 = vand.u32 4294901760, %v1965_v8  ;;  %v1995_v34 = vsub.f32 %v5982_v39, %v1994_v40  ;;  %v8222_v8 = vand.u32 4294901760, %v5748_v52  ;;  %v8230_v52 = vld [vmem:[#allocation8_spill] sm:$0xff] }
 0x102   :  { %1949 = vmatpush.msrb.mxu3 %v1948_v43  ;;  %1790 = vmatpush.msrb.mxu0 %v8217_v3  ;;  %v1988_v43 = vand.u32 4294901760, %v5971_v21  ;;  %v8235_v3 = vld [vmem:[#allocation7_spill] sm:$0xff] }
 0x103   :  { %1876 = vmatpush.msrb.mxu2 %v5825_v6  ;;  %1833 = vmatpush.msrb.mxu1 %v5544_v24  ;;  %v1983_v24 = vsub.f32 %v5958_v29, %v1982_v35 }
 0x104   :  { %1955 = vmatpush.msrb.mxu3 %v1954_v58  ;;  %1794 = vmatpush.msrb.mxu0 %v8218_v41  ;;  %v8220_v58 = vand.u32 4294901760, %v5685_v12  ;;  %v8239_v41 = vand.u32 4294901760, %v8235_v3 }
 0x105   :  { %1878 = vmatpush.msrb.mxu2 %v5852_v38  ;;  %1835 = vmatpush.msrb.mxu1 %v5560_v9  ;;  %v1989_v9 = vsub.f32 %v5971_v21, %v1988_v43  ;;  %v1984_v14 = vand.u32 4294901760, %v1983_v24  ;;  %v8241_v24 = vand.u32 4294901760, %v5818_v61 }
 0x106   :  { %1961 = vmatpush.msrb.mxu3 %v1960_v63  ;;  %1798 = vmatpush.msrb.mxu0 %v8219_v25 }
 0x107   :  { %1880 = vmatpush.msrb.mxu2 %v5870_v53  ;;  %1837 = vmatpush.msrb.mxu1 %v5573_v13  ;;  %v8221_v13 = vand.u32 4294901760, %v5718_v16  ;;  %v1990_v12 = vand.u32 4294901760, %v1989_v9  ;;  %v6029_v16 = vpop.f32.mrf.mxu0 }
 0x108   :  { %1967 = vmatpush.msrb.mxu3 %v1966_v5  ;;  %1802 = vmatpush.msrb.mxu0 %v8220_v58  ;;  %8225 = vst [vmem:[#allocation4_spill] sm:$0xff] %v6029_v16 }
 0x109   :  { %1882 = vmatpush.msrb.mxu2 %v5886_v18  ;;  %1839 = vmatpush.msrb.mxu1 %v5584_v55  ;;  %v1996_v55 = vand.u32 4294901760, %v1995_v34 }
 0x10a   :  { %1973 = vmatpush.msrb.mxu3 %v1972_v10  ;;  %1806 = vmatpush.msrb.mxu0 %v8221_v13 }
 0x10b   :  { %1884 = vmatpush.msrb.mxu2 %v5902_v48  ;;  %1841 = vmatpush.msrb.mxu1 %v5594_v62  ;;  %v8224_v62 = vand.u32 4294901760, %v5798_v11  ;;  %v6047_v11 = vpop.f32.mrf.mxu3 }
 0x10c   :  { %1979 = vmatpush.msrb.mxu3 %v1978_v22  ;;  %1810 = vmatpush.msrb.mxu0 %v8222_v8  ;;  %8231 = vst [vmem:[#allocation8_spill] sm:$0xff] %v6047_v11 }
 0x10d   :  { %1886 = vmatpush.msrb.mxu2 %v5917_v54  ;;  %1843 = vmatpush.msrb.mxu1 %v5620_v50  ;;  %v6038_v50 = vpop.f32.mrf.mxu1 }
 0x10e   :  { %1985 = vmatpush.msrb.mxu3 %v1984_v14  ;;  %1814 = vmatpush.msrb.mxu0 %v8223_v31  ;;  %8226 = vst [vmem:[#allocation11_spill] sm:$0xff] %v6038_v50 }
 0x10f   :  { %1888 = vmatpush.msrb.mxu2 %v5932_v49  ;;  %1845 = vmatpush.msrb.mxu1 %v5636_v0  ;;  %v8227_v0 = vld [vmem:[#allocation2_spill] sm:$0xff]  ;;  %v6059_v5 = vpop.f32.mrf.mxu0 }
 0x110   :  { %1991 = vmatpush.msrb.mxu3 %v1990_v12  ;;  %1818 = vmatpush.msrb.mxu0 %v8224_v62  ;;  %v8233_v63 = vand.u32 4294901760, %v8227_v0 }
 0x111   :  { %1890 = vmatpush.msrb.mxu2 %v5947_v57  ;;  %1847 = vmatpush.msrb.mxu1 %v5643_v42  ;;  %v6042_v42 = vpop.f32.mrf.mxu2 }
 0x112   :  { %1997 = vmatpush.msrb.mxu3 %v1996_v55  ;;  %1820 = vmatmul.f32.vlgmr.msrb.gmra.mxu0 %v5663_v46  ;;  %8228 = vst [vmem:[#allocation2_spill] sm:$0xff] %v6042_v42  ;;  %v8254_v55 = vld [vmem:[#allocation5_spill] sm:$0xff] }
 0x113   :  { %2005 = vmatpush.msra.mxu0 %v5713_v30  ;;  %1849 = vmatpush.msrb.mxu1 %v5682_v32  ;;  %v8232_v32 = vld [vmem:[#allocation10_spill] sm:$0xff]  ;;  %v6075_v22 = vpop.f32.mrf.mxu3 }
 0x114   :  { %2166 = vmatpush.msra.mxu3 %v5675_v1  ;;  %1892 = vmatpush.msrb.mxu2 %v5960_v19  ;;  %v8236_v30 = vand.u32 4294901760, %v8232_v32  ;;  %8237 = vst [vmem:[#allocation10_spill] sm:$0xff] %v6059_v5 }
 0x115   :  { %1898 = vmatmul.f32.vlgmr.msrb.gmra.mxu2 %v5815_v17  ;;  %2008 = vmatpush.msra.mxu0 %v8227_v0  ;;  %v6073_v25 = vpop.f32.mrf.mxu1  ;;  %8243 = vst [vmem:[#allocation6_spill] sm:$0xff] %v6075_v22 }
 0x116   :  { %2168 = vmatpush.msra.mxu3 %v5692_v51  ;;  %2099 = vmatpush.msra.mxu2 %v8229_v23  ;;  %8242 = vst [vmem:[#allocation7_spill] sm:$0xff] %v6073_v25 }
 0x117   :  { %1851 = vmatpush.msrb.mxu1 %v8230_v52  ;;  %1999 = vmatmul.f32.vlgmr.msrb.gmra.mxu3 %v5663_v46  ;;  %v6087_v9 = vpop.f32.mrf.mxu0  ;;  %v61_v52 = vld [vmem:[%s7919_s2 + $0x110] sm:$0xff] }
 0x118   :  { %2011 = vmatpush.msra.mxu0 %v8232_v32  ;;  %2103 = vmatpush.msra.mxu2 %v8233_v63  ;;  %8246 = vst [vmem:[#allocation12_spill] sm:$0xff] %v6087_v9 }
 0x119   :  { %2170 = vmatpush.msra.mxu3 %v5736_v47  ;;  %1853 = vmatpush.msrb.mxu1 %v8234_v45  ;;  %v6068_v10 = vpop.f32.mrf.mxu2  ;;  %v57_v45 = vld [vmem:[%s7919_s2 + $0xf0] sm:$0xff] }
 0x11a   :  { %2014 = vmatpush.msra.mxu0 %v8235_v3  ;;  %2107 = vmatpush.msra.mxu2 %v8236_v30  ;;  %8240 = vst [vmem:[#allocation3_spill] sm:$0xff] %v6068_v10  ;;  %v66_v10 = vld [vmem:[%s7919_s2 + $0x138] sm:$0xff] }
 0x11b   :  { %2172 = vmatpush.msra.mxu3 %v5751_v26  ;;  %1855 = vmatpush.msrb.mxu1 %v8238_v33 }
 0x11c   :  { %2017 = vmatpush.msra.mxu0 %v5818_v61  ;;  %1857 = vmatmul.f32.vlgmr.msrb.gmra.mxu1 %v5663_v46  ;;  %v8245_v61 = vand.u32 4294901760, %v5844_v44 }
 0x11d   :  { %2111 = vmatpush.msra.mxu2 %v8239_v41  ;;  %2058 = vmatpush.msra.mxu1 %v5675_v1  ;;  %v8244_v1 = vand.u32 4294901760, %v5834_v60 }
 0x11e   :  { %2174 = vmatpush.msra.mxu3 %v5779_v37  ;;  %2020 = vmatpush.msra.mxu0 %v5834_v60  ;;  %v6111_v60 = vpop.f32.mrf.mxu3 }
 0x11f   :  { %2115 = vmatpush.msra.mxu2 %v8241_v24  ;;  %2060 = vmatpush.msra.mxu1 %v5692_v51  ;;  %v8247_v51 = vand.u32 4294901760, %v5859_v2  ;;  %8252 = vst [vmem:[#allocation15_spill] sm:$0xff] %v6111_v60  ;;  %v876_v58 = vpop.f32.mrf.mxu0  ;;  %v6221_v24 = vand.u32 4294901760, %v61_v52 }
 0x120   :  { %2176 = vmatpush.msra.mxu3 %v5800_v27  ;;  %2023 = vmatpush.msra.mxu0 %v5844_v44  ;;  %v8248_v44 = vand.u32 4294901760, %v5884_v36 }
 0x121   :  { %2119 = vmatpush.msra.mxu2 %v8244_v1  ;;  %2062 = vmatpush.msra.mxu1 %v5736_v47  ;;  %v6099_v47 = vpop.f32.mrf.mxu1  ;;  %v53_v1 = vld [vmem:[%s7919_s2 + $0xd0] sm:$0xff] }
 0x122   :  { %2178 = vmatpush.msra.mxu3 %v5811_v20  ;;  %2026 = vmatpush.msra.mxu0 %v5859_v2  ;;  %8249 = vst [vmem:[#allocation13_spill] sm:$0xff] %v6099_v47  ;;  %v8251_v2 = vand.u32 4294901760, %v5900_v4 }
 0x123   :  { %2123 = vmatpush.msra.mxu2 %v8245_v61  ;;  %2064 = vmatpush.msra.mxu1 %v5751_v26  ;;  %v6103_v26 = vpop.f32.mrf.mxu2 }
 0x124   :  { %2180 = vmatpush.msra.mxu3 %v5825_v6  ;;  %2029 = vmatpush.msra.mxu0 %v5884_v36  ;;  %8250 = vst [vmem:[#allocation14_spill] sm:$0xff] %v6103_v26  ;;  %v85_v36 = vld [vmem:[%s7919_s2 + $0x1d0] sm:$0xff] }
 0x125   :  { %2127 = vmatpush.msra.mxu2 %v8247_v51  ;;  %2066 = vmatpush.msra.mxu1 %v5779_v37  ;;  %v89_v37 = vld [vmem:[%s7919_s2 + $0x1f0] sm:$0xff] }
 0x126   :  { %2182 = vmatpush.msra.mxu3 %v5852_v38  ;;  %2032 = vmatpush.msra.mxu0 %v5900_v4  ;;  %v6123_v4 = vand.u32 4294901760, %v89_v37 }
 0x127   :  { %2131 = vmatpush.msra.mxu2 %v8248_v44  ;;  %2068 = vmatpush.msra.mxu1 %v5800_v27  ;;  %v8253_v27 = vand.u32 4294901760, %v5915_v56 }
 0x128   :  { %2184 = vmatpush.msra.mxu3 %v5870_v53  ;;  %2035 = vmatpush.msra.mxu0 %v5915_v56  ;;  %v6133_v56 = vand.u32 4294901760, %v85_v36 }
 0x129   :  { %2135 = vmatpush.msra.mxu2 %v8251_v2  ;;  %2070 = vmatpush.msra.mxu1 %v5811_v20  ;;  %v81_v20 = vld [vmem:[%s7919_s2 + $0x1b0] sm:$0xff] }
 0x12a   :  { %2186 = vmatpush.msra.mxu3 %v5886_v18  ;;  %2038 = vmatpush.msra.mxu0 %v5930_v7  ;;  %v6144_v7 = vsub.f32 %v89_v37, %v6123_v4  ;;  %v49_v2 = vld [vmem:[%s7919_s2 + $0xb0] sm:$0xff] }
 0x12b   :  { %2139 = vmatpush.msra.mxu2 %v8253_v27  ;;  %2072 = vmatpush.msra.mxu1 %v5825_v6  ;;  %v77_v6 = vld [vmem:[%s7919_s2 + $0x190] sm:$0xff] }
 0x12c   :  { %2188 = vmatpush.msra.mxu3 %v5902_v48  ;;  %2041 = vmatpush.msra.mxu0 %v5945_v28  ;;  %v6151_v14 = vand.u32 4294901760, %v77_v6  ;;  %v8021_v8 = vand.u32 4294901760, %v6144_v7 }
 0x12d   :  { %2143 = vmatpush.msra.mxu2 %v1970_v15  ;;  %2074 = vmatpush.msra.mxu1 %v5852_v38  ;;  %v6146_v38 = vand.u32 4294901760, %v81_v20 }
 0x12e   :  { %2190 = vmatpush.msra.mxu3 %v5917_v54  ;;  %2044 = vmatpush.msra.mxu0 %v5958_v29  ;;  %v69_v29 = vld [vmem:[%s7919_s2 + $0x150] sm:$0xff]  ;;  %v6178_v31 = vsub.f32 %v77_v6, %v6151_v14  ;;  %v8256_v6 = vld [vmem:[#allocation9_spill] sm:$0xff] }
 0x12f   :  { %2147 = vmatpush.msra.mxu2 %v1976_v59  ;;  %2076 = vmatpush.msra.mxu1 %v5870_v53  ;;  %v977_v15 = vpop.f32.mrf.mxu1  ;;  %v73_v53 = vld [vmem:[%s7919_s2 + $0x170] sm:$0xff]  ;;  %v6159_v59 = vsub.f32 %v85_v36, %v6133_v56 }
 0x130   :  { %2192 = vmatpush.msra.mxu3 %v5932_v49  ;;  %2047 = vmatpush.msra.mxu0 %v5971_v21  ;;  %v978_v34 = vadd.f32 %v977_v15, %v876_v58  ;;  %v6172_v12 = vand.u32 4294901760, %v73_v53  ;;  %v6180_v21 = vand.u32 4294901760, %v69_v29  ;;  %v8017_v30 = vand.u32 4294901760, %v6178_v31 }
 0x131   :  { %2151 = vmatpush.msra.mxu2 %v1982_v35  ;;  %v1031_v28 = vpop.f32.mrf.mxu2  ;;  %2078 = vmatpush.msra.mxu1 %v5886_v18  ;;  %v1070_v35 = vpop.f32.mrf.mxu3  ;;  %v6170_v18 = vsub.f32 %v81_v20, %v6146_v38  ;;  %v8019_v62 = vand.u32 4294901760, %v6159_v59  ;;  %v6251_v58 = vsub.f32 %v61_v52, %v6221_v24  ;;  %v6253_v20 = vand.u32 4294901760, %v53_v1 }
 0x132   :  { %2194 = vmatpush.msra.mxu3 %v5947_v57  ;;  %2050 = vmatpush.msra.mxu0 %v5982_v39  ;;  %v1032_v13 = vadd.f32 %v1031_v28, %v978_v34  ;;  %v6200_v32 = vsub.f32 %v73_v53, %v6172_v12  ;;  %v6211_v3 = vsub.f32 %v69_v29, %v6180_v21  ;;  %v6260_v34 = vand.u32 4294901760, %v49_v2  ;;  %v90_v53 = vld [vmem:[%s7919_s2 + $0x1f8] sm:$0xff] }
 0x133   :  { %2155 = vmatpush.msra.mxu2 %v1988_v43  ;;  %2080 = vmatpush.msra.mxu1 %v5902_v48  ;;  %v65_v48 = vld [vmem:[%s7919_s2 + $0x130] sm:$0xff]  ;;  %v2252_v41 = vsub.f32 %v6159_v59, %v8019_v62  ;;  %v2264_v37 = vsub.f32 %v6178_v31, %v8017_v30 }
 0x134   :  { %2196 = vmatpush.msra.mxu3 %v5960_v19  ;;  %2053 = vmatmul.f32.vlgmr.msra.gmra.mxu0 %v8254_v55  ;;  %v1071_v43 = vadd.f32 %v1070_v35, %v1032_v13  ;;  %v6202_v39 = vand.u32 4294901760, %v65_v48  ;;  %v8014_v27 = vand.u32 4294901760, %v6211_v3 }
 0x135   :  { %2203 = vmatpush.msrb.mxu0 %v6123_v4  ;;  %2082 = vmatpush.msra.mxu1 %v5917_v54  ;;  %v1139_v0 = vpop.f32.mrf.mxu0  ;;  %v2246_v54 = vsub.f32 %v6144_v7, %v8021_v8  ;;  %v2253_v36 = vand.u32 4294901760, %v2252_v41  ;;  %v2265_v13 = vand.u32 4294901760, %v2264_v37  ;;  %v37_v37 = vld [vmem:[%s7919_s2 + $0x50] sm:$0xff] }
 0x136   :  { %2399 = vmatpush.msrb.mxu3 %v6123_v4  ;;  %2159 = vmatpush.msra.mxu2 %v1994_v40  ;;  %v1140_v23 = vadd.f32 %v1139_v0, %v1071_v43  ;;  %v8018_v40 = vand.u32 4294901760, %v6170_v18  ;;  %v6236_v44 = vsub.f32 %v65_v48, %v6202_v39  ;;  %v2276_v43 = vsub.f32 %v6211_v3, %v8014_v27  ;;  %v41_v48 = vld [vmem:[%s7919_s2 + $0x70] sm:$0xff]  ;;  %v86_v0 = vld [vmem:[%s7919_s2 + $0x1d8] sm:$0xff] }
 0x137   :  { %2205 = vmatpush.msrb.mxu0 %v6133_v56  ;;  %2084 = vmatpush.msra.mxu1 %v5932_v49  ;;  %v6225_v49 = vand.u32 4294901760, %v57_v45  ;;  %v2247_v61 = vand.u32 4294901760, %v2246_v54  ;;  %v8016_v54 = vand.u32 4294901760, %v6251_v58 }
 0x138   :  { %2401 = vmatpush.msrb.mxu3 %v6133_v56  ;;  %2346 = vmatpush.msrb.mxu2 %v6144_v7  ;;  %v1176_v63 = vpop.f32.mrf.mxu1  ;;  %v2258_v51 = vsub.f32 %v6170_v18, %v8018_v40  ;;  %v8013_v35 = vand.u32 4294901760, %v6236_v44 }
 0x139   :  { %2161 = vmatmul.f32.vlgmr.msra.gmra.mxu2 %v5663_v46  ;;  %v6214_v33 = vadd.f32 %v1176_v63, %v1140_v23  ;;  %2207 = vmatpush.msrb.mxu0 %v6146_v38  ;;  %v6258_v15 = vsub.f32 %v57_v45, %v6225_v49  ;;  %v6286_v23 = vsub.f32 %v53_v1, %v6253_v20  ;;  %v6291_v63 = vand.u32 4294901760, %v90_v53 }
 0x13a   :  { %2349 = vmatpush.msrb.mxu2 %v6159_v59  ;;  %2403 = vmatpush.msrb.mxu3 %v6146_v38  ;;  %v2259_v28 = vand.u32 4294901760, %v2258_v51  ;;  %v6296_v45 = vsub.f32 %v49_v2, %v6260_v34  ;;  %v6303_v51 = vand.u32 4294901760, %v41_v48  ;;  %v2277_v2 = vand.u32 4294901760, %v2276_v43  ;;  %v33_v43 = vld [vmem:[%s7919_s2 + $0x30] sm:$0xff] }
 0x13b   :  { %8255 = vst [vmem:[#allocation16_spill] sm:$0xff] %v6214_v33  ;;  %2086 = vmatpush.msra.mxu1 %v5947_v57  ;;  %2198 = vmatmul.f32.vlgmr.msra.gmra.mxu3 %v5663_v46  ;;  %v8015_v57 = vand.u32 4294901760, %v6200_v32  ;;  %v8020_v41 = vand.u32 4294901760, %v6258_v15  ;;  %v8022_v27 = vand.u32 4294901760, %v6286_v23  ;;  %v74_v33 = vld [vmem:[%s7919_s2 + $0x178] sm:$0xff] }
 0x13c   :  { %2209 = vmatpush.msrb.mxu0 %v6151_v14  ;;  %2352 = vmatpush.msrb.mxu2 %v6170_v18  ;;  %8257 = vst [vmem:[#allocation9_spill] sm:$0xff] %v6303_v51  ;;  %v6339_v40 = vsub.f32 %v41_v48, %v6303_v51  ;;  %v29_v48 = vld [vmem:[%s7919_s2 + $0x10] sm:$0xff]  ;;  %v8262_v60 = vand.u32 4294901760, %v6296_v45 }
 0x13d   :  { %2405 = vmatpush.msrb.mxu3 %v6151_v14  ;;  %2088 = vmatpush.msra.mxu1 %v5960_v19  ;;  %v45_v19 = vld [vmem:[%s7919_s2 + $0x90] sm:$0xff]  ;;  %v2270_v29 = vsub.f32 %v6200_v32, %v8015_v57  ;;  %v6327_v57 = vsub.f32 %v90_v53, %v6291_v63 }
 0x13e   :  { %2211 = vmatpush.msrb.mxu0 %v6172_v12  ;;  %2092 = vmatmul.f32.vlgmr.msra.gmra.mxu1 %v8256_v6  ;;  %v6288_v52 = vand.u32 4294901760, %v45_v19 }
 0x13f   :  { %2355 = vmatpush.msrb.mxu2 %v6178_v31  ;;  %2248 = vmatpush.msrb.mxu1 %v2247_v61  ;;  %v2271_v1 = vand.u32 4294901760, %v2270_v29  ;;  %v2282_v61 = vsub.f32 %v6236_v44, %v8013_v35  ;;  %v2288_v29 = vsub.f32 %v6251_v58, %v8016_v54  ;;  %8258 = vst [vmem:[#allocation17_spill] sm:$0xff] %v6327_v57  ;;  %v6334_v54 = vand.u32 4294901760, %v37_v37 }
 0x140   :  { %2407 = vmatpush.msrb.mxu3 %v6172_v12  ;;  %2213 = vmatpush.msrb.mxu0 %v6180_v21  ;;  %v6320_v35 = vsub.f32 %v45_v19, %v6288_v52  ;;  %v6376_v19 = vand.u32 4294901760, %v29_v48  ;;  %v8266_v9 = vand.u32 4294901760, %v6327_v57 }
 0x141   :  { %2358 = vmatpush.msrb.mxu2 %v6200_v32  ;;  %2254 = vmatpush.msrb.mxu1 %v2253_v36  ;;  %v6308_v36 = vand.u32 4294901760, %v86_v0  ;;  %8259 = vst [vmem:[#allocation18_spill] sm:$0xff] %v6334_v54  ;;  %v2283_v30 = vand.u32 4294901760, %v2282_v61  ;;  %v2300_v61 = vsub.f32 %v6286_v23, %v8022_v27  ;;  %v6371_v26 = vsub.f32 %v37_v37, %v6334_v54 }
 0x142   :  { %2409 = vmatpush.msrb.mxu3 %v6180_v21  ;;  %2215 = vmatpush.msrb.mxu0 %v6202_v39  ;;  %8263 = vst [vmem:[#allocation21_spill] sm:$0xff] %v6376_v19  ;;  %v6391_v37 = vand.u32 4294901760, %v74_v33  ;;  %v2587_v22 = vsub.f32 %v6327_v57, %v8266_v9  ;;  %v8268_v9 = vand.u32 4294901760, %v6339_v40  ;;  %v6416_v5 = vsub.f32 %v29_v48, %v6376_v19 }
 0x143   :  { %2361 = vmatpush.msrb.mxu2 %v6211_v3  ;;  %2260 = vmatpush.msrb.mxu1 %v2259_v28  ;;  %v82_v28 = vld [vmem:[%s7919_s2 + $0x1b8] sm:$0xff]  ;;  %v6342_v53 = vsub.f32 %v86_v0, %v6308_v36  ;;  %v2289_v0 = vand.u32 4294901760, %v2288_v29  ;;  %v2306_v29 = vsub.f32 %v6296_v45, %v8262_v60  ;;  %v2301_v47 = vand.u32 4294901760, %v2300_v61 }
 0x144   :  { %2411 = vmatpush.msrb.mxu3 %v6202_v39  ;;  %2217 = vmatpush.msrb.mxu0 %v6221_v24  ;;  %v6344_v62 = vand.u32 4294901760, %v82_v28  ;;  %v70_v60 = vld [vmem:[%s7919_s2 + $0x158] sm:$0xff]  ;;  %v6431_v48 = vand.u32 4294901760, %v66_v10  ;;  %v8271_v50 = vand.u32 4294901760, %v6371_v26 }
 0x145   :  { %2364 = vmatpush.msrb.mxu2 %v6236_v44  ;;  %2266 = vmatpush.msrb.mxu1 %v2265_v13  ;;  %v2294_v13 = vsub.f32 %v6258_v15, %v8020_v41  ;;  %8260 = vst [vmem:[#allocation19_spill] sm:$0xff] %v6342_v53  ;;  %v78_v41 = vld [vmem:[%s7919_s2 + $0x198] sm:$0xff]  ;;  %v6409_v25 = vand.u32 4294901760, %v70_v60  ;;  %v8269_v11 = vand.u32 4294901760, %v6342_v53 }
 0x146   :  { %2413 = vmatpush.msrb.mxu3 %v6221_v24  ;;  %2219 = vmatpush.msrb.mxu0 %v6225_v49  ;;  %v6373_v27 = vand.u32 4294901760, %v78_v41  ;;  %v2324_v16 = vsub.f32 %v6371_v26, %v8271_v50 }
 0x147   :  { %2367 = vmatpush.msrb.mxu2 %v6251_v58  ;;  %2272 = vmatpush.msrb.mxu1 %v2271_v1  ;;  %v6351_v1 = vand.u32 4294901760, %v33_v43 }
 0x148   :  { %2415 = vmatpush.msrb.mxu3 %v6225_v49  ;;  %2221 = vmatpush.msrb.mxu0 %v6253_v20  ;;  %v6407_v61 = vsub.f32 %v78_v41, %v6373_v27  ;;  %v62_v41 = vld [vmem:[%s7919_s2 + $0x118] sm:$0xff] }
 0x149   :  { %2370 = vmatpush.msrb.mxu2 %v6258_v15  ;;  %8261 = vst [vmem:[#allocation20_spill] sm:$0xff] %v6351_v1  ;;  %2278 = vmatpush.msrb.mxu1 %v2277_v2  ;;  %v2295_v2 = vand.u32 4294901760, %v2294_v13  ;;  %v6381_v13 = vsub.f32 %v82_v28, %v6344_v62  ;;  %v8265_v28 = vand.u32 4294901760, %v6320_v35 }
 0x14a   :  { %2417 = vmatpush.msrb.mxu3 %v6253_v20  ;;  %2223 = vmatpush.msrb.mxu0 %v6260_v34  ;;  %8267 = vst [vmem:[#allocation23_spill] sm:$0xff] %v6407_v61 }
 0x14b   :  { %2373 = vmatpush.msrb.mxu2 %v6286_v23  ;;  %2284 = vmatpush.msrb.mxu1 %v2283_v30  ;;  %8264 = vst [vmem:[#allocation22_spill] sm:$0xff] %v6381_v13  ;;  %v6389_v30 = vsub.f32 %v33_v43, %v6351_v1  ;;  %v2312_v8 = vsub.f32 %v6320_v35, %v8265_v28  ;;  %v2307_v43 = vand.u32 4294901760, %v2306_v29 }
 0x14c   :  { %2419 = vmatpush.msrb.mxu3 %v6260_v34  ;;  %2225 = vmatpush.msrb.mxu0 %v6288_v52  ;;  %v2318_v28 = vsub.f32 %v6339_v40, %v8268_v9  ;;  %v2593_v29 = vsub.f32 %v6342_v53, %v8269_v11  ;;  %v6429_v9 = vsub.f32 %v74_v33, %v6391_v37  ;;  %v6443_v53 = vand.u32 4294901760, %v62_v41 }
 0x14d   :  { %2376 = vmatpush.msrb.mxu2 %v6296_v45  ;;  %2290 = vmatpush.msrb.mxu1 %v2289_v0  ;;  %v2313_v11 = vand.u32 4294901760, %v2312_v8  ;;  %v2588_v0 = vand.u32 4294901760, %v2587_v22  ;;  %v6441_v33 = vsub.f32 %v70_v60, %v6409_v25  ;;  %v58_v22 = vld [vmem:[%s7919_s2 + $0xf8] sm:$0xff]  ;;  %v8274_v60 = vand.u32 4294901760, %v6389_v30 }
 0x14e   :  { %2421 = vmatpush.msrb.mxu3 %v6288_v52  ;;  %2227 = vmatpush.msrb.mxu0 %v6303_v51  ;;  %8270 = vst [vmem:[#allocation24_spill] sm:$0xff] %v6429_v9  ;;  %v2594_v8 = vand.u32 4294901760, %v2593_v29  ;;  %v6466_v29 = vand.u32 4294901760, %v58_v22 }
 0x14f   :  { %2379 = vmatpush.msrb.mxu2 %v6320_v35  ;;  %2296 = vmatpush.msrb.mxu1 %v2295_v2  ;;  %8272 = vst [vmem:[#allocation25_spill] sm:$0xff] %v6441_v33  ;;  %v2330_v57 = vsub.f32 %v6389_v30, %v8274_v60  ;;  %v2325_v2 = vand.u32 4294901760, %v2324_v16  ;;  %v8275_v60 = vand.u32 4294901760, %v6407_v61  ;;  %v8277_v16 = vand.u32 4294901760, %v6416_v5 }
 0x150   :  { %2423 = vmatpush.msrb.mxu3 %v6303_v51  ;;  %2229 = vmatpush.msrb.mxu0 %v6334_v54 }
 0x151   :  { %2382 = vmatpush.msrb.mxu2 %v6339_v40  ;;  %2302 = vmatpush.msrb.mxu1 %v2301_v47  ;;  %v1318_v42 = vpop.f32.mrf.mxu3  ;;  %v2319_v47 = vand.u32 4294901760, %v2318_v28  ;;  %v6460_v28 = vsub.f32 %v66_v10, %v6431_v48  ;;  %v8278_v10 = vand.u32 4294901760, %v6429_v9 }
 0x152   :  { %2425 = vmatpush.msrb.mxu3 %v6334_v54  ;;  %2231 = vmatpush.msrb.mxu0 %v6351_v1  ;;  %v8273_v54 = vand.u32 4294901760, %v6381_v13 }
 0x153   :  { %2385 = vmatpush.msrb.mxu2 %v6371_v26  ;;  %2308 = vmatpush.msrb.mxu1 %v2307_v43  ;;  %v1217_v51 = vpop.f32.mrf.mxu2  ;;  %v8276_v43 = vand.u32 4294901760, %v6144_v7 }
 0x154   :  { %2427 = vmatpush.msrb.mxu3 %v6351_v1  ;;  %v2599_v50 = vsub.f32 %v6381_v13, %v8273_v54  ;;  %2233 = vmatpush.msrb.mxu0 %v6376_v19  ;;  %v1319_v1 = vadd.f32 %v1318_v42, %v1217_v51  ;;  %v54_v54 = vld [vmem:[%s7919_s2 + $0xd8] sm:$0xff]  ;;  %v2605_v42 = vsub.f32 %v6407_v61, %v8275_v60 }
 0x155   :  { %2388 = vmatpush.msrb.mxu2 %v6389_v30  ;;  %2314 = vmatpush.msrb.mxu1 %v2313_v11  ;;  %v6474_v51 = vsub.f32 %v62_v41, %v6443_v53  ;;  %v50_v11 = vld [vmem:[%s7919_s2 + $0xb8] sm:$0xff]  ;;  %v6484_v60 = vand.u32 4294901760, %v54_v54  ;;  %v2331_v41 = vand.u32 4294901760, %v2330_v57  ;;  %v2611_v61 = vsub.f32 %v6429_v9, %v8278_v10 }
 0x156   :  { %2429 = vmatpush.msrb.mxu3 %v6376_v19  ;;  %2239 = vmatmul.f32.vlgmr.msrb.gmra.mxu0 %v5815_v17  ;;  %v2600_v19 = vand.u32 4294901760, %v2599_v50  ;;  %v8279_v50 = vand.u32 4294901760, %v6159_v59  ;;  %v6500_v57 = vand.u32 4294901760, %v50_v11  ;;  %v42_v59 = vld [vmem:[%s7919_s2 + $0x78] sm:$0xff]  ;;  %v8282_v10 = vand.u32 4294901760, %v6460_v28 }
 0x157   :  { %2440 = vmatpush.msra.mxu0 %v8276_v43  ;;  %2320 = vmatpush.msrb.mxu1 %v2319_v47  ;;  %v46_v47 = vld [vmem:[%s7919_s2 + $0x98] sm:$0xff] }
 0x158   :  { %2589 = vmatpush.msra.mxu3 %v2588_v0  ;;  %v2336_v0 = vsub.f32 %v6416_v5, %v8277_v16  ;;  %v1372_v13 = vpop.f32.mrf.mxu0  ;;  %2391 = vmatpush.msrb.mxu2 %v6416_v5  ;;  %v6498_v16 = vsub.f32 %v58_v22, %v6466_v29  ;;  %v8281_v22 = vand.u32 4294901760, %v6170_v18  ;;  %v6516_v9 = vand.u32 4294901760, %v46_v47  ;;  %v38_v18 = vld [vmem:[%s7919_s2 + $0x58] sm:$0xff] }
 0x159   :  { %v1373_v43 = vadd.f32 %v1372_v13, %v1319_v1  ;;  %2444 = vmatpush.msra.mxu0 %v8279_v50  ;;  %2326 = vmatpush.msrb.mxu1 %v2325_v2  ;;  %v8280_v1 = vand.u32 4294901760, %v6441_v33 }
 0x15a   :  { %2595 = vmatpush.msra.mxu3 %v2594_v8  ;;  %2544 = vmatpush.msra.mxu2 %v6291_v63  ;;  %v2606_v8 = vand.u32 4294901760, %v2605_v42  ;;  %v2337_v2 = vand.u32 4294901760, %v2336_v0  ;;  %v6514_v42 = vsub.f32 %v54_v54, %v6484_v60  ;;  %v8283_v0 = vand.u32 4294901760, %v6178_v31  ;;  %v34_v31 = vld [vmem:[%s7919_s2 + $0x38] sm:$0xff] }
 0x15b   :  { %2394 = vmatmul.f32.vlgmr.msrb.gmra.mxu2 %v8254_v55  ;;  %v2617_v13 = vsub.f32 %v6441_v33, %v8280_v1  ;;  %v1411_v7 = vpop.f32.mrf.mxu1  ;;  %2448 = vmatpush.msra.mxu0 %v8281_v22  ;;  %v1480_v55 = vpop.f32.mrf.mxu2  ;;  %v2612_v1 = vand.u32 4294901760, %v2611_v61  ;;  %v2623_v33 = vsub.f32 %v6460_v28, %v8282_v10  ;;  %v2634_v54 = vand.u32 4294901760, %v6498_v16 }
 0x15c   :  { %2546 = vmatpush.msra.mxu2 %v6308_v36  ;;  %v1412_v50 = vadd.f32 %v1411_v7, %v1373_v43  ;;  %2601 = vmatpush.msra.mxu3 %v2600_v19  ;;  %v6529_v19 = vsub.f32 %v50_v11, %v6500_v57  ;;  %v6531_v61 = vand.u32 4294901760, %v42_v59  ;;  %v8284_v43 = vand.u32 4294901760, %v6474_v51 }
 0x15d   :  { %2332 = vmatpush.msrb.mxu1 %v2331_v41  ;;  %2433 = vmatmul.f32.vlgmr.msrb.gmra.mxu3 %v8256_v6  ;;  %v2618_v41 = vand.u32 4294901760, %v2617_v13  ;;  %v2640_v11 = vand.u32 4294901760, %v6514_v42  ;;  %v6548_v13 = vand.u32 4294901760, %v38_v18 }
 0x15e   :  { %2452 = vmatpush.msra.mxu0 %v8283_v0  ;;  %v1481_v7 = vadd.f32 %v1480_v55, %v1412_v50  ;;  %2548 = vmatpush.msra.mxu2 %v6344_v62  ;;  %v2629_v10 = vsub.f32 %v6474_v51, %v8284_v43  ;;  %v1517_v22 = vpop.f32.mrf.mxu3  ;;  %v8285_v55 = vand.u32 4294901760, %v6200_v32  ;;  %v2624_v0 = vand.u32 4294901760, %v2623_v33 }
 0x15f   :  { %2607 = vmatpush.msra.mxu3 %v2606_v8  ;;  %2338 = vmatpush.msrb.mxu1 %v2337_v2  ;;  %v6546_v8 = vsub.f32 %v46_v47, %v6516_v9  ;;  %v30_v2 = vld [vmem:[%s7919_s2 + $0x18] sm:$0xff]  ;;  %v2635_v32 = vsub.f32 %v6498_v16, %v2634_v54  ;;  %v2646_v47 = vand.u32 4294901760, %v6529_v19  ;;  %v6563_v43 = vand.u32 4294901760, %v34_v31 }
 0x160   :  { %2456 = vmatpush.msra.mxu0 %v8285_v55  ;;  %v6543_v50 = vadd.f32 %v1517_v22, %v1481_v7  ;;  %2340 = vmatmul.f32.vlgmr.msrb.gmra.mxu1 %v5663_v46  ;;  %v6561_v7 = vsub.f32 %v42_v59, %v6531_v61  ;;  %v8287_v33 = vand.u32 4294901760, %v6211_v3  ;;  %v2630_v22 = vand.u32 4294901760, %v2629_v10 }
 0x161   :  { %2550 = vmatpush.msra.mxu2 %v6373_v27  ;;  %2507 = vmatpush.msra.mxu1 %v6123_v4  ;;  %v2641_v4 = vsub.f32 %v6514_v42, %v2640_v11  ;;  %v6574_v59 = vsub.f32 %v38_v18, %v6548_v13  ;;  %v6576_v55 = vand.u32 4294901760, %v30_v2  ;;  %v8288_v3 = vand.u32 4294901760, %v6236_v44 }
 0x162   :  { %8286 = vst [vmem:[#allocation26_spill] sm:$0xff] %v6543_v50  ;;  %2613 = vmatpush.msra.mxu3 %v2612_v1  ;;  %2460 = vmatpush.msra.mxu0 %v8287_v33  ;;  %v2652_v1 = vand.u32 4294901760, %v6546_v8  ;;  %v2658_v10 = vand.u32 4294901760, %v6561_v7  ;;  %v6587_v18 = vsub.f32 %v34_v31, %v6563_v43  ;;  %v8289_v33 = vand.u32 4294901760, %v6251_v58 }
 0x163   :  { %2552 = vmatpush.msra.mxu2 %v6391_v37  ;;  %2509 = vmatpush.msra.mxu1 %v6133_v56  ;;  %v2636_v56 = vand.u32 4294901760, %v2635_v32  ;;  %v6598_v32 = vsub.f32 %v30_v2, %v6576_v55  ;;  %v8290_v31 = vand.u32 4294901760, %v6258_v15 }
 0x164   :  { %2619 = vmatpush.msra.mxu3 %v2618_v41  ;;  %2464 = vmatpush.msra.mxu0 %v8288_v3  ;;  %v2647_v41 = vsub.f32 %v6529_v19, %v2646_v47  ;;  %v2653_v44 = vsub.f32 %v6546_v8, %v2652_v1  ;;  %v2659_v58 = vsub.f32 %v6561_v7, %v2658_v10  ;;  %v8292_v3 = vand.u32 4294901760, %v6296_v45 }
 0x165   :  { %2554 = vmatpush.msra.mxu2 %v6409_v25  ;;  %2511 = vmatpush.msra.mxu1 %v6146_v38  ;;  %v2642_v38 = vand.u32 4294901760, %v2641_v4  ;;  %v8291_v4 = vand.u32 4294901760, %v6286_v23  ;;  %v2676_v2 = vand.u32 4294901760, %v6598_v32 }
 0x166   :  { %2625 = vmatpush.msra.mxu3 %v2624_v0  ;;  %2468 = vmatpush.msra.mxu0 %v8289_v33  ;;  %v2664_v0 = vand.u32 4294901760, %v6574_v59  ;;  %v2654_v15 = vand.u32 4294901760, %v2653_v44  ;;  %v2660_v23 = vand.u32 4294901760, %v2659_v58  ;;  %v8295_v33 = vand.u32 4294901760, %v6371_v26  ;;  %v8298_v26 = vld [vmem:[#allocation17_spill] sm:$0xff]  ;;  %v8305_v44 = vld [vmem:[#allocation11_spill] sm:$0xff] }
 0x167   :  { %2556 = vmatpush.msra.mxu2 %v6431_v48  ;;  %2513 = vmatpush.msra.mxu1 %v6151_v14  ;;  %v2648_v14 = vand.u32 4294901760, %v2647_v41  ;;  %v2677_v41 = vsub.f32 %v6598_v32, %v2676_v2  ;;  %v8308_v58 = vld [vmem:[#allocation23_spill] sm:$0xff] }
 0x168   :  { %2631 = vmatpush.msra.mxu3 %v2630_v22  ;;  %2472 = vmatpush.msra.mxu0 %v8290_v31  ;;  %v2670_v22 = vand.u32 4294901760, %v6587_v18 }
 0x169   :  { %2558 = vmatpush.msra.mxu2 %v6443_v53  ;;  %2515 = vmatpush.msra.mxu1 %v6172_v12  ;;  %v2665_v12 = vsub.f32 %v6574_v59, %v2664_v0 }
 0x16a   :  { %2637 = vmatpush.msra.mxu3 %v2636_v56  ;;  %2476 = vmatpush.msra.mxu0 %v8291_v4  ;;  %v8293_v56 = vand.u32 4294901760, %v6320_v35 }
 0x16b   :  { %2560 = vmatpush.msra.mxu2 %v6466_v29  ;;  %2517 = vmatpush.msra.mxu1 %v6180_v21  ;;  %v2671_v21 = vsub.f32 %v6587_v18, %v2670_v22  ;;  %v2666_v45 = vand.u32 4294901760, %v2665_v12  ;;  %v8311_v12 = vld [vmem:[#allocation24_spill] sm:$0xff] }
 0x16c   :  { %2643 = vmatpush.msra.mxu3 %v2642_v38  ;;  %2480 = vmatpush.msra.mxu0 %v8292_v3  ;;  %v8296_v38 = vand.u32 4294901760, %v6389_v30  ;;  %v8304_v30 = vld [vmem:[#allocation4_spill] sm:$0xff]  ;;  %v8312_v3 = vld [vmem:[#allocation2_spill] sm:$0xff] }
 0x16d   :  { %2562 = vmatpush.msra.mxu2 %v6484_v60  ;;  %2519 = vmatpush.msra.mxu1 %v6202_v39  ;;  %v8294_v39 = vand.u32 4294901760, %v6339_v40  ;;  %v2672_v35 = vand.u32 4294901760, %v2671_v21  ;;  %v8297_v40 = vand.u32 4294901760, %v6416_v5  ;;  %v8300_v5 = vld [vmem:[#allocation19_spill] sm:$0xff]  ;;  %v296_v31 = vadd.f32 %v8305_v44, %v8304_v30  ;;  %v8324_v44 = vld [vmem:[#allocation6_spill] sm:$0xff] }
 0x16e   :  { %2649 = vmatpush.msra.mxu3 %v2648_v14  ;;  %2484 = vmatpush.msra.mxu0 %v8293_v56  ;;  %v8306_v14 = vand.u32 4294901760, %v8300_v5  ;;  %v8313_v21 = vand.u32 4294901760, %v8308_v58  ;;  %v8314_v56 = vld [vmem:[#allocation25_spill] sm:$0xff]  ;;  %v8323_v30 = vld [vmem:[#allocation3_spill] sm:$0xff] }
 0x16f   :  { %2564 = vmatpush.msra.mxu2 %v6500_v57  ;;  %2521 = vmatpush.msra.mxu1 %v6221_v24  ;;  %v2678_v24 = vand.u32 4294901760, %v2677_v41  ;;  %v8316_v41 = vld [vmem:[#allocation8_spill] sm:$0xff] }
 0x170   :  { %2655 = vmatpush.msra.mxu3 %v2654_v15  ;;  %2488 = vmatpush.msra.mxu0 %v8294_v39  ;;  %v8310_v15 = vld [vmem:[#allocation21_spill] sm:$0xff] }
 0x171   :  { %2566 = vmatpush.msra.mxu2 %v6516_v9  ;;  %2523 = vmatpush.msra.mxu1 %v6225_v49  ;;  %v8299_v49 = vld [vmem:[#allocation9_spill] sm:$0xff] }
 0x172   :  { %2661 = vmatpush.msra.mxu3 %v2660_v23  ;;  %2492 = vmatpush.msra.mxu0 %v8295_v33  ;;  %v350_v23 = vadd.f32 %v8312_v3, %v296_v31  ;;  %v637_v31 = vadd.f32 %v8324_v44, %v8323_v30  ;;  %v2909_v3 = vld [vmem:[%s7921_s5 + $0x38] sm:$0xff] }
 0x173   :  { %2568 = vmatpush.msra.mxu2 %v6531_v61  ;;  %2525 = vmatpush.msra.mxu1 %v6253_v20  ;;  %v8301_v20 = vand.u32 4294901760, %v8298_v26 }
 0x174   :  { %2667 = vmatpush.msra.mxu3 %v2666_v45  ;;  %2496 = vmatpush.msra.mxu0 %v8296_v38  ;;  %v8315_v45 = vand.u32 4294901760, %v8311_v12  ;;  %v389_v39 = vadd.f32 %v8316_v41, %v350_v23  ;;  %v2908_v41 = vld [vmem:[%s7921_s5 + $0x30] sm:$0xff] }
 0x175   :  { %2570 = vmatpush.msra.mxu2 %v6548_v13  ;;  %2527 = vmatpush.msra.mxu1 %v6260_v34  ;;  %v8302_v34 = vld [vmem:[#allocation18_spill] sm:$0xff] }
 0x176   :  { %2673 = vmatpush.msra.mxu3 %v2672_v35  ;;  %2500 = vmatpush.msra.mxu0 %v8297_v40  ;;  %v8317_v35 = vand.u32 4294901760, %v8314_v56 }
 0x177   :  { %2572 = vmatpush.msra.mxu2 %v6563_v43  ;;  %2529 = vmatpush.msra.mxu1 %v6288_v52  ;;  %v8303_v52 = vld [vmem:[#allocation22_spill] sm:$0xff] }
 0x178   :  { %2679 = vmatpush.msra.mxu3 %v2678_v24  ;;  %2502 = vmatmul.f32.vlgmr.msra.gmra.mxu0 %v5663_v46  ;;  %v8309_v4 = vand.u32 4294901760, %v8303_v52  ;;  %v8320_v24 = vand.u32 4294901760, %v6474_v51 }
 0x179   :  { %2687 = vmatpush.msrb.mxu0 %v8298_v26  ;;  %2531 = vmatpush.msra.mxu1 %v8299_v49  ;;  %v8322_v49 = vld [vmem:[#allocation5_spill] sm:$0xff] }
 0x17a   :  { %2848 = vmatpush.msrb.mxu3 %v6291_v63  ;;  %2574 = vmatpush.msra.mxu2 %v6576_v55 }
 0x17b   :  { %2580 = vmatmul.f32.vlgmr.msra.gmra.mxu2 %v5815_v17  ;;  %2690 = vmatpush.msrb.mxu0 %v8300_v5  ;;  %v8307_v17 = vld [vmem:[#allocation20_spill] sm:$0xff]  ;;  %v6786_v5 = vld [vmem:[%s7922_s4] sm:$0xf] }
 0x17c   :  { %2850 = vmatpush.msrb.mxu3 %v6308_v36  ;;  %2781 = vmatpush.msrb.mxu2 %v8301_v20 }
 0x17d   :  { %2533 = vmatpush.msra.mxu1 %v8302_v34  ;;  %2681 = vmatmul.f32.vlgmr.msra.gmra.mxu3 %v5663_v46 }
 0x17e   :  { %2693 = vmatpush.msrb.mxu0 %v8303_v52  ;;  %2785 = vmatpush.msrb.mxu2 %v8306_v14  ;;  %v2910_v52 = vld [vmem:[%s7921_s5 + $0x40] sm:$0xff] }
 0x17f   :  { %2852 = vmatpush.msrb.mxu3 %v6344_v62  ;;  %2535 = vmatpush.msra.mxu1 %v8307_v17 }
 0x180   :  { %2696 = vmatpush.msrb.mxu0 %v8308_v58  ;;  %2789 = vmatpush.msrb.mxu2 %v8309_v4 }
 0x181   :  { %2854 = vmatpush.msrb.mxu3 %v6373_v27  ;;  %2537 = vmatpush.msra.mxu1 %v8310_v15  ;;  %v6813_v15 = vand.u32 4294901760, %v2910_v52 }
 0x182   :  { %2699 = vmatpush.msrb.mxu0 %v8311_v12  ;;  %2539 = vmatmul.f32.vlgmr.msra.gmra.mxu1 %v5663_v46 }
 0x183   :  { %2793 = vmatpush.msrb.mxu2 %v8313_v21  ;;  %2740 = vmatpush.msrb.mxu1 %v6291_v63  ;;  %v8318_v63 = vand.u32 4294901760, %v6460_v28  ;;  %v8325_v21 = vld [vmem:[#allocation12_spill] sm:$0xff] }
 0x184   :  { %2856 = vmatpush.msrb.mxu3 %v6391_v37  ;;  %2702 = vmatpush.msrb.mxu0 %v8314_v56  ;;  %v691_v56 = vadd.f32 %v8325_v21, %v637_v31  ;;  %v2904_v31 = vld [vmem:[%s7921_s5 + $0x10] sm:$0xff]  ;;  %v2931_v21 = vld [vmem:[%s7921_s5 + $0xe8] sm:$0xff] }
 0x185   :  { %2797 = vmatpush.msrb.mxu2 %v8315_v45  ;;  %2742 = vmatpush.msrb.mxu1 %v6308_v36  ;;  %v8319_v36 = vld [vmem:[#allocation10_spill] sm:$0xff] }
 0x186   :  { %2858 = vmatpush.msrb.mxu3 %v6409_v25  ;;  %2705 = vmatpush.msrb.mxu0 %v6460_v28  ;;  %v458_v33 = vadd.f32 %v8319_v36, %v389_v39  ;;  %v8321_v28 = vld [vmem:[#allocation7_spill] sm:$0xff] }
 0x187   :  { %2801 = vmatpush.msrb.mxu2 %v8317_v35  ;;  %2744 = vmatpush.msrb.mxu1 %v6344_v62  ;;  %v1558_v62 = vpop.f32.mrf.mxu0  ;;  %v2907_v36 = vld [vmem:[%s7921_s5 + $0x28] sm:$0xff] }
 0x188   :  { %2860 = vmatpush.msrb.mxu3 %v6431_v48  ;;  %2708 = vmatpush.msrb.mxu0 %v6474_v51  ;;  %v495_v51 = vadd.f32 %v8321_v28, %v458_v33 }
 0x189   :  { %2805 = vmatpush.msrb.mxu2 %v8318_v63  ;;  %2746 = vmatpush.msrb.mxu1 %v6373_v27  ;;  %v2917_v27 = vld [vmem:[%s7921_s5 + $0x78] sm:$0xff]  ;;  %v6841_v63 = vand.u32 4294901760, %v2909_v3 }
 0x18a   :  { %2862 = vmatpush.msrb.mxu3 %v6443_v53  ;;  %2711 = vmatpush.msrb.mxu0 %v6498_v16  ;;  %v1559_v16 = vadd.f32 %v1558_v62, %v495_v51  ;;  %v2906_v51 = vld [vmem:[%s7921_s5 + $0x20] sm:$0xff] }
 0x18b   :  { %2809 = vmatpush.msrb.mxu2 %v8320_v24  ;;  %2748 = vmatpush.msrb.mxu1 %v6391_v37  ;;  %v1659_v37 = vpop.f32.mrf.mxu1  ;;  %v6855_v24 = vsub.f32 %v2910_v52, %v6813_v15 }
 0x18c   :  { %2864 = vmatpush.msrb.mxu3 %v6466_v29  ;;  %2714 = vmatpush.msrb.mxu0 %v6514_v42  ;;  %v1660_v42 = vadd.f32 %v1659_v37, %v1559_v16  ;;  %v8326_v37 = vld [vmem:[#allocation13_spill] sm:$0xff] }
 0x18d   :  { %2813 = vmatpush.msrb.mxu2 %v2634_v54  ;;  %2750 = vmatpush.msrb.mxu1 %v6409_v25  ;;  %v6716_v25 = vand.u32 4294901760, %v2917_v27  ;;  %v2916_v54 = vld [vmem:[%s7921_s5 + $0x70] sm:$0xff]  ;;  %v730_v16 = vadd.f32 %v8326_v37, %v691_v56 }
 0x18e   :  { %2866 = vmatpush.msrb.mxu3 %v6484_v60  ;;  %2717 = vmatpush.msrb.mxu0 %v6529_v19  ;;  %v1713_v19 = vpop.f32.mrf.mxu2 }
 0x18f   :  { %2817 = vmatpush.msrb.mxu2 %v2640_v11  ;;  %2752 = vmatpush.msrb.mxu1 %v6431_v48  ;;  %v2915_v48 = vld [vmem:[%s7921_s5 + $0x68] sm:$0xff]  ;;  %v6731_v11 = vand.u32 4294901760, %v2916_v54 }
 0x190   :  { %2868 = vmatpush.msrb.mxu3 %v6500_v57  ;;  %2720 = vmatpush.msrb.mxu0 %v6546_v8  ;;  %v6740_v8 = vsub.f32 %v2917_v27, %v6716_v25  ;;  %v6859_v27 = vand.u32 4294901760, %v2908_v41 }
 0x191   :  { %2821 = vmatpush.msrb.mxu2 %v2646_v47  ;;  %2754 = vmatpush.msrb.mxu1 %v6443_v53  ;;  %v2914_v53 = vld [vmem:[%s7921_s5 + $0x60] sm:$0xff]  ;;  %v1714_v47 = vadd.f32 %v1713_v19, %v1660_v42  ;;  %v2933_v42 = vld [vmem:[%s7921_s5 + $0xf8] sm:$0xff]  ;;  %v6881_v19 = vsub.f32 %v2909_v3, %v6841_v63 }
 0x192   :  { %2870 = vmatpush.msrb.mxu3 %v6516_v9  ;;  %2723 = vmatpush.msrb.mxu0 %v6561_v7  ;;  %v2913_v7 = vld [vmem:[%s7921_s5 + $0x58] sm:$0xff] }
 0x193   :  { %2825 = vmatpush.msrb.mxu2 %v2652_v1  ;;  %2756 = vmatpush.msrb.mxu1 %v6466_v29  ;;  %v6744_v29 = vand.u32 4294901760, %v2915_v48  ;;  %v6749_v1 = vand.u32 4294901760, %v2914_v53  ;;  %v6771_v40 = vand.u32 4294901760, %v2913_v7  ;;  %v8040_v44 = vand.u32 4294901760, %v6881_v19 }
 0x194   :  { %2872 = vmatpush.msrb.mxu3 %v6531_v61  ;;  %2726 = vmatpush.msrb.mxu0 %v6574_v59  ;;  %v8053_v59 = vand.u32 4294901760, %v6740_v8 }
 0x195   :  { %2829 = vmatpush.msrb.mxu2 %v2658_v10  ;;  %2758 = vmatpush.msrb.mxu1 %v6484_v60  ;;  %v1752_v10 = vpop.f32.mrf.mxu3  ;;  %v6757_v60 = vsub.f32 %v2916_v54, %v6731_v11  ;;  %v6769_v38 = vsub.f32 %v2915_v48, %v6744_v29  ;;  %v6805_v17 = vsub.f32 %v2913_v7, %v6771_v40  ;;  %v6868_v54 = vand.u32 4294901760, %v2907_v36 }
 0x196   :  { %2874 = vmatpush.msrb.mxu3 %v6548_v13  ;;  %2729 = vmatpush.msrb.mxu0 %v6587_v18  ;;  %v1753_v26 = vadd.f32 %v1752_v10, %v1714_v47  ;;  %v6776_v18 = vsub.f32 %v2914_v53, %v6749_v1  ;;  %v6887_v10 = vand.u32 4294901760, %v2906_v51  ;;  %v3062_v37 = vsub.f32 %v6881_v19, %v8040_v44 }
 0x197   :  { %2833 = vmatpush.msrb.mxu2 %v2664_v0  ;;  %2760 = vmatpush.msrb.mxu1 %v6500_v57  ;;  %v2912_v0 = vld [vmem:[%s7921_s5 + $0x50] sm:$0xff]  ;;  %v1821_v57 = vpop.f32.mrf.mxu0  ;;  %v8052_v34 = vand.u32 4294901760, %v6757_v60  ;;  %v8049_v4 = vand.u32 4294901760, %v6769_v38 }
 0x198   :  { %2876 = vmatpush.msrb.mxu3 %v6563_v43  ;;  %2732 = vmatpush.msrb.mxu0 %v6598_v32  ;;  %v6788_v20 = vand.u32 4294901760, %v2912_v0  ;;  %v1822_v14 = vadd.f32 %v1821_v57, %v1753_v26  ;;  %v8046_v12 = vand.u32 4294901760, %v6776_v18  ;;  %8327 = vst [vmem:[#allocation17_spill] sm:$0xff] %v6887_v10  ;;  %v6895_v26 = vsub.f32 %v2908_v41, %v6859_v27 }
 0x199   :  { %2837 = vmatpush.msrb.mxu2 %v2670_v22  ;;  %2762 = vmatpush.msrb.mxu1 %v6516_v9  ;;  %v2911_v9 = vld [vmem:[%s7921_s5 + $0x48] sm:$0xff]  ;;  %v1858_v22 = vpop.f32.mrf.mxu1  ;;  %v3026_v39 = vsub.f32 %v6769_v38, %v8049_v4 }
 0x19a   :  { %2878 = vmatpush.msrb.mxu3 %v6576_v55  ;;  %2735 = vmatmul.f32.vlgmr.msrb.gmra.mxu0 %v8322_v49  ;;  %v6807_v58 = vand.u32 4294901760, %v2911_v9  ;;  %v1859_v32 = vadd.f32 %v1858_v22, %v1822_v14  ;;  %v6825_v23 = vsub.f32 %v2912_v0, %v6788_v20  ;;  %v3032_v33 = vsub.f32 %v6776_v18, %v8046_v12  ;;  %v2932_v14 = vld [vmem:[%s7921_s5 + $0xf0] sm:$0xff] }
 0x19b   :  { %2971 = vmatpush.msra.mxu0 %v6716_v25  ;;  %2764 = vmatpush.msrb.mxu1 %v6531_v61  ;;  %v3014_v61 = vsub.f32 %v6740_v8, %v8053_v59  ;;  %v3027_v48 = vand.u32 4294901760, %v3026_v39  ;;  %v8041_v0 = vand.u32 4294901760, %v6855_v24  ;;  %v6904_v22 = vsub.f32 %v2907_v36, %v6868_v54 }
 0x19c   :  { %3167 = vmatpush.msra.mxu3 %v6716_v25  ;;  %2841 = vmatpush.msrb.mxu2 %v2676_v2  ;;  %v2886_v2 = vperm.slane %v6786_v5, 0  ;;  %v6839_v35 = vsub.f32 %v2911_v9, %v6807_v58  ;;  %v8044_v28 = vand.u32 4294901760, %v6825_v23  ;;  %v3033_v7 = vand.u32 4294901760, %v3032_v33 }
 0x19d   :  { %2973 = vmatpush.msra.mxu0 %v6731_v11  ;;  %2766 = vmatpush.msrb.mxu1 %v6548_v13  ;;  %v3020_v13 = vsub.f32 %v6757_v60, %v8052_v34  ;;  %v3015_v45 = vand.u32 4294901760, %v3014_v61  ;;  %v6899_v9 = vand.u32 4294901760, %v2933_v42  ;;  %v8329_v61 = vld [vmem:[#allocation14_spill] sm:$0xff]  ;;  %v3056_v3 = vsub.f32 %v6855_v24, %v8041_v0 }
 0x19e   :  { %3169 = vmatpush.msra.mxu3 %v6731_v11  ;;  %3114 = vmatpush.msra.mxu2 %v6740_v8  ;;  %v8043_v53 = vand.u32 4294901760, %v6839_v35  ;;  %v3044_v57 = vsub.f32 %v6825_v23, %v8044_v28  ;;  %v6941_v36 = vand.u32 4294901760, %v2904_v31  ;;  %v8047_v33 = vand.u32 4294901760, %v6904_v22 }
 0x19f   :  { %2843 = vmatmul.f32.vlgmr.msrb.gmra.mxu2 %v5663_v46  ;;  %2975 = vmatpush.msra.mxu0 %v6744_v29  ;;  %v3021_v62 = vand.u32 4294901760, %v3020_v13  ;;  %v6926_v13 = vsub.f32 %v2906_v51, %v6887_v10  ;;  %v6937_v39 = vsub.f32 %v2933_v42, %v6899_v9  ;;  %v8332_v42 = vld [vmem:[#allocation15_spill] sm:$0xff] }
 0x1a0   :  { %3117 = vmatpush.msra.mxu2 %v6757_v60  ;;  %3171 = vmatpush.msra.mxu3 %v6744_v29  ;;  %v3050_v30 = vsub.f32 %v6839_v35, %v8043_v53  ;;  %v3045_v56 = vand.u32 4294901760, %v3044_v57  ;;  %8331 = vst [vmem:[#allocation18_spill] sm:$0xff] %v6941_v36  ;;  %v2902_v57 = vld [vmem:[%s7921_s5] sm:$0xff]  ;;  %v6985_v44 = vsub.f32 %v2904_v31, %v6941_v36  ;;  %v3063_v53 = vand.u32 4294901760, %v3062_v37 }
 0x1a1   :  { %2768 = vmatpush.msrb.mxu1 %v6563_v43  ;;  %2880 = vmatmul.f32.vlgmr.msrb.gmra.mxu3 %v5663_v46  ;;  %v8045_v43 = vand.u32 4294901760, %v6805_v17  ;;  %v6849_v46 = vadd.f32 %v2886_v2, %v1859_v32  ;;  %v799_v32 = vadd.f32 %v8329_v61, %v730_v16  ;;  %8330 = vst [vmem:[#allocation19_spill] sm:$0xff] %v6937_v39  ;;  %v6953_v16 = vand.u32 4294901760, %v2931_v21  ;;  %v1899_v61 = vpop.f32.mrf.mxu2 }
 0x1a2   :  { %2977 = vmatpush.msra.mxu0 %v6749_v1  ;;  %3120 = vmatpush.msra.mxu2 %v6769_v38  ;;  %v3051_v51 = vand.u32 4294901760, %v3050_v30  ;;  %v2929_v30 = vld [vmem:[%s7921_s5 + $0xd8] sm:$0xff]  ;;  %v6993_v28 = vand.u32 4294901760, %v2902_v57 }
 0x1a3   :  { %3173 = vmatpush.msra.mxu3 %v6749_v1  ;;  %2770 = vmatpush.msrb.mxu1 %v6576_v55  ;;  %v2905_v55 = vld [vmem:[%s7921_s5 + $0x18] sm:$0xff]  ;;  %v2898_v47 = vmax.f32 %v6849_v46, 0.0  ;;  %v2903_v46 = vld [vmem:[%s7921_s5 + $0x8] sm:$0xff]  ;;  %v6998_v12 = vand.u32 4294901760, %v2929_v30 }
 0x1a4   :  { %2979 = vmatpush.msra.mxu0 %v6771_v40  ;;  %2774 = vmatmul.f32.vlgmr.msrb.gmra.mxu1 %v8256_v6  ;;  %v3038_v6 = vsub.f32 %v6805_v17, %v8045_v43  ;;  %v6897_v49 = vand.u32 4294901760, %v2905_v55  ;;  %8335 = vst [vmem:[#allocation11_spill] sm:$0xff] %v6993_v28  ;;  %v6996_v43 = vsub.f32 %v2931_v21, %v6953_v16 }
 0x1a5   :  { %3123 = vmatpush.msra.mxu2 %v6776_v18  ;;  %3016 = vmatpush.msra.mxu1 %v3015_v45  ;;  %v6918_v2 = vand.u32 4294901760, %v2898_v47  ;;  %v8042_v45 = vand.u32 4294901760, %v6895_v26  ;;  %v7037_v59 = vsub.f32 %v2929_v30, %v6998_v12 }
 0x1a6   :  { %3175 = vmatpush.msra.mxu3 %v6771_v40  ;;  %2981 = vmatpush.msra.mxu0 %v6788_v20  ;;  %8328 = vst [vmem:[#allocation9_spill] sm:$0xff] %v6897_v49  ;;  %v3039_v52 = vand.u32 4294901760, %v3038_v6  ;;  %v6934_v41 = vsub.f32 %v2905_v55, %v6897_v49  ;;  %v2930_v55 = vld [vmem:[%s7921_s5 + $0xe0] sm:$0xff] }
 0x1a7   :  { %3126 = vmatpush.msra.mxu2 %v6805_v17  ;;  %3022 = vmatpush.msra.mxu1 %v3021_v62  ;;  %v6947_v62 = vand.u32 4294901760, %v2932_v14  ;;  %v6960_v6 = vsub.f32 %v2898_v47, %v6918_v2  ;;  %v3068_v47 = vsub.f32 %v6895_v26, %v8042_v45  ;;  %v6990_v45 = vand.u32 4294901760, %v2930_v55  ;;  %8336 = vst [vmem:[#allocation20_spill] sm:$0xff] %v6996_v43 }
 0x1a8   :  { %3177 = vmatpush.msra.mxu3 %v6788_v20  ;;  %2983 = vmatpush.msra.mxu0 %v6807_v58 }
 0x1a9   :  { %3129 = vmatpush.msra.mxu2 %v6825_v23  ;;  %3028 = vmatpush.msra.mxu1 %v3027_v48  ;;  %v836_v48 = vadd.f32 %v8332_v42, %v799_v32  ;;  %v6975_v32 = vand.u32 4294901760, %v2903_v46  ;;  %v8051_v42 = vand.u32 4294901760, %v6934_v41  ;;  %v6988_v0 = vsub.f32 %v2932_v14, %v6947_v62 }
 0x1aa   :  { %3179 = vmatpush.msra.mxu3 %v6807_v58  ;;  %2985 = vmatpush.msra.mxu0 %v6813_v15  ;;  %v3069_v21 = vand.u32 4294901760, %v3068_v47 }
 0x1ab   :  { %3132 = vmatpush.msra.mxu2 %v6839_v35  ;;  %3034 = vmatpush.msra.mxu1 %v3033_v7  ;;  %v3057_v7 = vand.u32 4294901760, %v3056_v3  ;;  %8333 = vst [vmem:[#allocation22_spill] sm:$0xff] %v6975_v32  ;;  %v8050_v3 = vand.u32 4294901760, %v6937_v39  ;;  %v1900_v31 = vadd.f32 %v1899_v61, %v836_v48  ;;  %v7011_v37 = vsub.f32 %v2903_v46, %v6975_v32 }
 0x1ac   :  { %3181 = vmatpush.msra.mxu3 %v6813_v15  ;;  %2987 = vmatpush.msra.mxu0 %v6841_v63  ;;  %8334 = vst [vmem:[#allocation4_spill] sm:$0xff] %v6988_v0  ;;  %v7019_v61 = vsub.f32 %v6934_v41, %v8051_v42  ;;  %v7033_v42 = vsub.f32 %v2902_v57, %v6993_v28 }
 0x1ad   :  { %3135 = vmatpush.msra.mxu2 %v6855_v24  ;;  %3040 = vmatpush.msra.mxu1 %v3039_v52  ;;  %v8048_v52 = vand.u32 4294901760, %v6926_v13  ;;  %v3355_v48 = vsub.f32 %v6937_v39, %v8050_v3  ;;  %v7029_v3 = vsub.f32 %v2930_v55, %v6990_v45  ;;  %v8338_v55 = vand.u32 4294901760, %v6960_v6 }
 0x1ae   :  { %3183 = vmatpush.msra.mxu3 %v6841_v63  ;;  %2989 = vmatpush.msra.mxu0 %v6859_v27  ;;  %v3087_v50 = vand.u32 4294901760, %v7019_v61 }
 0x1af   :  { %3138 = vmatpush.msra.mxu2 %v6881_v19  ;;  %3046 = vmatpush.msra.mxu1 %v3045_v56  ;;  %v3074_v56 = vsub.f32 %v6904_v22, %v8047_v33  ;;  %v3080_v14 = vsub.f32 %v6926_v13, %v8048_v52  ;;  %v2927_v52 = vld [vmem:[%s7921_s5 + $0xc8] sm:$0xff]  ;;  %8337 = vst [vmem:[#allocation23_spill] sm:$0xff] %v7029_v3  ;;  %v3356_v30 = vand.u32 4294901760, %v3355_v48 }
 0x1b0   :  { %3185 = vmatpush.msra.mxu3 %v6859_v27  ;;  %2991 = vmatpush.msra.mxu0 %v6868_v54  ;;  %v3005_v57 = vsub.f32 %v6960_v6, %v8338_v55  ;;  %v7049_v4 = vand.u32 4294901760, %v2927_v52  ;;  %v8339_v55 = vand.u32 4294901760, %v6988_v0 }
 0x1b1   :  { %3141 = vmatpush.msra.mxu2 %v6895_v26  ;;  %3052 = vmatpush.msra.mxu1 %v3051_v51  ;;  %v2928_v51 = vld [vmem:[%s7921_s5 + $0xd0] sm:$0xff]  ;;  %v3075_v46 = vand.u32 4294901760, %v3074_v56  ;;  %v2926_v56 = vld [vmem:[%s7921_s5 + $0xc0] sm:$0xff]  ;;  %v2054_v47 = vpop.f32.mrf.mxu0 }
 0x1b2   :  { %3187 = vmatpush.msra.mxu3 %v6868_v54  ;;  %2993 = vmatpush.msra.mxu0 %v6887_v10  ;;  %v7039_v33 = vand.u32 4294901760, %v2928_v51 }
 0x1b3   :  { %3144 = vmatpush.msra.mxu2 %v6904_v22  ;;  %3058 = vmatpush.msra.mxu1 %v3057_v7  ;;  %v2000_v7 = vpop.f32.mrf.mxu3 }
 0x1b4   :  { %3189 = vmatpush.msra.mxu3 %v6887_v10  ;;  %2995 = vmatpush.msra.mxu0 %v6897_v49  ;;  %v2001_v34 = vadd.f32 %v2000_v7, %v1900_v31  ;;  %v3361_v31 = vsub.f32 %v6988_v0, %v8339_v55  ;;  %v7066_v7 = vand.u32 4294901760, %v2926_v56  ;;  %v7075_v55 = vsub.f32 %v2928_v51, %v7039_v33 }
 0x1b5   :  { %3147 = vmatpush.msra.mxu2 %v6926_v13  ;;  %3064 = vmatpush.msra.mxu1 %v3063_v53  ;;  %v3081_v53 = vand.u32 4294901760, %v3080_v14  ;;  %v2925_v14 = vld [vmem:[%s7921_s5 + $0xb8] sm:$0xff]  ;;  %v8342_v51 = vand.u32 4294901760, %v7011_v37 }
 0x1b6   :  { %3191 = vmatpush.msra.mxu3 %v6897_v49  ;;  %2997 = vmatpush.msra.mxu0 %v6941_v36  ;;  %v8341_v49 = vand.u32 4294901760, %v6996_v43  ;;  %v2055_v61 = vadd.f32 %v2054_v47, %v2001_v34  ;;  %v8343_v34 = vand.u32 4294901760, %v6960_v6  ;;  %v8344_v47 = vand.u32 4294901760, %v7029_v3 }
 0x1b7   :  { %3150 = vmatpush.msra.mxu2 %v6934_v41  ;;  %3070 = vmatpush.msra.mxu1 %v3069_v21  ;;  %v8340_v21 = vand.u32 4294901760, %v6985_v44  ;;  %v3098_v10 = vsub.f32 %v7011_v37, %v8342_v51  ;;  %v8345_v51 = vand.u32 4294901760, %v6740_v8 }
 0x1b8   :  { %3193 = vmatpush.msra.mxu3 %v6941_v36  ;;  %2999 = vmatpush.msra.mxu0 %v6975_v32  ;;  %v3367_v36 = vsub.f32 %v6996_v43, %v8341_v49  ;;  %v2924_v49 = vld [vmem:[%s7921_s5 + $0xb0] sm:$0xff] }
 0x1b9   :  { %3153 = vmatpush.msra.mxu2 %v6985_v44  ;;  %v3092_v48 = vsub.f32 %v6985_v44, %v8340_v21  ;;  %3076 = vmatpush.msra.mxu1 %v3075_v46  ;;  %v3006_v21 = vand.u32 4294901760, %v3005_v57  ;;  %v7080_v46 = vsub.f32 %v2927_v52, %v7049_v4  ;;  %v3362_v52 = vand.u32 4294901760, %v3361_v31 }
 0x1ba   :  { %3195 = vmatpush.msra.mxu3 %v6975_v32  ;;  %3001 = vmatpush.msra.mxu0 %v6993_v28  ;;  %v7082_v32 = vand.u32 4294901760, %v2925_v14  ;;  %v3373_v57 = vsub.f32 %v7029_v3, %v8344_v47  ;;  %v8346_v31 = vand.u32 4294901760, %v7033_v42  ;;  %v2921_v47 = vld [vmem:[%s7921_s5 + $0x98] sm:$0xff] }
 0x1bb   :  { %3156 = vmatpush.msra.mxu2 %v7011_v37  ;;  %3082 = vmatpush.msra.mxu1 %v3081_v53  ;;  %v2093_v39 = vpop.f32.mrf.mxu1  ;;  %v7097_v53 = vsub.f32 %v2926_v56, %v7066_v7  ;;  %v3368_v56 = vand.u32 4294901760, %v3367_v36 }
 0x1bc   :  { %3197 = vmatpush.msra.mxu3 %v6993_v28  ;;  %3007 = vmatmul.f32.vlgmr.msra.gmra.mxu0 %v3006_v21  ;;  %v2094_v43 = vadd.f32 %v2093_v39, %v2055_v61  ;;  %v2162_v0 = vpop.f32.mrf.mxu2  ;;  %v2923_v28 = vld [vmem:[%s7921_s5 + $0xa8] sm:$0xff]  ;;  %v3093_v21 = vand.u32 4294901760, %v3092_v48  ;;  %v7108_v39 = vand.u32 4294901760, %v2924_v49  ;;  %v8347_v61 = vand.u32 4294901760, %v7037_v59  ;;  %v2922_v48 = vld [vmem:[%s7921_s5 + $0xa0] sm:$0xff] }
 0x1bd   :  { %3201 = vmatmul.f32.vlgmr.msra.gmra.mxu3 %v8343_v34  ;;  %3208 = vmatpush.msrb.mxu0 %v8345_v51  ;;  %v3104_v34 = vsub.f32 %v7033_v42, %v8346_v31  ;;  %v3099_v51 = vand.u32 4294901760, %v3098_v10  ;;  %v7124_v31 = vand.u32 4294901760, %v2923_v28 }
 0x1be   :  { %3357 = vmatpush.msrb.mxu3 %v3356_v30  ;;  %3088 = vmatpush.msra.mxu1 %v3087_v50  ;;  %v3379_v3 = vsub.f32 %v7037_v59, %v8347_v61  ;;  %v7116_v30 = vsub.f32 %v2925_v14, %v7082_v32  ;;  %v8348_v50 = vand.u32 4294901760, %v6757_v60  ;;  %v2163_v36 = vadd.f32 %v2162_v0, %v2094_v43  ;;  %v2199_v8 = vpop.f32.mrf.mxu3 }
 0x1bf   :  { %3159 = vmatpush.msra.mxu2 %v7033_v42  ;;  %v3374_v61 = vand.u32 4294901760, %v3373_v57  ;;  %v8067_v14 = vand.u32 4294901760, %v7097_v53  ;;  %v3105_v60 = vand.u32 4294901760, %v3104_v34  ;;  %v8350_v43 = vand.u32 4294901760, %v7075_v55  ;;  %v2920_v34 = vld [vmem:[%s7921_s5 + $0x90] sm:$0xff] }
 0x1c0   :  { %3162 = vmatmul.f32.vlgmr.msra.gmra.mxu2 %v6960_v6  ;;  %3212 = vmatpush.msrb.mxu0 %v8348_v50  ;;  %v8349_v6 = vand.u32 4294901760, %v6769_v38  ;;  %v7137_v0 = vsub.f32 %v2924_v49, %v7108_v39  ;;  %v3380_v57 = vand.u32 4294901760, %v3379_v3  ;;  %v8351_v50 = vand.u32 4294901760, %v7080_v46 }
 0x1c1   :  { %3312 = vmatpush.msrb.mxu2 %v6899_v9  ;;  %3363 = vmatpush.msrb.mxu3 %v3362_v52  ;;  %v3385_v10 = vsub.f32 %v7075_v55, %v8350_v43  ;;  %v7139_v52 = vand.u32 4294901760, %v2922_v48  ;;  %v8068_v38 = vand.u32 4294901760, %v7116_v30  ;;  %v8352_v49 = vand.u32 4294901760, %v6776_v18  ;;  %v2919_v18 = vld [vmem:[%s7921_s5 + $0x88] sm:$0xff] }
 0x1c2   :  { %3094 = vmatpush.msra.mxu1 %v3093_v21  ;;  %3216 = vmatpush.msrb.mxu0 %v8349_v6  ;;  %v3391_v21 = vsub.f32 %v7080_v46, %v8351_v50  ;;  %v2200_v6 = vadd.f32 %v2199_v8, %v2163_v36  ;;  %v2887_v43 = vperm.slane %v6786_v5, 1  ;;  %v7155_v3 = vand.u32 4294901760, %v2921_v47 }
 0x1c3   :  { %3314 = vmatpush.msrb.mxu2 %v6947_v62  ;;  %3369 = vmatpush.msrb.mxu3 %v3368_v56  ;;  %v7153_v56 = vsub.f32 %v2923_v28, %v7124_v31  ;;  %v3397_v50 = vsub.f32 %v7097_v53, %v8067_v14  ;;  %v8353_v8 = vand.u32 4294901760, %v6805_v17  ;;  %v3408_v28 = vand.u32 4294901760, %v7137_v0  ;;  %v2918_v17 = vld [vmem:[%s7921_s5 + $0x80] sm:$0xff] }
 0x1c4   :  { %3100 = vmatpush.msra.mxu1 %v3099_v51  ;;  %3220 = vmatpush.msrb.mxu0 %v8352_v49  ;;  %v3386_v51 = vand.u32 4294901760, %v3385_v10  ;;  %v7168_v36 = vsub.f32 %v2922_v48, %v7139_v52  ;;  %v7170_v49 = vand.u32 4294901760, %v2920_v34  ;;  %v2895_v48 = vadd.f32 %v2887_v43, %v2200_v6 }
 0x1c5   :  { %3316 = vmatpush.msrb.mxu2 %v6953_v16  ;;  %3375 = vmatpush.msrb.mxu3 %v3374_v61  ;;  %v3392_v61 = vand.u32 4294901760, %v3391_v21  ;;  %v3414_v10 = vand.u32 4294901760, %v7153_v56  ;;  %v7185_v14 = vand.u32 4294901760, %v2919_v18  ;;  %v8354_v21 = vand.u32 4294901760, %v6825_v23 }
 0x1c6   :  { %3106 = vmatpush.msra.mxu1 %v3105_v60  ;;  %3224 = vmatpush.msrb.mxu0 %v8353_v8  ;;  %v3403_v60 = vsub.f32 %v7116_v30, %v8068_v38  ;;  %v7183_v8 = vsub.f32 %v2921_v47, %v7155_v3  ;;  %v3398_v38 = vand.u32 4294901760, %v3397_v50  ;;  %v7196_v47 = vsub.f32 %v2920_v34, %v7170_v49 }
 0x1c7   :  { %3108 = vmatmul.f32.vlgmr.msra.gmra.mxu1 %v6918_v2  ;;  %3318 = vmatpush.msrb.mxu2 %v6990_v45  ;;  %v7198_v6 = vand.u32 4294901760, %v2918_v17  ;;  %v8355_v23 = vand.u32 4294901760, %v6839_v35  ;;  %v3415_v50 = vsub.f32 %v7153_v56, %v3414_v10  ;;  %v7209_v34 = vsub.f32 %v2919_v18, %v7185_v14 }
 0x1c8   :  { %3275 = vmatpush.msrb.mxu1 %v6716_v25  ;;  %3381 = vmatpush.msrb.mxu3 %v3380_v57  ;;  %v3409_v25 = vsub.f32 %v7137_v0, %v3408_v28  ;;  %v3420_v57 = vand.u32 4294901760, %v7168_v36  ;;  %v3404_v43 = vand.u32 4294901760, %v3403_v60  ;;  %v8357_v18 = vand.u32 4294901760, %v6881_v19 }
 0x1c9   :  { %3228 = vmatpush.msrb.mxu0 %v8354_v21  ;;  %3320 = vmatpush.msrb.mxu2 %v6998_v12  ;;  %v8356_v21 = vand.u32 4294901760, %v6855_v24  ;;  %v7220_v60 = vsub.f32 %v2918_v17, %v7198_v6  ;;  %v8358_v17 = vand.u32 4294901760, %v6895_v26 }
 0x1ca   :  { %3277 = vmatpush.msrb.mxu1 %v6731_v11  ;;  %3387 = vmatpush.msrb.mxu3 %v3386_v51  ;;  %v2899_v11 = vmax.f32 %v2895_v48, 0.0  ;;  %v3426_v51 = vand.u32 4294901760, %v7183_v8  ;;  %v3421_v35 = vsub.f32 %v7168_v36, %v3420_v57  ;;  %v3438_v48 = vand.u32 4294901760, %v7209_v34 }
 0x1cb   :  { %3232 = vmatpush.msrb.mxu0 %v8355_v23  ;;  %3322 = vmatpush.msrb.mxu2 %v7039_v33  ;;  %v8359_v23 = vand.u32 4294901760, %v6904_v22 }
 0x1cc   :  { %3279 = vmatpush.msrb.mxu1 %v6744_v29  ;;  %3393 = vmatpush.msrb.mxu3 %v3392_v61  ;;  %v3410_v29 = vand.u32 4294901760, %v3409_v25  ;;  %v3432_v61 = vand.u32 4294901760, %v7196_v47  ;;  %v7225_v24 = vand.u32 4294901760, %v2899_v11  ;;  %v3422_v19 = vand.u32 4294901760, %v3421_v35  ;;  %v8367_v35 = vld [vmem:[#allocation9_spill] sm:$0xff] }
 0x1cd   :  { %3236 = vmatpush.msrb.mxu0 %v8356_v21  ;;  %3324 = vmatpush.msrb.mxu2 %v7049_v4  ;;  %v3444_v25 = vand.u32 4294901760, %v7220_v60 }
 0x1ce   :  { %3281 = vmatpush.msrb.mxu1 %v6749_v1  ;;  %3399 = vmatpush.msrb.mxu3 %v3398_v38  ;;  %v3416_v1 = vand.u32 4294901760, %v3415_v50  ;;  %v3427_v38 = vsub.f32 %v7183_v8, %v3426_v51  ;;  %v7244_v26 = vsub.f32 %v2899_v11, %v7225_v24  ;;  %v8360_v50 = vand.u32 4294901760, %v6926_v13 }
 0x1cf   :  { %3240 = vmatpush.msrb.mxu0 %v8357_v18  ;;  %3326 = vmatpush.msrb.mxu2 %v7066_v7  ;;  %v3445_v11 = vsub.f32 %v7220_v60, %v3444_v25 }
 0x1d0   :  { %3283 = vmatpush.msrb.mxu1 %v6771_v40  ;;  %3405 = vmatpush.msrb.mxu3 %v3404_v43  ;;  %v3433_v40 = vsub.f32 %v7196_v47, %v3432_v61  ;;  %v3439_v43 = vsub.f32 %v7209_v34, %v3438_v48  ;;  %v3345_v21 = vand.u32 4294901760, %v7244_v26 }
 0x1d1   :  { %3244 = vmatpush.msrb.mxu0 %v8358_v17  ;;  %3328 = vmatpush.msrb.mxu2 %v7082_v32 }
 0x1d2   :  { %3285 = vmatpush.msrb.mxu1 %v6788_v20  ;;  %3411 = vmatpush.msrb.mxu3 %v3410_v29  ;;  %v3428_v20 = vand.u32 4294901760, %v3427_v38  ;;  %v3434_v22 = vand.u32 4294901760, %v3433_v40  ;;  %v3440_v13 = vand.u32 4294901760, %v3439_v43  ;;  %v8362_v29 = vand.u32 4294901760, %v6985_v44  ;;  %v8371_v38 = vld [vmem:[#allocation20_spill] sm:$0xff]  ;;  %v8374_v40 = vld [vmem:[#allocation23_spill] sm:$0xff] }
 0x1d3   :  { %3248 = vmatpush.msrb.mxu0 %v8359_v23  ;;  %3330 = vmatpush.msrb.mxu2 %v7108_v39  ;;  %v8364_v44 = vand.u32 4294901760, %v7033_v42  ;;  %v8368_v42 = vld [vmem:[#allocation4_spill] sm:$0xff]  ;;  %v8375_v23 = vand.u32 4294901760, %v8371_v38  ;;  %v8377_v43 = vand.u32 4294901760, %v8374_v40 }
 0x1d4   :  { %3287 = vmatpush.msrb.mxu1 %v6807_v58  ;;  %3417 = vmatpush.msrb.mxu3 %v3416_v1  ;;  %v8361_v58 = vand.u32 4294901760, %v6934_v41  ;;  %v8363_v41 = vand.u32 4294901760, %v7011_v37  ;;  %v8366_v37 = vld [vmem:[#allocation19_spill] sm:$0xff]  ;;  %v8370_v1 = vld [vmem:[#allocation18_spill] sm:$0xff]  ;;  %v8372_v17 = vand.u32 4294901760, %v8368_v42 }
 0x1d5   :  { %3252 = vmatpush.msrb.mxu0 %v8360_v50  ;;  %3332 = vmatpush.msrb.mxu2 %v7124_v31  ;;  %v8369_v18 = vand.u32 4294901760, %v8366_v37  ;;  %v8378_v50 = vand.u32 4294901760, %v7037_v59 }
 0x1d6   :  { %3289 = vmatpush.msrb.mxu1 %v6813_v15  ;;  %3423 = vmatpush.msrb.mxu3 %v3422_v19  ;;  %v3446_v15 = vand.u32 4294901760, %v3445_v11  ;;  %v8373_v19 = vld [vmem:[#allocation22_spill] sm:$0xff] }
 0x1d7   :  { %3256 = vmatpush.msrb.mxu0 %v8361_v58  ;;  %3334 = vmatpush.msrb.mxu2 %v7139_v52 }
 0x1d8   :  { %3291 = vmatpush.msrb.mxu1 %v6841_v63  ;;  %3429 = vmatpush.msrb.mxu3 %v3428_v20  ;;  %v3346_v63 = vsub.f32 %v7244_v26, %v3345_v21  ;;  %v8376_v20 = vld [vmem:[#allocation11_spill] sm:$0xff] }
 0x1d9   :  { %3260 = vmatpush.msrb.mxu0 %v8362_v29  ;;  %3336 = vmatpush.msrb.mxu2 %v7155_v3 }
 0x1da   :  { %3293 = vmatpush.msrb.mxu1 %v6859_v27  ;;  %3435 = vmatpush.msrb.mxu3 %v3434_v22  ;;  %v8365_v27 = vld [vmem:[#allocation17_spill] sm:$0xff] }
 0x1db   :  { %3264 = vmatpush.msrb.mxu0 %v8363_v41  ;;  %3338 = vmatpush.msrb.mxu2 %v7170_v49 }
 0x1dc   :  { %3295 = vmatpush.msrb.mxu1 %v6868_v54  ;;  %3441 = vmatpush.msrb.mxu3 %v3440_v13  ;;  %v3347_v54 = vand.u32 4294901760, %v3346_v63 }
 0x1dd   :  { %3268 = vmatpush.msrb.mxu0 %v8364_v44  ;;  %3340 = vmatpush.msrb.mxu2 %v7185_v14 }
 0x1de   :  { %3297 = vmatpush.msrb.mxu1 %v8365_v27  ;;  %3447 = vmatpush.msrb.mxu3 %v3446_v15  ;;  %v2942_v15 = vld [vmem:[%s7921_s5 + $0x140] sm:$0xff] }
 0x1df   :  { %3270 = vmatmul.f32.vlgmr.msrb.gmra.mxu0 %v6918_v2  ;;  %3449 = vmatmul.f32.vlgmr.msrb.gmra.mxu3 %v7225_v24 }
 0x1e0   :  { %3455 = vmatpush.msra.mxu0 %v8366_v37  ;;  %3616 = vmatpush.msra.mxu3 %v6899_v9 }
 0x1e1   :  { %3299 = vmatpush.msrb.mxu1 %v8367_v35  ;;  %3342 = vmatpush.msrb.mxu2 %v7198_v6  ;;  %v7443_v35 = vand.u32 4294901760, %v2942_v15 }
 0x1e2   :  { %3348 = vmatmul.f32.vlgmr.msrb.gmra.mxu2 %v3347_v54  ;;  %3458 = vmatpush.msra.mxu0 %v8368_v42 }
 0x1e3   :  { %3549 = vmatpush.msra.mxu2 %v8369_v18  ;;  %3618 = vmatpush.msra.mxu3 %v6947_v62 }
 0x1e4   :  { %3301 = vmatpush.msrb.mxu1 %v8370_v1  ;;  %3461 = vmatpush.msra.mxu0 %v8371_v38 }
 0x1e5   :  { %3553 = vmatpush.msra.mxu2 %v8372_v17  ;;  %3620 = vmatpush.msra.mxu3 %v6953_v16 }
 0x1e6   :  { %3303 = vmatpush.msrb.mxu1 %v8373_v19  ;;  %3464 = vmatpush.msra.mxu0 %v8374_v40  ;;  %v2939_v19 = vld [vmem:[%s7921_s5 + $0x128] sm:$0xff] }
 0x1e7   :  { %3557 = vmatpush.msra.mxu2 %v8375_v23  ;;  %3622 = vmatpush.msra.mxu3 %v6990_v45  ;;  %v7474_v23 = vsub.f32 %v2942_v15, %v7443_v35  ;;  %v2935_v15 = vld [vmem:[%s7921_s5 + $0x108] sm:$0xff] }
 0x1e8   :  { %3305 = vmatpush.msrb.mxu1 %v8376_v20  ;;  %3467 = vmatpush.msra.mxu0 %v7037_v59  ;;  %v8381_v59 = vand.u32 4294901760, %v7097_v53 }
 0x1e9   :  { %3307 = vmatmul.f32.vlgmr.msrb.gmra.mxu1 %v6918_v2  ;;  %3561 = vmatpush.msra.mxu2 %v8377_v43  ;;  %v8379_v2 = vand.u32 4294901760, %v7075_v55 }
 0x1ea   :  { %3508 = vmatpush.msra.mxu1 %v6899_v9  ;;  %3624 = vmatpush.msra.mxu3 %v6998_v12  ;;  %v8380_v9 = vand.u32 4294901760, %v7080_v46 }
 0x1eb   :  { %3470 = vmatpush.msra.mxu0 %v7075_v55  ;;  %3565 = vmatpush.msra.mxu2 %v8378_v50  ;;  %v8383_v55 = vld [vmem:[#allocation16_spill] sm:$0xff] }
 0x1ec   :  { %3510 = vmatpush.msra.mxu1 %v6947_v62  ;;  %3626 = vmatpush.msra.mxu3 %v7039_v33  ;;  %v8382_v62 = vand.u32 4294901760, %v7116_v30 }
 0x1ed   :  { %3473 = vmatpush.msra.mxu0 %v7080_v46  ;;  %3569 = vmatpush.msra.mxu2 %v8379_v2 }
 0x1ee   :  { %3512 = vmatpush.msra.mxu1 %v6953_v16  ;;  %3628 = vmatpush.msra.mxu3 %v7049_v4  ;;  %v2240_v16 = vpop.f32.mrf.mxu0 }
 0x1ef   :  { %3476 = vmatpush.msra.mxu0 %v7097_v53  ;;  %3573 = vmatpush.msra.mxu2 %v8380_v9  ;;  %v2241_v46 = vadd.f32 %v2240_v16, %v8383_v55 }
 0x1f0   :  { %3514 = vmatpush.msra.mxu1 %v6990_v45  ;;  %3630 = vmatpush.msra.mxu3 %v7066_v7  ;;  %v2341_v45 = vpop.f32.mrf.mxu1 }
 0x1f1   :  { %3479 = vmatpush.msra.mxu0 %v7116_v30  ;;  %3577 = vmatpush.msra.mxu2 %v8381_v59  ;;  %v2947_v30 = vld [vmem:[%s7921_s5 + $0x168] sm:$0xff]  ;;  %v7492_v59 = vand.u32 4294901760, %v2939_v19 }
 0x1f2   :  { %3516 = vmatpush.msra.mxu1 %v6998_v12  ;;  %3632 = vmatpush.msra.mxu3 %v7082_v32  ;;  %v2949_v12 = vld [vmem:[%s7921_s5 + $0x178] sm:$0xff] }
 0x1f3   :  { %3482 = vmatpush.msra.mxu0 %v7137_v0  ;;  %3581 = vmatpush.msra.mxu2 %v8382_v62  ;;  %v7346_v53 = vand.u32 4294901760, %v2949_v12  ;;  %v2395_v0 = vpop.f32.mrf.mxu2  ;;  %8384 = vst [vmem:[#allocation21_spill] sm:$0xff] %v7492_v59 }
 0x1f4   :  { %3518 = vmatpush.msra.mxu1 %v7039_v33  ;;  %3634 = vmatpush.msra.mxu3 %v7108_v39  ;;  %v2948_v33 = vld [vmem:[%s7921_s5 + $0x170] sm:$0xff] }
 0x1f5   :  { %3485 = vmatpush.msra.mxu0 %v7153_v56  ;;  %3585 = vmatpush.msra.mxu2 %v3408_v28  ;;  %v2946_v56 = vld [vmem:[%s7921_s5 + $0x160] sm:$0xff]  ;;  %v7367_v28 = vsub.f32 %v2949_v12, %v7346_v53  ;;  %v2937_v12 = vld [vmem:[%s7921_s5 + $0x118] sm:$0xff] }
 0x1f6   :  { %3520 = vmatpush.msra.mxu1 %v7049_v4  ;;  %3636 = vmatpush.msra.mxu3 %v7124_v31  ;;  %v2342_v4 = vadd.f32 %v2341_v45, %v2241_v46 }
 0x1f7   :  { %3488 = vmatpush.msra.mxu0 %v7168_v36  ;;  %3589 = vmatpush.msra.mxu2 %v3414_v10  ;;  %v7374_v10 = vand.u32 4294901760, %v2946_v56  ;;  %v8082_v22 = vand.u32 4294901760, %v7367_v28 }
 0x1f8   :  { %3522 = vmatpush.msra.mxu1 %v7066_v7  ;;  %3638 = vmatpush.msra.mxu3 %v7139_v52  ;;  %v7356_v7 = vand.u32 4294901760, %v2948_v33  ;;  %v2396_v36 = vadd.f32 %v2395_v0, %v2342_v4 }
 0x1f9   :  { %3491 = vmatpush.msra.mxu0 %v7183_v8  ;;  %3593 = vmatpush.msra.mxu2 %v3420_v57  ;;  %v2945_v8 = vld [vmem:[%s7921_s5 + $0x158] sm:$0xff]  ;;  %v3696_v41 = vsub.f32 %v7367_v28, %v8082_v22 }
 0x1fa   :  { %3524 = vmatpush.msra.mxu1 %v7082_v32  ;;  %3640 = vmatpush.msra.mxu3 %v7155_v3  ;;  %v7369_v32 = vand.u32 4294901760, %v2947_v30  ;;  %v7382_v57 = vsub.f32 %v2948_v33, %v7356_v7  ;;  %v8072_v33 = vand.u32 4294901760, %v7474_v23 }
 0x1fb   :  { %3494 = vmatpush.msra.mxu0 %v7196_v47  ;;  %3597 = vmatpush.msra.mxu2 %v3426_v51  ;;  %v2944_v47 = vld [vmem:[%s7921_s5 + $0x150] sm:$0xff]  ;;  %v2503_v51 = vpop.f32.mrf.mxu0  ;;  %v3697_v42 = vand.u32 4294901760, %v3696_v41  ;;  %v2959_v41 = vld [vmem:[%s7921_s5 + $0x1c8] sm:$0xff] }
 0x1fc   :  { %3526 = vmatpush.msra.mxu1 %v7108_v39  ;;  %3642 = vmatpush.msra.mxu3 %v7170_v49  ;;  %v2434_v39 = vpop.f32.mrf.mxu3  ;;  %v7408_v58 = vand.u32 4294901760, %v2944_v47  ;;  %v8081_v13 = vand.u32 4294901760, %v7382_v57 }
 0x1fd   :  { %3497 = vmatpush.msra.mxu0 %v7209_v34  ;;  %3601 = vmatpush.msra.mxu2 %v3432_v61  ;;  %v7395_v61 = vand.u32 4294901760, %v2945_v8  ;;  %v2435_v11 = vadd.f32 %v2434_v39, %v2396_v36  ;;  %v7401_v34 = vsub.f32 %v2946_v56, %v7374_v10  ;;  %v7524_v36 = vsub.f32 %v2939_v19, %v7492_v59  ;;  %v2960_v39 = vld [vmem:[%s7921_s5 + $0x1d0] sm:$0xff] }
 0x1fe   :  { %3528 = vmatpush.msra.mxu1 %v7124_v31  ;;  %3644 = vmatpush.msra.mxu3 %v7185_v14  ;;  %v7393_v31 = vsub.f32 %v2947_v30, %v7369_v32  ;;  %v3702_v37 = vsub.f32 %v7382_v57, %v8081_v13  ;;  %v7441_v54 = vsub.f32 %v2944_v47, %v7408_v58  ;;  %v7577_v19 = vand.u32 4294901760, %v2935_v15 }
 0x1ff   :  { %3500 = vmatpush.msra.mxu0 %v7220_v60  ;;  %3605 = vmatpush.msra.mxu2 %v3438_v48  ;;  %v2540_v48 = vpop.f32.mrf.mxu1  ;;  %v2504_v29 = vadd.f32 %v2503_v51, %v2435_v11  ;;  %v7423_v63 = vsub.f32 %v2945_v8, %v7395_v61  ;;  %v2941_v60 = vld [vmem:[%s7921_s5 + $0x138] sm:$0xff]  ;;  %v8076_v27 = vand.u32 4294901760, %v7401_v34  ;;  %v7526_v8 = vand.u32 4294901760, %v2937_v12  ;;  %v2936_v51 = vld [vmem:[%s7921_s5 + $0x110] sm:$0xff] }
 0x200   :  { %3530 = vmatpush.msra.mxu1 %v7139_v52  ;;  %3646 = vmatpush.msra.mxu3 %v7198_v6  ;;  %v2943_v52 = vld [vmem:[%s7921_s5 + $0x148] sm:$0xff]  ;;  %v3703_v40 = vand.u32 4294901760, %v3702_v37  ;;  %v8074_v43 = vand.u32 4294901760, %v7441_v54  ;;  %8388 = vst [vmem:[#allocation8_spill] sm:$0xff] %v7577_v19 }
 0x201   :  { %3503 = vmatmul.f32.vlgmr.msra.gmra.mxu0 %v7244_v26  ;;  %3648 = vmatmul.f32.vlgmr.msra.gmra.mxu3 %v7225_v24  ;;  %v7425_v44 = vand.u32 4294901760, %v2943_v52  ;;  %v8075_v38 = vand.u32 4294901760, %v7423_v63  ;;  %8386 = vst [vmem:[#allocation2_spill] sm:$0xff] %v7526_v8 }
 0x202   :  { %3653 = vmatpush.msrb.mxu0 %v7346_v53  ;;  %3849 = vmatpush.msrb.mxu3 %v7346_v53  ;;  %v3726_v45 = vsub.f32 %v7441_v54, %v8074_v43 }
 0x203   :  { %3532 = vmatpush.msra.mxu1 %v7155_v3  ;;  %3609 = vmatpush.msra.mxu2 %v3444_v25  ;;  %v8079_v3 = vand.u32 4294901760, %v7393_v31  ;;  %v2888_v25 = vperm.slane %v6786_v5, 2  ;;  %v7447_v5 = vand.u32 4294901760, %v2941_v60  ;;  %v7458_v1 = vsub.f32 %v2943_v52, %v7425_v44 }
 0x204   :  { %3611 = vmatmul.f32.vlgmr.msra.gmra.mxu2 %v7225_v24  ;;  %3655 = vmatpush.msrb.mxu0 %v7356_v7  ;;  %v2541_v24 = vadd.f32 %v2540_v48, %v2504_v29  ;;  %v3720_v9 = vsub.f32 %v7423_v63, %v8075_v38  ;;  %v3727_v11 = vand.u32 4294901760, %v3726_v45  ;;  %v3738_v52 = vsub.f32 %v7474_v23, %v8072_v33 }
 0x205   :  { %3796 = vmatpush.msrb.mxu2 %v7367_v28  ;;  %3851 = vmatpush.msrb.mxu3 %v7356_v7  ;;  %v3708_v18 = vsub.f32 %v7393_v31, %v8079_v3  ;;  %v7483_v50 = vsub.f32 %v2941_v60, %v7447_v5  ;;  %v8073_v26 = vand.u32 4294901760, %v7458_v1 }
 0x206   :  { %3534 = vmatpush.msra.mxu1 %v7170_v49  ;;  %3657 = vmatpush.msrb.mxu0 %v7369_v32  ;;  %v2940_v49 = vld [vmem:[%s7921_s5 + $0x130] sm:$0xff]  ;;  %v7463_v17 = vadd.f32 %v2888_v25, %v2541_v24  ;;  %v3721_v0 = vand.u32 4294901760, %v3720_v9  ;;  %v7560_v25 = vand.u32 4294901760, %v2960_v39 }
 0x207   :  { %3799 = vmatpush.msrb.mxu2 %v7382_v57  ;;  %3853 = vmatpush.msrb.mxu3 %v7369_v32  ;;  %v7476_v20 = vand.u32 4294901760, %v2940_v49  ;;  %v3709_v2 = vand.u32 4294901760, %v3708_v18  ;;  %v8070_v4 = vand.u32 4294901760, %v7483_v50  ;;  %v3732_v56 = vsub.f32 %v7458_v1, %v8073_v26 }
 0x208   :  { %3536 = vmatpush.msra.mxu1 %v7185_v14  ;;  %3659 = vmatpush.msrb.mxu0 %v7374_v10  ;;  %v3714_v14 = vsub.f32 %v7401_v34, %v8076_v27  ;;  %v2900_v62 = vmax.f32 %v7463_v17, 0.0  ;;  %v8071_v18 = vand.u32 4294901760, %v7524_v36  ;;  %v2958_v17 = vld [vmem:[%s7921_s5 + $0x1c0] sm:$0xff]  ;;  %v7593_v45 = vsub.f32 %v2960_v39, %v7560_v25  ;;  %v2682_v27 = vpop.f32.mrf.mxu3 }
 0x209   :  { %3802 = vmatpush.msrb.mxu2 %v7393_v31  ;;  %3855 = vmatpush.msrb.mxu3 %v7374_v10  ;;  %v7509_v55 = vsub.f32 %v2940_v49, %v7476_v20  ;;  %v3744_v60 = vsub.f32 %v7483_v50, %v8070_v4  ;;  %v3733_v37 = vand.u32 4294901760, %v3732_v56  ;;  %v7563_v49 = vand.u32 4294901760, %v2936_v51  ;;  %v2957_v56 = vld [vmem:[%s7921_s5 + $0x1b8] sm:$0xff] }
 0x20a   :  { %3538 = vmatpush.msra.mxu1 %v7198_v6  ;;  %3661 = vmatpush.msrb.mxu0 %v7395_v61  ;;  %v2938_v6 = vld [vmem:[%s7921_s5 + $0x120] sm:$0xff]  ;;  %v3715_v16 = vand.u32 4294901760, %v3714_v14  ;;  %v7531_v47 = vand.u32 4294901760, %v2900_v62  ;;  %8389 = vst [vmem:[#allocation10_spill] sm:$0xff] %v7593_v45  ;;  %v7627_v38 = vand.u32 4294901760, %v2957_v56 }
 0x20b   :  { %3542 = vmatmul.f32.vlgmr.msra.gmra.mxu1 %v3345_v21  ;;  %3805 = vmatpush.msrb.mxu2 %v7401_v34  ;;  %v2961_v21 = vld [vmem:[%s7921_s5 + $0x1d8] sm:$0xff]  ;;  %v7511_v46 = vand.u32 4294901760, %v2938_v6  ;;  %v8069_v29 = vand.u32 4294901760, %v7509_v55  ;;  %8387 = vst [vmem:[#allocation25_spill] sm:$0xff] %v7563_v49 }
 0x20c   :  { %3698 = vmatpush.msrb.mxu1 %v3697_v42  ;;  %3857 = vmatpush.msrb.mxu3 %v7395_v61  ;;  %v7517_v30 = vand.u32 4294901760, %v2961_v21  ;;  %v7566_v42 = vsub.f32 %v2937_v12, %v7526_v8  ;;  %v7573_v14 = vsub.f32 %v2900_v62, %v7531_v47  ;;  %v2581_v62 = vpop.f32.mrf.mxu2 }
 0x20d   :  { %3663 = vmatpush.msrb.mxu0 %v7408_v58  ;;  %3808 = vmatpush.msrb.mxu2 %v7423_v63  ;;  %8385 = vst [vmem:[#allocation24_spill] sm:$0xff] %v7511_v46  ;;  %v7543_v48 = vsub.f32 %v2938_v6, %v7511_v46  ;;  %v7582_v6 = vand.u32 4294901760, %v2959_v41  ;;  %v3750_v9 = vsub.f32 %v7509_v55, %v8069_v29  ;;  %v2956_v29 = vld [vmem:[%s7921_s5 + $0x1b0] sm:$0xff] }
 0x20e   :  { %3704 = vmatpush.msrb.mxu1 %v3703_v40  ;;  %3859 = vmatpush.msrb.mxu3 %v7408_v58  ;;  %v7558_v24 = vsub.f32 %v2961_v21, %v7517_v30  ;;  %v2934_v40 = vld [vmem:[%s7921_s5 + $0x100] sm:$0xff]  ;;  %v8080_v39 = vand.u32 4294901760, %v7566_v42  ;;  %v8083_v4 = vand.u32 4294901760, %v7573_v14 }
 0x20f   :  { %3665 = vmatpush.msrb.mxu0 %v7425_v44  ;;  %3811 = vmatpush.msrb.mxu2 %v7441_v54  ;;  %v8077_v21 = vand.u32 4294901760, %v7543_v48  ;;  %v3751_v26 = vand.u32 4294901760, %v3750_v9  ;;  %v2955_v9 = vld [vmem:[%s7921_s5 + $0x1a8] sm:$0xff] }
 0x210   :  { %3710 = vmatpush.msrb.mxu1 %v3709_v2  ;;  %3861 = vmatpush.msrb.mxu3 %v7425_v44  ;;  %v3739_v2 = vand.u32 4294901760, %v3738_v52  ;;  %v8078_v12 = vand.u32 4294901760, %v7558_v24  ;;  %v7605_v52 = vsub.f32 %v2936_v51, %v7563_v49  ;;  %v7620_v51 = vsub.f32 %v2959_v41, %v7582_v6 }
 0x211   :  { %3667 = vmatpush.msrb.mxu0 %v7443_v35  ;;  %3814 = vmatpush.msrb.mxu2 %v7458_v1  ;;  %v3762_v43 = vsub.f32 %v7543_v48, %v8077_v21  ;;  %v3768_v21 = vsub.f32 %v7566_v42, %v8080_v39  ;;  %v2954_v39 = vld [vmem:[%s7921_s5 + $0x1a0] sm:$0xff]  ;;  %v7665_v41 = vand.u32 4294901760, %v2955_v9 }
 0x212   :  { %3716 = vmatpush.msrb.mxu1 %v3715_v16  ;;  %3863 = vmatpush.msrb.mxu3 %v7443_v35  ;;  %v3745_v16 = vand.u32 4294901760, %v3744_v60  ;;  %v7607_v60 = vand.u32 4294901760, %v2934_v40  ;;  %8391 = vst [vmem:[#allocation5_spill] sm:$0xff] %v7620_v51 }
 0x213   :  { %3669 = vmatpush.msrb.mxu0 %v7447_v5  ;;  %3817 = vmatpush.msrb.mxu2 %v7474_v23  ;;  %v3763_v13 = vand.u32 4294901760, %v3762_v43  ;;  %v2953_v43 = vld [vmem:[%s7921_s5 + $0x198] sm:$0xff] }
 0x214   :  { %3722 = vmatpush.msrb.mxu1 %v3721_v0  ;;  %3865 = vmatpush.msrb.mxu3 %v7447_v5  ;;  %v7595_v0 = vand.u32 4294901760, %v2958_v17  ;;  %8390 = vst [vmem:[#allocation7_spill] sm:$0xff] %v7607_v60 }
 0x215   :  { %3671 = vmatpush.msrb.mxu0 %v7476_v20  ;;  %3820 = vmatpush.msrb.mxu2 %v7483_v50 }
 0x216   :  { %3728 = vmatpush.msrb.mxu1 %v3727_v11  ;;  %3867 = vmatpush.msrb.mxu3 %v7476_v20  ;;  %v3756_v11 = vsub.f32 %v7524_v36, %v8071_v18  ;;  %v8392_v18 = vld [vmem:[#allocation26_spill] sm:$0xff] }
 0x217   :  { %3673 = vmatpush.msrb.mxu0 %v7492_v59  ;;  %3823 = vmatpush.msrb.mxu2 %v7509_v55  ;;  %v2582_v33 = vadd.f32 %v2581_v62, %v8392_v18  ;;  %v7636_v18 = vsub.f32 %v2958_v17, %v7595_v0  ;;  %v2736_v22 = vpop.f32.mrf.mxu0  ;;  %v7663_v17 = vsub.f32 %v2957_v56, %v7627_v38  ;;  %v8395_v56 = vand.u32 4294901760, %v7605_v52 }
 0x218   :  { %3734 = vmatpush.msrb.mxu1 %v3733_v37  ;;  %3869 = vmatpush.msrb.mxu3 %v7492_v59  ;;  %v7617_v37 = vsub.f32 %v2935_v15, %v7577_v19  ;;  %v4037_v15 = vsub.f32 %v7558_v24, %v8078_v12  ;;  %v3757_v62 = vand.u32 4294901760, %v3756_v11  ;;  %v7648_v12 = vsub.f32 %v2934_v40, %v7607_v60 }
 0x219   :  { %3675 = vmatpush.msrb.mxu0 %v7511_v46  ;;  %3826 = vmatpush.msrb.mxu2 %v7524_v36  ;;  %8393 = vst [vmem:[#allocation3_spill] sm:$0xff] %v7636_v18  ;;  %v2683_v40 = vadd.f32 %v2682_v27, %v2582_v33  ;;  %v8394_v11 = vand.u32 4294901760, %v7593_v45  ;;  %v3769_v33 = vand.u32 4294901760, %v3768_v21 }
 0x21a   :  { %3740 = vmatpush.msrb.mxu1 %v3739_v2  ;;  %3871 = vmatpush.msrb.mxu3 %v7511_v46  ;;  %v7638_v2 = vand.u32 4294901760, %v2956_v29  ;;  %v8397_v21 = vand.u32 4294901760, %v7617_v37 }
 0x21b   :  { %3677 = vmatpush.msrb.mxu0 %v7526_v8  ;;  %3829 = vmatpush.msrb.mxu2 %v7543_v48  ;;  %v4043_v3 = vsub.f32 %v7593_v45, %v8394_v11  ;;  %v7684_v11 = vand.u32 4294901760, %v2954_v39  ;;  %v2737_v27 = vadd.f32 %v2736_v22, %v2683_v40  ;;  %v7700_v22 = vsub.f32 %v2955_v9, %v7665_v41 }
 0x21c   :  { %3746 = vmatpush.msrb.mxu1 %v3745_v16  ;;  %3873 = vmatpush.msrb.mxu3 %v7526_v8  ;;  %v3687_v16 = vsub.f32 %v7573_v14, %v8083_v4  ;;  %v4038_v4 = vand.u32 4294901760, %v4037_v15  ;;  %v3774_v15 = vsub.f32 %v7605_v52, %v8395_v56  ;;  %v8396_v8 = vand.u32 4294901760, %v7620_v51  ;;  %v2952_v56 = vld [vmem:[%s7921_s5 + $0x190] sm:$0xff] }
 0x21d   :  { %3679 = vmatpush.msrb.mxu0 %v7563_v49  ;;  %3832 = vmatpush.msrb.mxu2 %v7566_v42  ;;  %v7702_v40 = vand.u32 4294901760, %v2953_v43  ;;  %v8400_v9 = vand.u32 4294901760, %v7367_v28  ;;  %v8401_v45 = vand.u32 4294901760, %v7648_v12  ;;  %v4288_v28 = vld [vmem:[%s7922_s4] sm:$0xf] }
 0x21e   :  { %3752 = vmatpush.msrb.mxu1 %v3751_v26  ;;  %3875 = vmatpush.msrb.mxu3 %v7563_v49  ;;  %v7674_v26 = vsub.f32 %v2956_v29, %v7638_v2  ;;  %v3688_v29 = vand.u32 4294901760, %v3687_v16  ;;  %v2951_v49 = vld [vmem:[%s7921_s5 + $0x188] sm:$0xff] }
 0x21f   :  { %3681 = vmatpush.msrb.mxu0 %v7577_v19  ;;  %3835 = vmatpush.msrb.mxu2 %v7605_v52 }
 0x220   :  { %3758 = vmatpush.msrb.mxu1 %v3757_v62  ;;  %3877 = vmatpush.msrb.mxu3 %v7577_v19  ;;  %v4049_v62 = vsub.f32 %v7620_v51, %v8396_v8  ;;  %v3780_v19 = vsub.f32 %v7617_v37, %v8397_v21  ;;  %v8398_v8 = vand.u32 4294901760, %v7573_v14  ;;  %v4044_v21 = vand.u32 4294901760, %v4043_v3 }
 0x221   :  { %3683 = vmatpush.msrb.mxu0 %v7607_v60  ;;  %3838 = vmatpush.msrb.mxu2 %v7617_v37  ;;  %v2775_v46 = vpop.f32.mrf.mxu1  ;;  %v8399_v51 = vand.u32 4294901760, %v7636_v18  ;;  %v3786_v3 = vsub.f32 %v7648_v12, %v8401_v45  ;;  %v2950_v45 = vld [vmem:[%s7921_s5 + $0x180] sm:$0xff] }
 0x222   :  { %3764 = vmatpush.msrb.mxu1 %v3763_v13  ;;  %3879 = vmatpush.msrb.mxu3 %v7607_v60  ;;  %v2844_v16 = vpop.f32.mrf.mxu2  ;;  %v2776_v59 = vadd.f32 %v2775_v46, %v2737_v27  ;;  %v4050_v46 = vand.u32 4294901760, %v4049_v62  ;;  %v3781_v27 = vand.u32 4294901760, %v3780_v19  ;;  %v7740_v62 = vand.u32 4294901760, %v2951_v49 }
 0x223   :  { %3689 = vmatmul.f32.vlgmr.msrb.gmra.mxu0 %v3688_v29  ;;  %3883 = vmatmul.f32.vlgmr.msrb.gmra.mxu3 %v8398_v8  ;;  %v4055_v13 = vsub.f32 %v7636_v18, %v8399_v51  ;;  %v3775_v29 = vand.u32 4294901760, %v3774_v15  ;;  %v7719_v8 = vsub.f32 %v2954_v39, %v7684_v11  ;;  %v7721_v51 = vand.u32 4294901760, %v2952_v56 }
 0x224   :  { %3890 = vmatpush.msra.mxu0 %v8400_v9  ;;  %4039 = vmatpush.msra.mxu3 %v4038_v4  ;;  %v2845_v60 = vadd.f32 %v2844_v16, %v2776_v59  ;;  %v2881_v18 = vpop.f32.mrf.mxu3  ;;  %v2889_v4 = vperm.slane %v4288_v28, 3  ;;  %v8402_v39 = vand.u32 4294901760, %v7382_v57  ;;  %v7738_v15 = vsub.f32 %v2953_v43, %v7702_v40 }
 0x225   :  { %3770 = vmatpush.msrb.mxu1 %v3769_v33  ;;  %3841 = vmatpush.msrb.mxu2 %v7648_v12  ;;  %v8403_v33 = vand.u32 4294901760, %v7663_v17  ;;  %v4056_v16 = vand.u32 4294901760, %v4055_v13  ;;  %v8405_v28 = vand.u32 4294901760, %v7393_v31  ;;  %v7750_v43 = vsub.f32 %v2952_v56, %v7721_v51 }
 0x226   :  { %3844 = vmatmul.f32.vlgmr.msrb.gmra.mxu2 %v7573_v14  ;;  %3894 = vmatpush.msra.mxu0 %v8402_v39  ;;  %v8404_v14 = vand.u32 4294901760, %v7674_v26  ;;  %v2882_v9 = vadd.f32 %v2881_v18, %v2845_v60  ;;  %v3787_v39 = vand.u32 4294901760, %v3786_v3  ;;  %v7752_v59 = vand.u32 4294901760, %v2950_v45 }
 0x227   :  { %v4061_v19 = vsub.f32 %v7663_v17, %v8403_v33  ;;  %3998 = vmatpush.msra.mxu2 %v7517_v30  ;;  %4045 = vmatpush.msra.mxu3 %v4044_v21  ;;  %v4078_v33 = vand.u32 4294901760, %v7719_v8  ;;  %v8406_v13 = vand.u32 4294901760, %v7401_v34  ;;  %v8407_v31 = vand.u32 4294901760, %v7700_v22 }
 0x228   :  { %v4067_v57 = vsub.f32 %v7674_v26, %v8404_v14  ;;  %3776 = vmatpush.msrb.mxu1 %v3775_v29  ;;  %3898 = vmatpush.msra.mxu0 %v8405_v28  ;;  %v2897_v21 = vadd.f32 %v2889_v4, %v2882_v9  ;;  %v4084_v29 = vand.u32 4294901760, %v7738_v15  ;;  %v7762_v56 = vsub.f32 %v2951_v49, %v7740_v62 }
 0x229   :  { %4000 = vmatpush.msra.mxu2 %v7560_v25  ;;  %4051 = vmatpush.msra.mxu3 %v4050_v46  ;;  %v4062_v60 = vand.u32 4294901760, %v4061_v19  ;;  %v4073_v18 = vsub.f32 %v7700_v22, %v8407_v31  ;;  %v4079_v34 = vsub.f32 %v7719_v8, %v4078_v33  ;;  %v4090_v4 = vand.u32 4294901760, %v7750_v43 }
 0x22a   :  { %3782 = vmatpush.msrb.mxu1 %v3781_v27  ;;  %3902 = vmatpush.msra.mxu0 %v8406_v13  ;;  %v4068_v3 = vand.u32 4294901760, %v4067_v57  ;;  %v2901_v46 = vmax.f32 %v2897_v21, 0.0  ;;  %v8408_v27 = vand.u32 4294901760, %v7423_v63  ;;  %v7772_v19 = vsub.f32 %v2950_v45, %v7752_v59 }
 0x22b   :  { %4002 = vmatpush.msra.mxu2 %v7582_v6  ;;  %4057 = vmatpush.msra.mxu3 %v4056_v16  ;;  %v4074_v49 = vand.u32 4294901760, %v4073_v18  ;;  %v4085_v63 = vsub.f32 %v7738_v15, %v4084_v29  ;;  %v4096_v16 = vand.u32 4294901760, %v7762_v56  ;;  %v8409_v14 = vand.u32 4294901760, %v7441_v54 }
 0x22c   :  { %3788 = vmatpush.msrb.mxu1 %v3787_v39  ;;  %3906 = vmatpush.msra.mxu0 %v8408_v27  ;;  %v2968_v45 = vsel %vm2966_vm0, %v2901_v46, 0  ;;  %v4080_v57 = vand.u32 4294901760, %v4079_v34  ;;  %v4102_v9 = vand.u32 4294901760, %v7772_v19  ;;  %v8410_v28 = vand.u32 4294901760, %v7458_v1  ;;  %v8426_v46 = vld [vmem:[#allocation2_spill] sm:$0xff]  ;;  %v8428_v27 = vld [vmem:[#allocation25_spill] sm:$0xff] }
 0x22d   :  { %3790 = vmatmul.f32.vlgmr.msrb.gmra.mxu1 %v7531_v47  ;;  %4004 = vmatpush.msra.mxu2 %v7595_v0  ;;  %v7794_v54 = vand.u32 4294901760, %v2968_v45  ;;  %v4086_v39 = vand.u32 4294901760, %v4085_v63  ;;  %v8411_v21 = vand.u32 4294901760, %v7474_v23  ;;  %v8412_v13 = vand.u32 4294901760, %v7483_v50  ;;  %v8432_v63 = vld [vmem:[#allocation7_spill] sm:$0xff] }
 0x22e   :  { %3957 = vmatpush.msra.mxu1 %v7346_v53  ;;  %4063 = vmatpush.msra.mxu3 %v4062_v60  ;;  %v4091_v53 = vsub.f32 %v7750_v43, %v4090_v4  ;;  %v8414_v50 = vand.u32 4294901760, %v7524_v36  ;;  %v8415_v18 = vand.u32 4294901760, %v7543_v48  ;;  %v8419_v36 = vld [vmem:[#allocation10_spill] sm:$0xff]  ;;  %v8420_v48 = vld [vmem:[#allocation21_spill] sm:$0xff] }
 0x22f   :  { %3910 = vmatpush.msra.mxu0 %v8409_v14  ;;  %4006 = vmatpush.msra.mxu2 %v7627_v38  ;;  %v7810_v60 = vsub.f32 %v2968_v45, %v7794_v54  ;;  %v8433_v14 = vand.u32 4294901760, %v7663_v17  ;;  %v8434_v45 = vand.u32 4294901760, %v7674_v26 }
 0x230   :  { %3959 = vmatpush.msra.mxu1 %v7356_v7  ;;  %4069 = vmatpush.msra.mxu3 %v4068_v3  ;;  %v4097_v7 = vsub.f32 %v7762_v56, %v4096_v16  ;;  %v4092_v1 = vand.u32 4294901760, %v4091_v53  ;;  %v8423_v3 = vld [vmem:[#allocation24_spill] sm:$0xff] }
 0x231   :  { %3914 = vmatpush.msra.mxu0 %v8410_v28  ;;  %4008 = vmatpush.msra.mxu2 %v7638_v2 }
 0x232   :  { %3961 = vmatpush.msra.mxu1 %v7369_v32  ;;  %4075 = vmatpush.msra.mxu3 %v4074_v49  ;;  %v4103_v32 = vsub.f32 %v7772_v19, %v4102_v9  ;;  %v4098_v23 = vand.u32 4294901760, %v4097_v7 }
 0x233   :  { %3918 = vmatpush.msra.mxu0 %v8411_v21  ;;  %4010 = vmatpush.msra.mxu2 %v7665_v41 }
 0x234   :  { %3963 = vmatpush.msra.mxu1 %v7374_v10  ;;  %4081 = vmatpush.msra.mxu3 %v4080_v57  ;;  %v8413_v10 = vand.u32 4294901760, %v7509_v55  ;;  %v4104_v31 = vand.u32 4294901760, %v4103_v32  ;;  %v8417_v55 = vand.u32 4294901760, %v7605_v52  ;;  %v8422_v52 = vld [vmem:[#allocation5_spill] sm:$0xff] }
 0x235   :  { %3922 = vmatpush.msra.mxu0 %v8412_v13  ;;  %4012 = vmatpush.msra.mxu2 %v7684_v11  ;;  %v8429_v34 = vand.u32 4294901760, %v8422_v52 }
 0x236   :  { %3965 = vmatpush.msra.mxu1 %v7395_v61  ;;  %4087 = vmatpush.msra.mxu3 %v4086_v39  ;;  %v4023_v61 = vand.u32 4294901760, %v7810_v60 }
 0x237   :  { %3926 = vmatpush.msra.mxu0 %v8413_v10  ;;  %4014 = vmatpush.msra.mxu2 %v7702_v40 }
 0x238   :  { %3967 = vmatpush.msra.mxu1 %v7408_v58  ;;  %4093 = vmatpush.msra.mxu3 %v4092_v1  ;;  %v8416_v58 = vand.u32 4294901760, %v7566_v42  ;;  %v8421_v42 = vand.u32 4294901760, %v7648_v12  ;;  %v8427_v12 = vand.u32 4294901760, %v8419_v36 }
 0x239   :  { %3930 = vmatpush.msra.mxu0 %v8414_v50  ;;  %4016 = vmatpush.msra.mxu2 %v7721_v51 }
 0x23a   :  { %3969 = vmatpush.msra.mxu1 %v7425_v44  ;;  %4099 = vmatpush.msra.mxu3 %v4098_v23  ;;  %v4024_v44 = vsub.f32 %v7810_v60, %v4023_v61 }
 0x23b   :  { %3934 = vmatpush.msra.mxu0 %v8415_v18  ;;  %4018 = vmatpush.msra.mxu2 %v7740_v62 }
 0x23c   :  { %3971 = vmatpush.msra.mxu1 %v7443_v35  ;;  %4105 = vmatpush.msra.mxu3 %v4104_v31  ;;  %v8418_v35 = vand.u32 4294901760, %v7617_v37  ;;  %v8425_v37 = vand.u32 4294901760, %v7558_v24 }
 0x23d   :  { %4107 = vmatmul.f32.vlgmr.msra.gmra.mxu3 %v7794_v54  ;;  %3938 = vmatpush.msra.mxu0 %v8416_v58 }
 0x23e   :  { %4162 = vmatpush.msrb.mxu3 %v7517_v30  ;;  %3973 = vmatpush.msra.mxu1 %v7447_v5  ;;  %v4025_v5 = vand.u32 4294901760, %v4024_v44 }
 0x23f   :  { %4020 = vmatpush.msra.mxu2 %v7752_v59  ;;  %3942 = vmatpush.msra.mxu0 %v8417_v55 }
 0x240   :  { %4164 = vmatpush.msrb.mxu3 %v7560_v25  ;;  %3975 = vmatpush.msra.mxu1 %v7476_v20  ;;  %v8424_v20 = vld [vmem:[#allocation3_spill] sm:$0xff] }
 0x241   :  { %4117 = vmatpush.msrb.mxu2 %v7558_v24  ;;  %3946 = vmatpush.msra.mxu0 %v8418_v35  ;;  %v8430_v24 = vld [vmem:[#allocation8_spill] sm:$0xff]  ;;  %v8431_v49 = vand.u32 4294901760, %v8424_v20 }
 0x242   :  { %4166 = vmatpush.msrb.mxu3 %v7582_v6  ;;  %3977 = vmatpush.msra.mxu1 %v8420_v48 }
 0x243   :  { %4120 = vmatpush.msrb.mxu2 %v8419_v36  ;;  %3950 = vmatpush.msra.mxu0 %v8421_v42 }
 0x244   :  { %4168 = vmatpush.msrb.mxu3 %v7595_v0  ;;  %3979 = vmatpush.msra.mxu1 %v8423_v3 }
 0x245   :  { %4123 = vmatpush.msrb.mxu2 %v8422_v52  ;;  %3952 = vmatmul.f32.vlgmr.msra.gmra.mxu0 %v7531_v47 }
 0x246   :  { %4026 = vmatmul.f32.vlgmr.msra.gmra.mxu2 %v4025_v5  ;;  %4170 = vmatpush.msrb.mxu3 %v7627_v38 }
 0x247   :  { %4126 = vmatpush.msrb.mxu2 %v8424_v20  ;;  %4199 = vmatpush.msrb.mxu0 %v8425_v37 }
 0x248   :  { %3981 = vmatpush.msra.mxu1 %v8426_v46  ;;  %4172 = vmatpush.msrb.mxu3 %v7638_v2 }
 0x249   :  { %4129 = vmatpush.msrb.mxu2 %v7663_v17  ;;  %4203 = vmatpush.msrb.mxu0 %v8427_v12  ;;  %v3202_v17 = vpop.f32.mrf.mxu3 }
 0x24a   :  { %3983 = vmatpush.msra.mxu1 %v8428_v27  ;;  %4174 = vmatpush.msrb.mxu3 %v7665_v41 }
 0x24b   :  { %4132 = vmatpush.msrb.mxu2 %v7674_v26  ;;  %4207 = vmatpush.msrb.mxu0 %v8429_v34 }
 0x24c   :  { %3985 = vmatpush.msra.mxu1 %v8430_v24  ;;  %4176 = vmatpush.msrb.mxu3 %v7684_v11 }
 0x24d   :  { %4135 = vmatpush.msrb.mxu2 %v7700_v22  ;;  %4211 = vmatpush.msrb.mxu0 %v8431_v49 }
 0x24e   :  { %3987 = vmatpush.msra.mxu1 %v8432_v63  ;;  %4178 = vmatpush.msrb.mxu3 %v7702_v40 }
 0x24f   :  { %3989 = vmatmul.f32.vlgmr.msra.gmra.mxu1 %v7531_v47  ;;  %4138 = vmatpush.msrb.mxu2 %v7719_v8  ;;  %v8435_v47 = vand.u32 4294901760, %v7700_v22 }
 0x250   :  { %4215 = vmatpush.msrb.mxu0 %v8433_v14  ;;  %4254 = vmatpush.msrb.mxu1 %v7517_v30  ;;  %v3008_v30 = vpop.f32.mrf.mxu0 }
 0x251   :  { %4141 = vmatpush.msrb.mxu2 %v7738_v15  ;;  %4180 = vmatpush.msrb.mxu3 %v7721_v51 }
 0x252   :  { %4219 = vmatpush.msrb.mxu0 %v8434_v45  ;;  %4256 = vmatpush.msrb.mxu1 %v7560_v25  ;;  %v3109_v25 = vpop.f32.mrf.mxu1 }
 0x253   :  { %4144 = vmatpush.msrb.mxu2 %v7750_v43  ;;  %4182 = vmatpush.msrb.mxu3 %v7740_v62 }
 0x254   :  { %4223 = vmatpush.msrb.mxu0 %v8435_v47  ;;  %4258 = vmatpush.msrb.mxu1 %v7582_v6 }
 0x255   :  { %4147 = vmatpush.msrb.mxu2 %v7762_v56  ;;  %4184 = vmatpush.msrb.mxu3 %v7752_v59 }
 0x256   :  { %4227 = vmatpush.msrb.mxu0 %v4078_v33  ;;  %4260 = vmatpush.msrb.mxu1 %v7595_v0 }
 0x257   :  { %4188 = vmatmul.f32.vlgmr.msrb.gmra.mxu3 %v4023_v61  ;;  %4150 = vmatpush.msrb.mxu2 %v7772_v19 }
 0x258   :  { %4231 = vmatpush.msrb.mxu0 %v4084_v29  ;;  %4262 = vmatpush.msrb.mxu1 %v7627_v38  ;;  %v4287_v38 = vld [vmem:[%s7923_s6] ss:$0 sm:$0xff] }
 0x259   :  { %4153 = vmatmul.f32.vlgmr.msrb.gmra.mxu2 %v7810_v60  ;;  %v3009_v6 = vadd.f32 %v4287_v38, %v3008_v30 }
 0x25a   :  { %4235 = vmatpush.msrb.mxu0 %v4090_v4  ;;  %4264 = vmatpush.msrb.mxu1 %v7638_v2 }
 0x25b   :  { %v3110_v0 = vadd.f32 %v3109_v25, %v3009_v6 }
 0x25c   :  { %4239 = vmatpush.msrb.mxu0 %v4096_v16  ;;  %4266 = vmatpush.msrb.mxu1 %v7665_v41  ;;  %v3163_v41 = vpop.f32.mrf.mxu2  ;;  %v3271_v26 = vpop.f32.mrf.mxu0 }
 0x25d   :  { %v3164_v2 = vadd.f32 %v3163_v41, %v3110_v0 }
 0x25e   :  { %4243 = vmatpush.msrb.mxu0 %v4102_v9  ;;  %4268 = vmatpush.msrb.mxu1 %v7684_v11 }
 0x25f   :  { %4245 = vmatmul.f32.vlgmr.msrb.gmra.mxu0 %v7794_v54  ;;  %v3203_v11 = vadd.f32 %v3202_v17, %v3164_v2 }
 0x260   :  { %4270 = vmatpush.msrb.mxu1 %v7702_v40 }
 0x261   :  { %v3272_v40 = vadd.f32 %v3271_v26, %v3203_v11 }
 0x262   :  { %4272 = vmatpush.msrb.mxu1 %v7721_v51  ;;  %v3450_v15 = vpop.f32.mrf.mxu3 }
 0x264   :  { %4274 = vmatpush.msrb.mxu1 %v7740_v62 }
 0x265   :  { %v3349_v51 = vpop.f32.mrf.mxu2 }
 0x266   :  { %4276 = vmatpush.msrb.mxu1 %v7752_v59  ;;  %v3308_v22 = vpop.f32.mrf.mxu1 }
 0x267   :  { %4278 = vmatmul.f32.vlgmr.msrb.gmra.mxu1 %v7794_v54  ;;  %v3309_v8 = vadd.f32 %v3308_v22, %v3272_v40 }
 0x269   :  { %v3350_v59 = vadd.f32 %v3349_v51, %v3309_v8 }
 0x26b   :  { %v3451_v33 = vadd.f32 %v3450_v15, %v3350_v59 }
 0x27e   :  { %v3504_v62 = vpop.f32.mrf.mxu0 }
 0x27f   :  { %v3505_v29 = vadd.f32 %v3504_v62, %v3451_v33 }
 0x284   :  { %v3649_v16 = vpop.f32.mrf.mxu3 }
 0x287   :  { %v3612_v4 = vpop.f32.mrf.mxu2 }
 0x288   :  { %v3543_v43 = vpop.f32.mrf.mxu1 }
 0x289   :  { %v3544_v56 = vadd.f32 %v3543_v43, %v3505_v29 }
 0x28b   :  { %v3613_v19 = vadd.f32 %v3612_v4, %v3544_v56 }
 0x28d   :  { %v3650_v53 = vadd.f32 %v3649_v16, %v3613_v19 }
 0x2a0   :  { %v3690_v57 = vpop.f32.mrf.mxu0 }
 0x2a1   :  { %v3691_v28 = vadd.f32 %v3690_v57, %v3650_v53 }
 0x2a6   :  { %v3884_v21 = vpop.f32.mrf.mxu3 }
 0x2a9   :  { %v3845_v39 = vpop.f32.mrf.mxu2 }
 0x2aa   :  { %v3791_v9 = vpop.f32.mrf.mxu1 }
 0x2ab   :  { %v3792_v54 = vadd.f32 %v3791_v9, %v3691_v28 }
 0x2ad   :  { %v3846_v7 = vadd.f32 %v3845_v39, %v3792_v54 }
 0x2af   :  { %v3885_v32 = vadd.f32 %v3884_v21, %v3846_v7 }
 0x2c0   :  { %v4108_v31 = vpop.f32.mrf.mxu3 }
 0x2c2   :  { %v3953_v1 = vpop.f32.mrf.mxu0 }
 0x2c3   :  { %v3954_v60 = vadd.f32 %v3953_v1, %v3885_v32 }
 0x2c9   :  { %v4027_v10 = vpop.f32.mrf.mxu2 }
 0x2cc   :  { %v3990_v13 = vpop.f32.mrf.mxu1 }
 0x2cd   :  { %v3991_v23 = vadd.f32 %v3990_v13, %v3954_v60 }
 0x2cf   :  { %v4028_v50 = vadd.f32 %v4027_v10, %v3991_v23 }
 0x2d1   :  { %v4109_v61 = vadd.f32 %v4108_v31, %v4028_v50 }
 0x2da   :  { %v4189_v44 = vpop.f32.mrf.mxu3 }
 0x2dc   :  { %v4154_v18 = vpop.f32.mrf.mxu2  ;;  %v4246_v35 = vpop.f32.mrf.mxu0 }
 0x2dd   :  { %v4155_v58 = vadd.f32 %v4154_v18, %v4109_v61 }
 0x2df   :  { %v4190_v55 = vadd.f32 %v4189_v44, %v4155_v58 }
 0x2e1   :  { %v4247_v36 = vadd.f32 %v4246_v35, %v4190_v55 }
 0x2e4   :  { %v4279_v5 = vpop.f32.mrf.mxu1 }
 0x2e5   :  { %v4280_v48 = vadd.f32 %v4279_v5, %v4247_v36 }
 0x2e7   :  { %4282 = vst.msk [vmem:[%s7924_s7] sm:$0xff] %vm2966_vm0, %v4280_v48 }

</bundles_post_ra>
